<compile_context>
chip_gen: v6e
topology: v6e:2x2x1
jax: 0.10.0
libtpu: 0.0.40
codegen_flags: <defaults>
</compile_context>

<pallas_src>
import functools
import math

import jax
import jax.numpy as jnp
from jax.experimental import pallas as pl
from jax.experimental.pallas import tpu as pltpu

# ---------------- small, self-consistent config (scaled-down module) ----------------
NUM_CHANNELS = 4
SEGMENT_LENGTH = 16
SEQ_LENGTH = 128
NUM_SEGMENTS = SEQ_LENGTH // SEGMENT_LENGTH          # 8
EMBED_DIM = 64
DEPTH = 2
NUM_HEADS = 4
DEC_EMBED_DIM = 32
DEC_NUM_HEADS = 4
MLP_RATIO = 4.0
D_IN = NUM_CHANNELS * SEGMENT_LENGTH                 # 64  (also the output dim)
FFN_DIM = int(EMBED_DIM * MLP_RATIO)                 # 256
DEC_FFN_DIM = int(DEC_EMBED_DIM * MLP_RATIO)         # 128
LN_EPS = 1e-5
BATCH = 2

assert EMBED_DIM % NUM_HEADS == 0 and DEC_EMBED_DIM % DEC_NUM_HEADS == 0


def _shift(n):
    s = int(round(math.log2(n)))
    assert (1 << s) == n, n
    return s


# ---------------- static slab layouts ----------------
def _mat_entries():
    es = [("seg_w", D_IN, EMBED_DIM)]
    for l in range(DEPTH):
        es += [
            (f"e_qkv_w{l}", EMBED_DIM, 3 * EMBED_DIM),
            (f"e_out_w{l}", EMBED_DIM, EMBED_DIM),
            (f"e_l1_w{l}", EMBED_DIM, FFN_DIM),
            (f"e_l2_w{l}", FFN_DIM, EMBED_DIM),
        ]
    es += [
        ("de_w", EMBED_DIM, DEC_EMBED_DIM),
        ("dsa_qkv_w", DEC_EMBED_DIM, 3 * DEC_EMBED_DIM),
        ("dsa_out_w", DEC_EMBED_DIM, DEC_EMBED_DIM),
        ("dca_q_w", DEC_EMBED_DIM, DEC_EMBED_DIM),
        ("dca_kv_w", DEC_EMBED_DIM, 2 * DEC_EMBED_DIM),
        ("dca_out_w", DEC_EMBED_DIM, DEC_EMBED_DIM),
        ("d_l1_w", DEC_EMBED_DIM, DEC_FFN_DIM),
        ("d_l2_w", DEC_FFN_DIM, DEC_EMBED_DIM),
        ("pred_w", DEC_EMBED_DIM, D_IN),
    ]
    return es


def _vec_entries():
    es = [("pos", NUM_SEGMENTS, EMBED_DIM), ("dpos", NUM_SEGMENTS, DEC_EMBED_DIM),
          ("seg_b", 1, EMBED_DIM)]
    for l in range(DEPTH):
        es += [
            (f"e_qkv_b{l}", 1, 3 * EMBED_DIM),
            (f"e_out_b{l}", 1, EMBED_DIM),
            (f"e_l1_b{l}", 1, FFN_DIM),
            (f"e_l2_b{l}", 1, EMBED_DIM),
            (f"e_n1_w{l}", 1, EMBED_DIM), (f"e_n1_b{l}", 1, EMBED_DIM),
            (f"e_n2_w{l}", 1, EMBED_DIM), (f"e_n2_b{l}", 1, EMBED_DIM),
        ]
    es += [
        ("norm_w", 1, EMBED_DIM), ("norm_b", 1, EMBED_DIM),
        ("de_b", 1, DEC_EMBED_DIM),
        ("dsa_qkv_b", 1, 3 * DEC_EMBED_DIM), ("dsa_out_b", 1, DEC_EMBED_DIM),
        ("dca_q_b", 1, DEC_EMBED_DIM), ("dca_kv_b", 1, 2 * DEC_EMBED_DIM),
        ("dca_out_b", 1, DEC_EMBED_DIM),
        ("d_l1_b", 1, DEC_FFN_DIM), ("d_l2_b", 1, DEC_EMBED_DIM),
        ("d_n1_w", 1, DEC_EMBED_DIM), ("d_n1_b", 1, DEC_EMBED_DIM),
        ("d_n2_w", 1, DEC_EMBED_DIM), ("d_n2_b", 1, DEC_EMBED_DIM),
        ("d_n3_w", 1, DEC_EMBED_DIM), ("d_n3_b", 1, DEC_EMBED_DIM),
        ("dnorm_w", 1, DEC_EMBED_DIM), ("dnorm_b", 1, DEC_EMBED_DIM),
        ("pred_b", 1, D_IN),
    ]
    return es


def _shelf_pack(entries, width):
    """Simple shelf packer: name -> (row_off, col_off, rows, cols), total_rows.

    Shrinks the bf16 weight slab from ~704 KiB (row-stacked, 256-lane padded)
    to ~288 KiB (~1.2x the raw data).  All offsets are static; row offsets stay
    multiples of 16 (bf16 sublane tile) by construction.
    """
    order = sorted(entries, key=lambda e: (-e[1], -e[2], e[0]))
    shelves = []                      # [row_off, height, cols_used]
    placed, top = {}, 0
    for name, r, c in order:
        assert c <= width and r % 16 == 0, (name, r, c)
        for sh in shelves:
            if r <= sh[1] and c <= width - sh[2]:
                placed[name] = (sh[0], sh[2], r, c)
                sh[2] += c
                break
        else:
            placed[name] = (top, 0, r, c)
            shelves.append([top, r, c])
            top += r
    return placed, top


MAT_ENTRIES = _mat_entries()
MAT_W = max(c for _, _, c in MAT_ENTRIES)            # 256
MAT_IDX, _mat_rows = _shelf_pack(MAT_ENTRIES, MAT_W)
MAT_ROWS = ((_mat_rows + 15) // 16) * 16

VEC_ENTRIES = _vec_entries()
VEC_W = max(c for _, _, c in VEC_ENTRIES)            # 256
VEC_IDX = {}
_off = 0
for _name, _r, _c in VEC_ENTRIES:
    VEC_IDX[_name] = (_off, _r, _c)
    _off += _r
VEC_ROWS = ((_off + 7) // 8) * 8


# ---------------- the fused forward kernel (bt batch elements per grid step) ----------------
def _mae_kernel(x_ref, mats_ref, vecs_ref, out_ref, *, bt):
    f32, bf16 = jnp.float32, jnp.bfloat16
    R = bt * NUM_SEGMENTS                              # stacked rows per step

    def M(name):                                       # static view into bf16 matrix slab
        r0, c0, r, c = MAT_IDX[name]
        return mats_ref[r0:r0 + r, c0:c0 + c]

    def V(name):                                       # static view into f32 vector slab
        off, r, c = VEC_IDX[name]
        return vecs_ref[off:off + r, :c]

    def mm(a, b):                                      # bf16 MXU operands, f32 accumulation
        return jnp.dot(a.astype(bf16), b.astype(bf16), preferred_element_type=f32)

    def mm_t(a, b):                                    # (M,K)x(N,K)->(M,N): trans-B on the MXU
        return jax.lax.dot_general(
            a.astype(bf16), b.astype(bf16),
            dimension_numbers=(((1,), (1,)), ((), ())),
            preferred_element_type=f32)

    def layer_norm(t, w_name, b_name):
        mu = jnp.mean(t, axis=-1, keepdims=True)
        tc = t - mu
        var = jnp.mean(tc * tc, axis=-1, keepdims=True)
        return tc * jax.lax.rsqrt(var + LN_EPS) * V(w_name) + V(b_name)

    s_sh = _shift(NUM_SEGMENTS)
    r_sh = _shift(R)

    def group_mask(e, nh):
        """(nh*R, e): 1 where the row's head-group owns the column's embedding dims."""
        hd_sh = _shift(e // nh)
        r = jax.lax.broadcasted_iota(jnp.int32, (nh * R, e), 0)
        c = jax.lax.broadcasted_iota(jnp.int32, (nh * R, e), 1)
        return (jnp.right_shift(r, r_sh) == jnp.right_shift(c, hd_sh)).astype(f32)

    def batch_mask(nh):
        """(R, nh*R): additive 0 for same-batch key, -1e30 across batch elements."""
        r = jax.lax.broadcasted_iota(jnp.int32, (R, nh * R), 0)
        c = jax.lax.broadcasted_iota(jnp.int32, (R, nh * R), 1)
        same = (jnp.right_shift(r, s_sh)
                == jnp.right_shift(jnp.bitwise_and(c, R - 1), s_sh))
        return jnp.where(same, 0.0, -1e30).astype(f32)

    # Grid-invariant masks: with the default single-step grid they are built once
    # per kernel invocation, so shipping them through the f32 slab would only add DMA.
    vmask_e = group_mask(EMBED_DIM, NUM_HEADS)
    vmask_d = group_mask(DEC_EMBED_DIM, DEC_NUM_HEADS)
    bmasks = {}
    if bt > 1:
        for nh in sorted({NUM_HEADS, DEC_NUM_HEADS}):
            bmasks[nh] = batch_mask(nh)

    def attention(q, k, v, nh, vmask, out_w, out_b):
        """All heads (and all stacked batch rows) at once.

        K/V are row-replicated per head and head-block masked; scores come from
        one trans-B matmul; the PV contraction and the per-head softmax
        denominator are fused into a single matmul against [V_blocks | vmask].
        NOTE: the softmax shift is the row-wide max across heads (valid shift,
        can underflow a head whose scores sit far below the global max).
        """
        e = q.shape[-1]
        hd = e // nh
        k_rep = jnp.tile(k, (nh, 1)) * vmask                       # (nh*R, e)
        v_rep = jnp.tile(v, (nh, 1)) * vmask                       # (nh*R, e)
        v_aug = jnp.concatenate([v_rep, vmask], axis=1)            # (nh*R, 2e)
        s = mm_t(q, k_rep) * (1.0 / math.sqrt(hd))                 # (R, nh*R)
        if bt > 1:
            s = s + bmasks[nh]                                     # cross-batch -> -inf
        p = jnp.exp(s - jnp.max(s, axis=-1, keepdims=True))
        nd = mm(p, v_aug)                                          # (R, 2e): [num | den]
        o = nd[:, :e] * pl.reciprocal(jnp.maximum(nd[:, e:], 1e-30), approx=True)
        return mm(o, M(out_w)) + V(out_b)

    x = x_ref[...]                                                 # (R, D_IN), bf16

    # --- SegmentEmbed.proj + pos_embed ---
    x = mm(x, M("seg_w")) + V("seg_b") + jnp.tile(V("pos"), (bt, 1))

    # --- encoder: nn.TransformerEncoderLayer x DEPTH (post-LN, ReLU, eval dropout) ---
    for l in range(DEPTH):                                         # static unroll
        e = EMBED_DIM
        qkv = mm(x, M(f"e_qkv_w{l}")) + V(f"e_qkv_b{l}")           # fused QKV
        a = attention(qkv[:, :e], qkv[:, e:2 * e], qkv[:, 2 * e:],
                      NUM_HEADS, vmask_e, f"e_out_w{l}", f"e_out_b{l}")
        x = layer_norm(x + a, f"e_n1_w{l}", f"e_n1_b{l}")
        h = jnp.maximum(mm(x, M(f"e_l1_w{l}")) + V(f"e_l1_b{l}"), 0.0)
        h = mm(h, M(f"e_l2_w{l}")) + V(f"e_l2_b{l}")
        x = layer_norm(x + h, f"e_n2_w{l}", f"e_n2_b{l}")

    x = layer_norm(x, "norm_w", "norm_b")

    # --- decoder embed + decoder pos embed ---
    x = mm(x, M("de_w")) + V("de_b") + jnp.tile(V("dpos"), (bt, 1))

    # --- decoder: nn.TransformerDecoderLayer (memory = its own input, post-LN, ReLU) ---
    de = DEC_EMBED_DIM
    mem = x
    qkv = mm(x, M("dsa_qkv_w")) + V("dsa_qkv_b")                   # fused QKV (self)
    a = attention(qkv[:, :de], qkv[:, de:2 * de], qkv[:, 2 * de:],
                  DEC_NUM_HEADS, vmask_d, "dsa_out_w", "dsa_out_b")
    x = layer_norm(x + a, "d_n1_w", "d_n1_b")

    q = mm(x, M("dca_q_w")) + V("dca_q_b")                         # cross-attn: fused K/V
    kv = mm(mem, M("dca_kv_w")) + V("dca_kv_b")
    a = attention(q, kv[:, :de], kv[:, de:],
                  DEC_NUM_HEADS, vmask_d, "dca_out_w", "dca_out_b")
    x = layer_norm(x + a, "d_n2_w", "d_n2_b")

    h = jnp.maximum(mm(x, M("d_l1_w")) + V("d_l1_b"), 0.0)
    h = mm(h, M("d_l2_w")) + V("d_l2_b")
    x = layer_norm(x + h, "d_n3_w", "d_n3_b")

    # --- decoder_norm + decoder_pred ---
    x = layer_norm(x, "dnorm_w", "dnorm_b")
    out_ref[...] = (mm(x, M("pred_w")) + V("pred_b")).astype(out_ref.dtype)


# ---------------- parameter packing (wrapper-side, trace-time / one-off) ----------------
def pack_params(p):
    de = DEC_EMBED_DIM
    mat_src = {
        "seg_w": p["seg_w"], "de_w": p["de_w"],
        "dsa_qkv_w": p["dsa_qkv_w"], "dsa_out_w": p["dsa_out_w"],
        "dca_q_w": p["dca_qkv_w"][:, :de], "dca_kv_w": p["dca_qkv_w"][:, de:],
        "dca_out_w": p["dca_out_w"],
        "d_l1_w": p["d_l1_w"], "d_l2_w": p["d_l2_w"], "pred_w": p["pred_w"],
    }
    vec_src = {
        "seg_b": p["seg_b"], "pos": p["pos"],
        "norm_w": p["norm_w"], "norm_b": p["norm_b"],
        "de_b": p["de_b"], "dpos": p["dpos"],
        "dsa_qkv_b": p["dsa_qkv_b"], "dsa_out_b": p["dsa_out_b"],
        "dca_q_b": p["dca_qkv_b"][:, :de], "dca_kv_b": p["dca_qkv_b"][:, de:],
        "dca_out_b": p["dca_out_b"],
        "d_l1_b": p["d_l1_b"], "d_l2_b": p["d_l2_b"],
        "d_n1_w": p["d_n1_w"], "d_n1_b": p["d_n1_b"],
        "d_n2_w": p["d_n2_w"], "d_n2_b": p["d_n2_b"],
        "d_n3_w": p["d_n3_w"], "d_n3_b": p["d_n3_b"],
        "dnorm_w": p["dnorm_w"], "dnorm_b": p["dnorm_b"],
        "pred_b": p["pred_b"],
    }
    for l in range(DEPTH):
        for nm in ("e_qkv_w", "e_out_w", "e_l1_w", "e_l2_w"):
            mat_src[f"{nm}{l}"] = p[nm][l]
        for nm in ("e_qkv_b", "e_out_b", "e_l1_b", "e_l2_b",
                   "e_n1_w", "e_n1_b", "e_n2_w", "e_n2_b"):
            vec_src[f"{nm}{l}"] = p[nm][l]

    mats = jnp.zeros((MAT_ROWS, MAT_W), jnp.float32)
    for name, r, c in MAT_ENTRIES:
        r0, c0, _, _ = MAT_IDX[name]
        a = jnp.asarray(mat_src[name], jnp.float32).reshape(r, c)
        mats = mats.at[r0:r0 + r, c0:c0 + c].set(a)
    mats = mats.astype(jnp.bfloat16)

    vecs = jnp.zeros((VEC_ROWS, VEC_W), jnp.float32)
    for name, r, c in VEC_ENTRIES:
        off, _, _ = VEC_IDX[name]
        a = jnp.asarray(vec_src[name], jnp.float32).reshape(r, c)
        vecs = vecs.at[off:off + r, :c].set(a)
    return mats, vecs


# ---------------- wrapper: BlockSpecs / grid ----------------
def mae_forward(x, params, batch_tile=None):
    """batch_tile=None (default) processes the whole batch in ONE grid step
    (best on single-TC v5e/v6e).  On v7x pass batch_tile=b//2 to keep a 2-long
    parallel grid axis so both TensorCores are used."""
    b = x.shape[0]
    bt = b if batch_tile is None else batch_tile
    assert b % bt == 0
    rows = bt * NUM_SEGMENTS
    assert rows & (rows - 1) == 0, "bt * NUM_SEGMENTS must be a power of two"

    x_rows = x.reshape(b * NUM_SEGMENTS, D_IN).astype(jnp.bfloat16)
    mats, vecs = pack_params(params)

    kernel = functools.partial(_mae_kernel, bt=bt)
    in_specs = [
        pl.BlockSpec((rows, D_IN), lambda i: (i, 0)),
        pl.BlockSpec(mats.shape, lambda i: (0, 0)),   # constant block: fetched once
        pl.BlockSpec(vecs.shape, lambda i: (0, 0)),   # constant block: fetched once
    ]
    out_spec = pl.BlockSpec((rows, D_IN), lambda i: (i, 0))

    out = pl.pallas_call(
        kernel,
        out_shape=jax.ShapeDtypeStruct((b * NUM_SEGMENTS, D_IN), jnp.float32),
        grid_spec=pltpu.PrefetchScalarGridSpec(
            num_scalar_prefetch=0,
            grid=(b // bt,),
            in_specs=in_specs,
            out_specs=out_spec,
        ),
        compiler_params=pltpu.CompilerParams(dimension_semantics=("parallel",)),
    )(x_rows, mats, vecs)
    return out.reshape(b, NUM_SEGMENTS, D_IN)


# ---------------- deterministic parameter init (synthetic; kernel layout) ----------------
def init_params(key):
    keys = iter(jax.random.split(key, 64))

    def w(shape, std=0.02):
        return (std * jax.random.normal(next(keys), shape)).astype(jnp.float32)

    def zeros(shape):
        return jnp.zeros(shape, jnp.float32)

    def ones(shape):
        return jnp.ones(shape, jnp.float32)

    p = {}
    p["seg_w"] = w((D_IN, EMBED_DIM)); p["seg_b"] = zeros((1, EMBED_DIM))
    p["pos"] = w((NUM_SEGMENTS, EMBED_DIM))
    p["e_qkv_w"] = w((DEPTH, EMBED_DIM, 3 * EMBED_DIM))
    p["e_qkv_b"] = zeros((DEPTH, 1, 3 * EMBED_DIM))
    p["e_out_w"] = w((DEPTH, EMBED_DIM, EMBED_DIM))
    p["e_out_b"] = zeros((DEPTH, 1, EMBED_DIM))
    p["e_l1_w"] = w((DEPTH, EMBED_DIM, FFN_DIM)); p["e_l1_b"] = zeros((DEPTH, 1, FFN_DIM))
    p["e_l2_w"] = w((DEPTH, FFN_DIM, EMBED_DIM)); p["e_l2_b"] = zeros((DEPTH, 1, EMBED_DIM))
    p["e_n1_w"] = ones((DEPTH, 1, EMBED_DIM)); p["e_n1_b"] = zeros((DEPTH, 1, EMBED_DIM))
    p["e_n2_w"] = ones((DEPTH, 1, EMBED_DIM)); p["e_n2_b"] = zeros((DEPTH, 1, EMBED_DIM))
    p["norm_w"] = ones((1, EMBED_DIM)); p["norm_b"] = zeros((1, EMBED_DIM))
    p["de_w"] = w((EMBED_DIM, DEC_EMBED_DIM)); p["de_b"] = zeros((1, DEC_EMBED_DIM))
    p["dpos"] = w((NUM_SEGMENTS, DEC_EMBED_DIM))
    p["dsa_qkv_w"] = w((DEC_EMBED_DIM, 3 * DEC_EMBED_DIM))
    p["dsa_qkv_b"] = zeros((1, 3 * DEC_EMBED_DIM))
    p["dsa_out_w"] = w((DEC_EMBED_DIM, DEC_EMBED_DIM))
    p["dsa_out_b"] = zeros((1, DEC_EMBED_DIM))
    p["dca_qkv_w"] = w((DEC_EMBED_DIM, 3 * DEC_EMBED_DIM))
    p["dca_qkv_b"] = zeros((1, 3 * DEC_EMBED_DIM))
    p["dca_out_w"] = w((DEC_EMBED_DIM, DEC_EMBED_DIM))
    p["dca_out_b"] = zeros((1, DEC_EMBED_DIM))
    p["d_l1_w"] = w((DEC_EMBED_DIM, DEC_FFN_DIM)); p["d_l1_b"] = zeros((1, DEC_FFN_DIM))
    p["d_l2_w"] = w((DEC_FFN_DIM, DEC_EMBED_DIM)); p["d_l2_b"] = zeros((1, DEC_EMBED_DIM))
    p["d_n1_w"] = ones((1, DEC_EMBED_DIM)); p["d_n1_b"] = zeros((1, DEC_EMBED_DIM))
    p["d_n2_w"] = ones((1, DEC_EMBED_DIM)); p["d_n2_b"] = zeros((1, DEC_EMBED_DIM))
    p["d_n3_w"] = ones((1, DEC_EMBED_DIM)); p["d_n3_b"] = zeros((1, DEC_EMBED_DIM))
    p["dnorm_w"] = ones((1, DEC_EMBED_DIM)); p["dnorm_b"] = zeros((1, DEC_EMBED_DIM))
    p["pred_w"] = w((DEC_EMBED_DIM, D_IN)); p["pred_b"] = zeros((1, D_IN))
    return p


# ---------------- pure-JAX f32 reference (same math, batched) ----------------
def mae_reference(x, p):
    b = x.shape[0]
    x = x.reshape(b, NUM_SEGMENTS, D_IN).astype(jnp.float32)

    def ln(t, w, bb):
        mu = t.mean(-1, keepdims=True)
        var = ((t - mu) ** 2).mean(-1, keepdims=True)
        return (t - mu) / jnp.sqrt(var + LN_EPS) * w + bb

    def mha(q_in, kv_in, w_in, b_in, w_out, b_out, nh):
        e = q_in.shape[-1]
        hd = e // nh
        q = q_in @ w_in[:, :e] + b_in[:, :e]
        k = kv_in @ w_in[:, e:2 * e] + b_in[:, e:2 * e]
        v = kv_in @ w_in[:, 2 * e:] + b_in[:, 2 * e:]
        sp = lambda t: t.reshape(t.shape[0], t.shape[1], nh, hd).transpose(0, 2, 1, 3)
        qh, kh, vh = sp(q), sp(k), sp(v)
        s = jnp.einsum("bhqd,bhkd->bhqk", qh, kh) / math.sqrt(hd)
        pr = jax.nn.softmax(s, axis=-1)
        o = jnp.einsum("bhqk,bhkd->bhqd", pr, vh).transpose(0, 2, 1, 3).reshape(q.shape)
        return o @ w_out + b_out

    x = x @ p["seg_w"] + p["seg_b"]
    x = x + p["pos"]
    for l in range(DEPTH):
        a = mha(x, x, p["e_qkv_w"][l], p["e_qkv_b"][l], p["e_out_w"][l], p["e_out_b"][l],
                NUM_HEADS)
        x = ln(x + a, p["e_n1_w"][l], p["e_n1_b"][l])
        h = jnp.maximum(x @ p["e_l1_w"][l] + p["e_l1_b"][l], 0.0) @ p["e_l2_w"][l] + p["e_l2_b"][l]
        x = ln(x + h, p["e_n2_w"][l], p["e_n2_b"][l])
    x = ln(x, p["norm_w"], p["norm_b"])
    x = x @ p["de_w"] + p["de_b"]
    x = x + p["dpos"]
    mem = x
    a = mha(x, x, p["dsa_qkv_w"], p["dsa_qkv_b"], p["dsa_out_w"], p["dsa_out_b"], DEC_NUM_HEADS)
    x = ln(x + a, p["d_n1_w"], p["d_n1_b"])
    a = mha(x, mem, p["dca_qkv_w"], p["dca_qkv_b"], p["dca_out_w"], p["dca_out_b"], DEC_NUM_HEADS)
    x = ln(x + a, p["d_n2_w"], p["d_n2_b"])
    h = jnp.maximum(x @ p["d_l1_w"] + p["d_l1_b"], 0.0) @ p["d_l2_w"] + p["d_l2_b"]
    x = ln(x + h, p["d_n3_w"], p["d_n3_b"])
    x = ln(x, p["dnorm_w"], p["dnorm_b"])
    return x @ p["pred_w"] + p["pred_b"]


if __name__ == "__main__":
    key = jax.random.PRNGKey(0)
    pkey, xkey = jax.random.split(key)
    params = init_params(pkey)
    x = jax.random.normal(xkey, (BATCH, SEQ_LENGTH, NUM_CHANNELS), dtype=jnp.float32)

    fwd = jax.jit(mae_forward)
    out = jax.block_until_ready(fwd(x, params))

    assert out.shape == (BATCH, NUM_SEGMENTS, NUM_CHANNELS * SEGMENT_LENGTH), out.shape
    assert bool(jnp.all(jnp.isfinite(out)))

    ref = mae_reference(x, params)
    max_err = float(jnp.max(jnp.abs(out - ref)))
    assert max_err < 5e-2, f"kernel/reference mismatch: {max_err}"

    print("KERNEL_OK")
</pallas_src>

<mosaic_0001>
module attributes {stable_mosaic.version = 11 : i64} {
  func.func @_mae_kernel(%arg0: i32, %arg1: memref<16x64xbf16, #tpu.memory_space<vmem>>, %arg2: memref<576x256xbf16, #tpu.memory_space<vmem>>, %arg3: memref<56x256xf32, #tpu.memory_space<vmem>>, %arg4: memref<16x64xf32, #tpu.memory_space<vmem>>) attributes {dimension_semantics = [#tpu.dimension_semantics<parallel>], iteration_bounds = array<i64: 1>, scalar_prefetch = 0 : i64, scratch_operands = 0 : i64, tpu.core_type = #tpu.core_type<tc>, window_params = [{transform_indices = @transform_0, window_bounds = array<i64: 16, 64>}, {pipeline_mode = #tpu.pipeline_mode<synchronous>, transform_indices = @transform_1, window_bounds = array<i64: 576, 256>}, {pipeline_mode = #tpu.pipeline_mode<synchronous>, transform_indices = @transform_2, window_bounds = array<i64: 56, 256>}, {transform_indices = @transform_3, window_bounds = array<i64: 16, 64>}]} {
    %0 = tpu.iota {dimensions = array<i32: 0>} : vector<64x64xi32>
    %1 = tpu.iota {dimensions = array<i32: 1>} : vector<64x64xi32>
    %c4_i32 = arith.constant 4 : i32
    %2 = vector.broadcast %c4_i32 : i32 to vector<64x64xi32>
    %3 = arith.shrsi %0, %2 : vector<64x64xi32>
    %c4_i32_0 = arith.constant 4 : i32
    %4 = vector.broadcast %c4_i32_0 : i32 to vector<64x64xi32>
    %5 = arith.shrsi %1, %4 : vector<64x64xi32>
    %6 = arith.cmpi eq, %3, %5 : vector<64x64xi32>
    %7 = arith.extui %6 : vector<64x64xi1> to vector<64x64xi32>
    %8 = arith.sitofp %7 : vector<64x64xi32> to vector<64x64xf32>
    %9 = tpu.iota {dimensions = array<i32: 0>} : vector<64x32xi32>
    %10 = tpu.iota {dimensions = array<i32: 1>} : vector<64x32xi32>
    %c4_i32_1 = arith.constant 4 : i32
    %11 = vector.broadcast %c4_i32_1 : i32 to vector<64x32xi32>
    %12 = arith.shrsi %9, %11 : vector<64x32xi32>
    %c3_i32 = arith.constant 3 : i32
    %13 = vector.broadcast %c3_i32 : i32 to vector<64x32xi32>
    %14 = arith.shrsi %10, %13 : vector<64x32xi32>
    %15 = arith.cmpi eq, %12, %14 : vector<64x32xi32>
    %16 = arith.extui %15 : vector<64x32xi1> to vector<64x32xi32>
    %17 = arith.sitofp %16 : vector<64x32xi32> to vector<64x32xf32>
    %18 = tpu.iota {dimensions = array<i32: 0>} : vector<16x64xi32>
    %19 = tpu.iota {dimensions = array<i32: 1>} : vector<16x64xi32>
    %c3_i32_2 = arith.constant 3 : i32
    %20 = vector.broadcast %c3_i32_2 : i32 to vector<16x64xi32>
    %21 = arith.shrsi %18, %20 : vector<16x64xi32>
    %c15_i32 = arith.constant 15 : i32
    %22 = vector.broadcast %c15_i32 : i32 to vector<16x64xi32>
    %23 = arith.andi %19, %22 : vector<16x64xi32>
    %c3_i32_3 = arith.constant 3 : i32
    %24 = vector.broadcast %c3_i32_3 : i32 to vector<16x64xi32>
    %25 = arith.shrsi %23, %24 : vector<16x64xi32>
    %26 = arith.cmpi eq, %21, %25 : vector<16x64xi32>
    %cst = arith.constant 0.000000e+00 : f32
    %cst_4 = arith.constant -1.000000e+30 : f32
    %27 = vector.broadcast %cst : f32 to vector<16x64xf32>
    %28 = vector.broadcast %cst_4 : f32 to vector<16x64xf32>
    %29 = arith.select %26, %27, %28 : vector<16x64xi1>, vector<16x64xf32>
    %c0 = arith.constant 0 : index
    %c0_5 = arith.constant 0 : index
    %30 = vector.load %arg1[%c0, %c0_5] : memref<16x64xbf16, #tpu.memory_space<vmem>>, vector<16x64xbf16>
    %c448 = arith.constant 448 : index
    %c192 = arith.constant 192 : index
    %31 = vector.load %arg2[%c448, %c192] : memref<576x256xbf16, #tpu.memory_space<vmem>>, vector<64x64xbf16>
    %cst_6 = arith.constant dense<0.000000e+00> : vector<16x64xf32>
    %32 = tpu.matmul %30, %31, %cst_6 {dimension_numbers = #tpu.dot_dimension_numbers<[1], [0], [0], [1], [0, 0, 1, 1], [], []>} : vector<16x64xbf16>, vector<64x64xbf16>, vector<16x64xf32> -> vector<16x64xf32>
    %c16 = arith.constant 16 : index
    %c0_7 = arith.constant 0 : index
    %33 = vector.load %arg3[%c16, %c0_7] : memref<56x256xf32, #tpu.memory_space<vmem>>, vector<1x64xf32>
    %34 = vector.broadcast %33 : vector<1x64xf32> to vector<16x64xf32>
    %35 = arith.addf %32, %34 : vector<16x64xf32>
    %c0_8 = arith.constant 0 : index
    %c0_9 = arith.constant 0 : index
    %36 = vector.load %arg3[%c0_8, %c0_9] : memref<56x256xf32, #tpu.memory_space<vmem>>, vector<8x64xf32>
    %37 = tpu.concatenate %36, %36 in 0 : vector<8x64xf32>, vector<8x64xf32> -> vector<16x64xf32>
    %38 = arith.addf %35, %37 : vector<16x64xf32>
    %c384 = arith.constant 384 : index
    %c0_10 = arith.constant 0 : index
    %39 = vector.load %arg2[%c384, %c0_10] : memref<576x256xbf16, #tpu.memory_space<vmem>>, vector<64x192xbf16>
    %40 = arith.truncf %38 : vector<16x64xf32> to vector<16x64xbf16>
    %cst_11 = arith.constant dense<0.000000e+00> : vector<16x192xf32>
    %41 = tpu.matmul %40, %39, %cst_11 {dimension_numbers = #tpu.dot_dimension_numbers<[1], [0], [0], [1], [0, 0, 1, 1], [], []>} : vector<16x64xbf16>, vector<64x192xbf16>, vector<16x192xf32> -> vector<16x192xf32>
    %c17 = arith.constant 17 : index
    %c0_12 = arith.constant 0 : index
    %42 = vector.load %arg3[%c17, %c0_12] : memref<56x256xf32, #tpu.memory_space<vmem>>, vector<1x192xf32>
    %43 = vector.broadcast %42 : vector<1x192xf32> to vector<16x192xf32>
    %44 = arith.addf %41, %43 : vector<16x192xf32>
    %45 = vector.extract_strided_slice %44 {offsets = [0, 0], sizes = [16, 64], strides = [1, 1]} : vector<16x192xf32> to vector<16x64xf32>
    %46 = vector.extract_strided_slice %44 {offsets = [0, 64], sizes = [16, 64], strides = [1, 1]} : vector<16x192xf32> to vector<16x64xf32>
    %47 = vector.extract_strided_slice %44 {offsets = [0, 128], sizes = [16, 64], strides = [1, 1]} : vector<16x192xf32> to vector<16x64xf32>
    %48 = tpu.concatenate %46, %46, %46, %46 in 0 : vector<16x64xf32>, vector<16x64xf32>, vector<16x64xf32>, vector<16x64xf32> -> vector<64x64xf32>
    %49 = arith.mulf %48, %8 : vector<64x64xf32>
    %50 = tpu.concatenate %47, %47, %47, %47 in 0 : vector<16x64xf32>, vector<16x64xf32>, vector<16x64xf32>, vector<16x64xf32> -> vector<64x64xf32>
    %51 = arith.mulf %50, %8 : vector<64x64xf32>
    %52 = tpu.concatenate %51, %8 in 1 : vector<64x64xf32>, vector<64x64xf32> -> vector<64x128xf32>
    %53 = arith.truncf %45 : vector<16x64xf32> to vector<16x64xbf16>
    %54 = arith.truncf %49 : vector<64x64xf32> to vector<64x64xbf16>
    %cst_13 = arith.constant dense<0.000000e+00> : vector<16x64xf32>
    %55 = tpu.matmul %53, %54, %cst_13 {dimension_numbers = #tpu.dot_dimension_numbers<[1], [1], [0], [0], [0, 0, 1, 0], [], []>} : vector<16x64xbf16>, vector<64x64xbf16>, vector<16x64xf32> -> vector<16x64xf32>
    %cst_14 = arith.constant 2.500000e-01 : f32
    %56 = vector.broadcast %cst_14 : f32 to vector<16x64xf32>
    %57 = arith.mulf %55, %56 : vector<16x64xf32>
    %58 = arith.addf %57, %29 : vector<16x64xf32>
    %cst_15 = arith.constant dense<0xFF800000> : vector<16xf32>
    %59 = vector.multi_reduction <maximumf>, %58, %cst_15 [1] : vector<16x64xf32> to vector<16xf32>
    %60 = vector.shape_cast %59 : vector<16xf32> to vector<16x1xf32>
    %61 = vector.broadcast %60 : vector<16x1xf32> to vector<16x64xf32>
    %62 = arith.subf %58, %61 : vector<16x64xf32>
    %63 = math.exp %62 : vector<16x64xf32>
    %64 = arith.truncf %63 : vector<16x64xf32> to vector<16x64xbf16>
    %65 = arith.truncf %52 : vector<64x128xf32> to vector<64x128xbf16>
    %cst_16 = arith.constant dense<0.000000e+00> : vector<16x128xf32>
    %66 = tpu.matmul %64, %65, %cst_16 {dimension_numbers = #tpu.dot_dimension_numbers<[1], [0], [0], [1], [0, 0, 1, 1], [], []>} : vector<16x64xbf16>, vector<64x128xbf16>, vector<16x128xf32> -> vector<16x128xf32>
    %67 = vector.extract_strided_slice %66 {offsets = [0, 0], sizes = [16, 64], strides = [1, 1]} : vector<16x128xf32> to vector<16x64xf32>
    %68 = vector.extract_strided_slice %66 {offsets = [0, 64], sizes = [16, 64], strides = [1, 1]} : vector<16x128xf32> to vector<16x64xf32>
    %cst_17 = arith.constant 1.000000e-30 : f32
    %69 = vector.broadcast %cst_17 : f32 to vector<16x64xf32>
    %70 = arith.maximumf %68, %69 : vector<16x64xf32>
    %71 = tpu.reciprocal %70 {approx = true} : vector<16x64xf32> -> vector<16x64xf32>
    %72 = arith.mulf %67, %71 : vector<16x64xf32>
    %c0_18 = arith.constant 0 : index
    %c160 = arith.constant 160 : index
    %73 = vector.load %arg2[%c0_18, %c160] : memref<576x256xbf16, #tpu.memory_space<vmem>>, vector<64x64xbf16>
    %74 = arith.truncf %72 : vector<16x64xf32> to vector<16x64xbf16>
    %cst_19 = arith.constant dense<0.000000e+00> : vector<16x64xf32>
    %75 = tpu.matmul %74, %73, %cst_19 {dimension_numbers = #tpu.dot_dimension_numbers<[1], [0], [0], [1], [0, 0, 1, 1], [], []>} : vector<16x64xbf16>, vector<64x64xbf16>, vector<16x64xf32> -> vector<16x64xf32>
    %c18 = arith.constant 18 : index
    %c0_20 = arith.constant 0 : index
    %76 = vector.load %arg3[%c18, %c0_20] : memref<56x256xf32, #tpu.memory_space<vmem>>, vector<1x64xf32>
    %77 = vector.broadcast %76 : vector<1x64xf32> to vector<16x64xf32>
    %78 = arith.addf %75, %77 : vector<16x64xf32>
    %79 = arith.addf %38, %78 : vector<16x64xf32>
    %cst_21 = arith.constant dense<0.000000e+00> : vector<16xf32>
    %80 = vector.multi_reduction <add>, %79, %cst_21 [1] : vector<16x64xf32> to vector<16xf32>
    %81 = vector.shape_cast %80 : vector<16xf32> to vector<16x1xf32>
    %cst_22 = arith.constant 6.400000e+01 : f32
    %82 = vector.broadcast %cst_22 : f32 to vector<16x1xf32>
    %83 = arith.divf %81, %82 : vector<16x1xf32>
    %84 = vector.broadcast %83 : vector<16x1xf32> to vector<16x64xf32>
    %85 = arith.subf %79, %84 : vector<16x64xf32>
    %86 = arith.mulf %85, %85 : vector<16x64xf32>
    %cst_23 = arith.constant dense<0.000000e+00> : vector<16xf32>
    %87 = vector.multi_reduction <add>, %86, %cst_23 [1] : vector<16x64xf32> to vector<16xf32>
    %88 = vector.shape_cast %87 : vector<16xf32> to vector<16x1xf32>
    %cst_24 = arith.constant 6.400000e+01 : f32
    %89 = vector.broadcast %cst_24 : f32 to vector<16x1xf32>
    %90 = arith.divf %88, %89 : vector<16x1xf32>
    %cst_25 = arith.constant 9.99999974E-6 : f32
    %91 = vector.broadcast %cst_25 : f32 to vector<16x1xf32>
    %92 = arith.addf %90, %91 : vector<16x1xf32>
    %93 = math.rsqrt %92 : vector<16x1xf32>
    %94 = vector.broadcast %93 : vector<16x1xf32> to vector<16x64xf32>
    %95 = arith.mulf %85, %94 : vector<16x64xf32>
    %c21 = arith.constant 21 : index
    %c0_26 = arith.constant 0 : index
    %96 = vector.load %arg3[%c21, %c0_26] : memref<56x256xf32, #tpu.memory_space<vmem>>, vector<1x64xf32>
    %97 = vector.broadcast %96 : vector<1x64xf32> to vector<16x64xf32>
    %98 = arith.mulf %95, %97 : vector<16x64xf32>
    %c22 = arith.constant 22 : index
    %c0_27 = arith.constant 0 : index
    %99 = vector.load %arg3[%c22, %c0_27] : memref<56x256xf32, #tpu.memory_space<vmem>>, vector<1x64xf32>
    %100 = vector.broadcast %99 : vector<1x64xf32> to vector<16x64xf32>
    %101 = arith.addf %98, %100 : vector<16x64xf32>
    %c256 = arith.constant 256 : index
    %c0_28 = arith.constant 0 : index
    %102 = vector.load %arg2[%c256, %c0_28] : memref<576x256xbf16, #tpu.memory_space<vmem>>, vector<64x256xbf16>
    %103 = arith.truncf %101 : vector<16x64xf32> to vector<16x64xbf16>
    %cst_29 = arith.constant dense<0.000000e+00> : vector<16x256xf32>
    %104 = tpu.matmul %103, %102, %cst_29 {dimension_numbers = #tpu.dot_dimension_numbers<[1], [0], [0], [1], [0, 0, 1, 1], [], []>} : vector<16x64xbf16>, vector<64x256xbf16>, vector<16x256xf32> -> vector<16x256xf32>
    %c19 = arith.constant 19 : index
    %c0_30 = arith.constant 0 : index
    %105 = vector.load %arg3[%c19, %c0_30] : memref<56x256xf32, #tpu.memory_space<vmem>>, vector<1x256xf32>
    %106 = vector.broadcast %105 : vector<1x256xf32> to vector<16x256xf32>
    %107 = arith.addf %104, %106 : vector<16x256xf32>
    %cst_31 = arith.constant 0.000000e+00 : f32
    %108 = vector.broadcast %cst_31 : f32 to vector<16x256xf32>
    %109 = arith.maximumf %107, %108 : vector<16x256xf32>
    %c0_32 = arith.constant 0 : index
    %c0_33 = arith.constant 0 : index
    %110 = vector.load %arg2[%c0_32, %c0_33] : memref<576x256xbf16, #tpu.memory_space<vmem>>, vector<256x64xbf16>
    %111 = arith.truncf %109 : vector<16x256xf32> to vector<16x256xbf16>
    %cst_34 = arith.constant dense<0.000000e+00> : vector<16x64xf32>
    %112 = tpu.matmul %111, %110, %cst_34 {dimension_numbers = #tpu.dot_dimension_numbers<[1], [0], [0], [1], [0, 0, 1, 1], [], []>} : vector<16x256xbf16>, vector<256x64xbf16>, vector<16x64xf32> -> vector<16x64xf32>
    %c20 = arith.constant 20 : index
    %c0_35 = arith.constant 0 : index
    %113 = vector.load %arg3[%c20, %c0_35] : memref<56x256xf32, #tpu.memory_space<vmem>>, vector<1x64xf32>
    %114 = vector.broadcast %113 : vector<1x64xf32> to vector<16x64xf32>
    %115 = arith.addf %112, %114 : vector<16x64xf32>
    %116 = arith.addf %101, %115 : vector<16x64xf32>
    %cst_36 = arith.constant dense<0.000000e+00> : vector<16xf32>
    %117 = vector.multi_reduction <add>, %116, %cst_36 [1] : vector<16x64xf32> to vector<16xf32>
    %118 = vector.shape_cast %117 : vector<16xf32> to vector<16x1xf32>
    %cst_37 = arith.constant 6.400000e+01 : f32
    %119 = vector.broadcast %cst_37 : f32 to vector<16x1xf32>
    %120 = arith.divf %118, %119 : vector<16x1xf32>
    %121 = vector.broadcast %120 : vector<16x1xf32> to vector<16x64xf32>
    %122 = arith.subf %116, %121 : vector<16x64xf32>
    %123 = arith.mulf %122, %122 : vector<16x64xf32>
    %cst_38 = arith.constant dense<0.000000e+00> : vector<16xf32>
    %124 = vector.multi_reduction <add>, %123, %cst_38 [1] : vector<16x64xf32> to vector<16xf32>
    %125 = vector.shape_cast %124 : vector<16xf32> to vector<16x1xf32>
    %cst_39 = arith.constant 6.400000e+01 : f32
    %126 = vector.broadcast %cst_39 : f32 to vector<16x1xf32>
    %127 = arith.divf %125, %126 : vector<16x1xf32>
    %cst_40 = arith.constant 9.99999974E-6 : f32
    %128 = vector.broadcast %cst_40 : f32 to vector<16x1xf32>
    %129 = arith.addf %127, %128 : vector<16x1xf32>
    %130 = math.rsqrt %129 : vector<16x1xf32>
    %131 = vector.broadcast %130 : vector<16x1xf32> to vector<16x64xf32>
    %132 = arith.mulf %122, %131 : vector<16x64xf32>
    %c23 = arith.constant 23 : index
    %c0_41 = arith.constant 0 : index
    %133 = vector.load %arg3[%c23, %c0_41] : memref<56x256xf32, #tpu.memory_space<vmem>>, vector<1x64xf32>
    %134 = vector.broadcast %133 : vector<1x64xf32> to vector<16x64xf32>
    %135 = arith.mulf %132, %134 : vector<16x64xf32>
    %c24 = arith.constant 24 : index
    %c0_42 = arith.constant 0 : index
    %136 = vector.load %arg3[%c24, %c0_42] : memref<56x256xf32, #tpu.memory_space<vmem>>, vector<1x64xf32>
    %137 = vector.broadcast %136 : vector<1x64xf32> to vector<16x64xf32>
    %138 = arith.addf %135, %137 : vector<16x64xf32>
    %c448_43 = arith.constant 448 : index
    %c0_44 = arith.constant 0 : index
    %139 = vector.load %arg2[%c448_43, %c0_44] : memref<576x256xbf16, #tpu.memory_space<vmem>>, vector<64x192xbf16>
    %140 = arith.truncf %138 : vector<16x64xf32> to vector<16x64xbf16>
    %cst_45 = arith.constant dense<0.000000e+00> : vector<16x192xf32>
    %141 = tpu.matmul %140, %139, %cst_45 {dimension_numbers = #tpu.dot_dimension_numbers<[1], [0], [0], [1], [0, 0, 1, 1], [], []>} : vector<16x64xbf16>, vector<64x192xbf16>, vector<16x192xf32> -> vector<16x192xf32>
    %c25 = arith.constant 25 : index
    %c0_46 = arith.constant 0 : index
    %142 = vector.load %arg3[%c25, %c0_46] : memref<56x256xf32, #tpu.memory_space<vmem>>, vector<1x192xf32>
    %143 = vector.broadcast %142 : vector<1x192xf32> to vector<16x192xf32>
    %144 = arith.addf %141, %143 : vector<16x192xf32>
    %145 = vector.extract_strided_slice %144 {offsets = [0, 0], sizes = [16, 64], strides = [1, 1]} : vector<16x192xf32> to vector<16x64xf32>
    %146 = vector.extract_strided_slice %144 {offsets = [0, 64], sizes = [16, 64], strides = [1, 1]} : vector<16x192xf32> to vector<16x64xf32>
    %147 = vector.extract_strided_slice %144 {offsets = [0, 128], sizes = [16, 64], strides = [1, 1]} : vector<16x192xf32> to vector<16x64xf32>
    %148 = tpu.concatenate %146, %146, %146, %146 in 0 : vector<16x64xf32>, vector<16x64xf32>, vector<16x64xf32>, vector<16x64xf32> -> vector<64x64xf32>
    %149 = arith.mulf %148, %8 : vector<64x64xf32>
    %150 = tpu.concatenate %147, %147, %147, %147 in 0 : vector<16x64xf32>, vector<16x64xf32>, vector<16x64xf32>, vector<16x64xf32> -> vector<64x64xf32>
    %151 = arith.mulf %150, %8 : vector<64x64xf32>
    %152 = tpu.concatenate %151, %8 in 1 : vector<64x64xf32>, vector<64x64xf32> -> vector<64x128xf32>
    %153 = arith.truncf %145 : vector<16x64xf32> to vector<16x64xbf16>
    %154 = arith.truncf %149 : vector<64x64xf32> to vector<64x64xbf16>
    %cst_47 = arith.constant dense<0.000000e+00> : vector<16x64xf32>
    %155 = tpu.matmul %153, %154, %cst_47 {dimension_numbers = #tpu.dot_dimension_numbers<[1], [1], [0], [0], [0, 0, 1, 0], [], []>} : vector<16x64xbf16>, vector<64x64xbf16>, vector<16x64xf32> -> vector<16x64xf32>
    %cst_48 = arith.constant 2.500000e-01 : f32
    %156 = vector.broadcast %cst_48 : f32 to vector<16x64xf32>
    %157 = arith.mulf %155, %156 : vector<16x64xf32>
    %158 = arith.addf %157, %29 : vector<16x64xf32>
    %cst_49 = arith.constant dense<0xFF800000> : vector<16xf32>
    %159 = vector.multi_reduction <maximumf>, %158, %cst_49 [1] : vector<16x64xf32> to vector<16xf32>
    %160 = vector.shape_cast %159 : vector<16xf32> to vector<16x1xf32>
    %161 = vector.broadcast %160 : vector<16x1xf32> to vector<16x64xf32>
    %162 = arith.subf %158, %161 : vector<16x64xf32>
    %163 = math.exp %162 : vector<16x64xf32>
    %164 = arith.truncf %163 : vector<16x64xf32> to vector<16x64xbf16>
    %165 = arith.truncf %152 : vector<64x128xf32> to vector<64x128xbf16>
    %cst_50 = arith.constant dense<0.000000e+00> : vector<16x128xf32>
    %166 = tpu.matmul %164, %165, %cst_50 {dimension_numbers = #tpu.dot_dimension_numbers<[1], [0], [0], [1], [0, 0, 1, 1], [], []>} : vector<16x64xbf16>, vector<64x128xbf16>, vector<16x128xf32> -> vector<16x128xf32>
    %167 = vector.extract_strided_slice %166 {offsets = [0, 0], sizes = [16, 64], strides = [1, 1]} : vector<16x128xf32> to vector<16x64xf32>
    %168 = vector.extract_strided_slice %166 {offsets = [0, 64], sizes = [16, 64], strides = [1, 1]} : vector<16x128xf32> to vector<16x64xf32>
    %cst_51 = arith.constant 1.000000e-30 : f32
    %169 = vector.broadcast %cst_51 : f32 to vector<16x64xf32>
    %170 = arith.maximumf %168, %169 : vector<16x64xf32>
    %171 = tpu.reciprocal %170 {approx = true} : vector<16x64xf32> -> vector<16x64xf32>
    %172 = arith.mulf %167, %171 : vector<16x64xf32>
    %c384_52 = arith.constant 384 : index
    %c192_53 = arith.constant 192 : index
    %173 = vector.load %arg2[%c384_52, %c192_53] : memref<576x256xbf16, #tpu.memory_space<vmem>>, vector<64x64xbf16>
    %174 = arith.truncf %172 : vector<16x64xf32> to vector<16x64xbf16>
    %cst_54 = arith.constant dense<0.000000e+00> : vector<16x64xf32>
    %175 = tpu.matmul %174, %173, %cst_54 {dimension_numbers = #tpu.dot_dimension_numbers<[1], [0], [0], [1], [0, 0, 1, 1], [], []>} : vector<16x64xbf16>, vector<64x64xbf16>, vector<16x64xf32> -> vector<16x64xf32>
    %c26 = arith.constant 26 : index
    %c0_55 = arith.constant 0 : index
    %176 = vector.load %arg3[%c26, %c0_55] : memref<56x256xf32, #tpu.memory_space<vmem>>, vector<1x64xf32>
    %177 = vector.broadcast %176 : vector<1x64xf32> to vector<16x64xf32>
    %178 = arith.addf %175, %177 : vector<16x64xf32>
    %179 = arith.addf %138, %178 : vector<16x64xf32>
    %cst_56 = arith.constant dense<0.000000e+00> : vector<16xf32>
    %180 = vector.multi_reduction <add>, %179, %cst_56 [1] : vector<16x64xf32> to vector<16xf32>
    %181 = vector.shape_cast %180 : vector<16xf32> to vector<16x1xf32>
    %cst_57 = arith.constant 6.400000e+01 : f32
    %182 = vector.broadcast %cst_57 : f32 to vector<16x1xf32>
    %183 = arith.divf %181, %182 : vector<16x1xf32>
    %184 = vector.broadcast %183 : vector<16x1xf32> to vector<16x64xf32>
    %185 = arith.subf %179, %184 : vector<16x64xf32>
    %186 = arith.mulf %185, %185 : vector<16x64xf32>
    %cst_58 = arith.constant dense<0.000000e+00> : vector<16xf32>
    %187 = vector.multi_reduction <add>, %186, %cst_58 [1] : vector<16x64xf32> to vector<16xf32>
    %188 = vector.shape_cast %187 : vector<16xf32> to vector<16x1xf32>
    %cst_59 = arith.constant 6.400000e+01 : f32
    %189 = vector.broadcast %cst_59 : f32 to vector<16x1xf32>
    %190 = arith.divf %188, %189 : vector<16x1xf32>
    %cst_60 = arith.constant 9.99999974E-6 : f32
    %191 = vector.broadcast %cst_60 : f32 to vector<16x1xf32>
    %192 = arith.addf %190, %191 : vector<16x1xf32>
    %193 = math.rsqrt %192 : vector<16x1xf32>
    %194 = vector.broadcast %193 : vector<16x1xf32> to vector<16x64xf32>
    %195 = arith.mulf %185, %194 : vector<16x64xf32>
    %c29 = arith.constant 29 : index
    %c0_61 = arith.constant 0 : index
    %196 = vector.load %arg3[%c29, %c0_61] : memref<56x256xf32, #tpu.memory_space<vmem>>, vector<1x64xf32>
    %197 = vector.broadcast %196 : vector<1x64xf32> to vector<16x64xf32>
    %198 = arith.mulf %195, %197 : vector<16x64xf32>
    %c30 = arith.constant 30 : index
    %c0_62 = arith.constant 0 : index
    %199 = vector.load %arg3[%c30, %c0_62] : memref<56x256xf32, #tpu.memory_space<vmem>>, vector<1x64xf32>
    %200 = vector.broadcast %199 : vector<1x64xf32> to vector<16x64xf32>
    %201 = arith.addf %198, %200 : vector<16x64xf32>
    %c320 = arith.constant 320 : index
    %c0_63 = arith.constant 0 : index
    %202 = vector.load %arg2[%c320, %c0_63] : memref<576x256xbf16, #tpu.memory_space<vmem>>, vector<64x256xbf16>
    %203 = arith.truncf %201 : vector<16x64xf32> to vector<16x64xbf16>
    %cst_64 = arith.constant dense<0.000000e+00> : vector<16x256xf32>
    %204 = tpu.matmul %203, %202, %cst_64 {dimension_numbers = #tpu.dot_dimension_numbers<[1], [0], [0], [1], [0, 0, 1, 1], [], []>} : vector<16x64xbf16>, vector<64x256xbf16>, vector<16x256xf32> -> vector<16x256xf32>
    %c27 = arith.constant 27 : index
    %c0_65 = arith.constant 0 : index
    %205 = vector.load %arg3[%c27, %c0_65] : memref<56x256xf32, #tpu.memory_space<vmem>>, vector<1x256xf32>
    %206 = vector.broadcast %205 : vector<1x256xf32> to vector<16x256xf32>
    %207 = arith.addf %204, %206 : vector<16x256xf32>
    %cst_66 = arith.constant 0.000000e+00 : f32
    %208 = vector.broadcast %cst_66 : f32 to vector<16x256xf32>
    %209 = arith.maximumf %207, %208 : vector<16x256xf32>
    %c0_67 = arith.constant 0 : index
    %c64 = arith.constant 64 : index
    %210 = vector.load %arg2[%c0_67, %c64] : memref<576x256xbf16, #tpu.memory_space<vmem>>, vector<256x64xbf16>
    %211 = arith.truncf %209 : vector<16x256xf32> to vector<16x256xbf16>
    %cst_68 = arith.constant dense<0.000000e+00> : vector<16x64xf32>
    %212 = tpu.matmul %211, %210, %cst_68 {dimension_numbers = #tpu.dot_dimension_numbers<[1], [0], [0], [1], [0, 0, 1, 1], [], []>} : vector<16x256xbf16>, vector<256x64xbf16>, vector<16x64xf32> -> vector<16x64xf32>
    %c28 = arith.constant 28 : index
    %c0_69 = arith.constant 0 : index
    %213 = vector.load %arg3[%c28, %c0_69] : memref<56x256xf32, #tpu.memory_space<vmem>>, vector<1x64xf32>
    %214 = vector.broadcast %213 : vector<1x64xf32> to vector<16x64xf32>
    %215 = arith.addf %212, %214 : vector<16x64xf32>
    %216 = arith.addf %201, %215 : vector<16x64xf32>
    %cst_70 = arith.constant dense<0.000000e+00> : vector<16xf32>
    %217 = vector.multi_reduction <add>, %216, %cst_70 [1] : vector<16x64xf32> to vector<16xf32>
    %218 = vector.shape_cast %217 : vector<16xf32> to vector<16x1xf32>
    %cst_71 = arith.constant 6.400000e+01 : f32
    %219 = vector.broadcast %cst_71 : f32 to vector<16x1xf32>
    %220 = arith.divf %218, %219 : vector<16x1xf32>
    %221 = vector.broadcast %220 : vector<16x1xf32> to vector<16x64xf32>
    %222 = arith.subf %216, %221 : vector<16x64xf32>
    %223 = arith.mulf %222, %222 : vector<16x64xf32>
    %cst_72 = arith.constant dense<0.000000e+00> : vector<16xf32>
    %224 = vector.multi_reduction <add>, %223, %cst_72 [1] : vector<16x64xf32> to vector<16xf32>
    %225 = vector.shape_cast %224 : vector<16xf32> to vector<16x1xf32>
    %cst_73 = arith.constant 6.400000e+01 : f32
    %226 = vector.broadcast %cst_73 : f32 to vector<16x1xf32>
    %227 = arith.divf %225, %226 : vector<16x1xf32>
    %cst_74 = arith.constant 9.99999974E-6 : f32
    %228 = vector.broadcast %cst_74 : f32 to vector<16x1xf32>
    %229 = arith.addf %227, %228 : vector<16x1xf32>
    %230 = math.rsqrt %229 : vector<16x1xf32>
    %231 = vector.broadcast %230 : vector<16x1xf32> to vector<16x64xf32>
    %232 = arith.mulf %222, %231 : vector<16x64xf32>
    %c31 = arith.constant 31 : index
    %c0_75 = arith.constant 0 : index
    %233 = vector.load %arg3[%c31, %c0_75] : memref<56x256xf32, #tpu.memory_space<vmem>>, vector<1x64xf32>
    %234 = vector.broadcast %233 : vector<1x64xf32> to vector<16x64xf32>
    %235 = arith.mulf %232, %234 : vector<16x64xf32>
    %c32 = arith.constant 32 : index
    %c0_76 = arith.constant 0 : index
    %236 = vector.load %arg3[%c32, %c0_76] : memref<56x256xf32, #tpu.memory_space<vmem>>, vector<1x64xf32>
    %237 = vector.broadcast %236 : vector<1x64xf32> to vector<16x64xf32>
    %238 = arith.addf %235, %237 : vector<16x64xf32>
    %cst_77 = arith.constant dense<0.000000e+00> : vector<16xf32>
    %239 = vector.multi_reduction <add>, %238, %cst_77 [1] : vector<16x64xf32> to vector<16xf32>
    %240 = vector.shape_cast %239 : vector<16xf32> to vector<16x1xf32>
    %cst_78 = arith.constant 6.400000e+01 : f32
    %241 = vector.broadcast %cst_78 : f32 to vector<16x1xf32>
    %242 = arith.divf %240, %241 : vector<16x1xf32>
    %243 = vector.broadcast %242 : vector<16x1xf32> to vector<16x64xf32>
    %244 = arith.subf %238, %243 : vector<16x64xf32>
    %245 = arith.mulf %244, %244 : vector<16x64xf32>
    %cst_79 = arith.constant dense<0.000000e+00> : vector<16xf32>
    %246 = vector.multi_reduction <add>, %245, %cst_79 [1] : vector<16x64xf32> to vector<16xf32>
    %247 = vector.shape_cast %246 : vector<16xf32> to vector<16x1xf32>
    %cst_80 = arith.constant 6.400000e+01 : f32
    %248 = vector.broadcast %cst_80 : f32 to vector<16x1xf32>
    %249 = arith.divf %247, %248 : vector<16x1xf32>
    %cst_81 = arith.constant 9.99999974E-6 : f32
    %250 = vector.broadcast %cst_81 : f32 to vector<16x1xf32>
    %251 = arith.addf %249, %250 : vector<16x1xf32>
    %252 = math.rsqrt %251 : vector<16x1xf32>
    %253 = vector.broadcast %252 : vector<16x1xf32> to vector<16x64xf32>
    %254 = arith.mulf %244, %253 : vector<16x64xf32>
    %c33 = arith.constant 33 : index
    %c0_82 = arith.constant 0 : index
    %255 = vector.load %arg3[%c33, %c0_82] : memref<56x256xf32, #tpu.memory_space<vmem>>, vector<1x64xf32>
    %256 = vector.broadcast %255 : vector<1x64xf32> to vector<16x64xf32>
    %257 = arith.mulf %254, %256 : vector<16x64xf32>
    %c34 = arith.constant 34 : index
    %c0_83 = arith.constant 0 : index
    %258 = vector.load %arg3[%c34, %c0_83] : memref<56x256xf32, #tpu.memory_space<vmem>>, vector<1x64xf32>
    %259 = vector.broadcast %258 : vector<1x64xf32> to vector<16x64xf32>
    %260 = arith.addf %257, %259 : vector<16x64xf32>
    %c0_84 = arith.constant 0 : index
    %c224 = arith.constant 224 : index
    %261 = vector.load %arg2[%c0_84, %c224] : memref<576x256xbf16, #tpu.memory_space<vmem>>, vector<64x32xbf16>
    %262 = arith.truncf %260 : vector<16x64xf32> to vector<16x64xbf16>
    %cst_85 = arith.constant dense<0.000000e+00> : vector<16x32xf32>
    %263 = tpu.matmul %262, %261, %cst_85 {dimension_numbers = #tpu.dot_dimension_numbers<[1], [0], [0], [1], [0, 0, 1, 1], [], []>} : vector<16x64xbf16>, vector<64x32xbf16>, vector<16x32xf32> -> vector<16x32xf32>
    %c35 = arith.constant 35 : index
    %c0_86 = arith.constant 0 : index
    %264 = vector.load %arg3[%c35, %c0_86] : memref<56x256xf32, #tpu.memory_space<vmem>>, vector<1x32xf32>
    %265 = vector.broadcast %264 : vector<1x32xf32> to vector<16x32xf32>
    %266 = arith.addf %263, %265 : vector<16x32xf32>
    %c8 = arith.constant 8 : index
    %c0_87 = arith.constant 0 : index
    %267 = vector.load %arg3[%c8, %c0_87] : memref<56x256xf32, #tpu.memory_space<vmem>>, vector<8x32xf32>
    %268 = tpu.concatenate %267, %267 in 0 : vector<8x32xf32>, vector<8x32xf32> -> vector<16x32xf32>
    %269 = arith.addf %266, %268 : vector<16x32xf32>
    %c512 = arith.constant 512 : index
    %c128 = arith.constant 128 : index
    %270 = vector.load %arg2[%c512, %c128] : memref<576x256xbf16, #tpu.memory_space<vmem>>, vector<32x96xbf16>
    %271 = arith.truncf %269 : vector<16x32xf32> to vector<16x32xbf16>
    %cst_88 = arith.constant dense<0.000000e+00> : vector<16x96xf32>
    %272 = tpu.matmul %271, %270, %cst_88 {dimension_numbers = #tpu.dot_dimension_numbers<[1], [0], [0], [1], [0, 0, 1, 1], [], []>} : vector<16x32xbf16>, vector<32x96xbf16>, vector<16x96xf32> -> vector<16x96xf32>
    %c36 = arith.constant 36 : index
    %c0_89 = arith.constant 0 : index
    %273 = vector.load %arg3[%c36, %c0_89] : memref<56x256xf32, #tpu.memory_space<vmem>>, vector<1x96xf32>
    %274 = vector.broadcast %273 : vector<1x96xf32> to vector<16x96xf32>
    %275 = arith.addf %272, %274 : vector<16x96xf32>
    %276 = vector.extract_strided_slice %275 {offsets = [0, 0], sizes = [16, 32], strides = [1, 1]} : vector<16x96xf32> to vector<16x32xf32>
    %277 = vector.extract_strided_slice %275 {offsets = [0, 32], sizes = [16, 32], strides = [1, 1]} : vector<16x96xf32> to vector<16x32xf32>
    %278 = vector.extract_strided_slice %275 {offsets = [0, 64], sizes = [16, 32], strides = [1, 1]} : vector<16x96xf32> to vector<16x32xf32>
    %279 = tpu.concatenate %277, %277, %277, %277 in 0 : vector<16x32xf32>, vector<16x32xf32>, vector<16x32xf32>, vector<16x32xf32> -> vector<64x32xf32>
    %280 = arith.mulf %279, %17 : vector<64x32xf32>
    %281 = tpu.concatenate %278, %278, %278, %278 in 0 : vector<16x32xf32>, vector<16x32xf32>, vector<16x32xf32>, vector<16x32xf32> -> vector<64x32xf32>
    %282 = arith.mulf %281, %17 : vector<64x32xf32>
    %283 = tpu.concatenate %282, %17 in 1 : vector<64x32xf32>, vector<64x32xf32> -> vector<64x64xf32>
    %284 = arith.truncf %276 : vector<16x32xf32> to vector<16x32xbf16>
    %285 = arith.truncf %280 : vector<64x32xf32> to vector<64x32xbf16>
    %cst_90 = arith.constant dense<0.000000e+00> : vector<16x64xf32>
    %286 = tpu.matmul %284, %285, %cst_90 {dimension_numbers = #tpu.dot_dimension_numbers<[1], [1], [0], [0], [0, 0, 1, 0], [], []>} : vector<16x32xbf16>, vector<64x32xbf16>, vector<16x64xf32> -> vector<16x64xf32>
    %cst_91 = arith.constant 0.353553385 : f32
    %287 = vector.broadcast %cst_91 : f32 to vector<16x64xf32>
    %288 = arith.mulf %286, %287 : vector<16x64xf32>
    %289 = arith.addf %288, %29 : vector<16x64xf32>
    %cst_92 = arith.constant dense<0xFF800000> : vector<16xf32>
    %290 = vector.multi_reduction <maximumf>, %289, %cst_92 [1] : vector<16x64xf32> to vector<16xf32>
    %291 = vector.shape_cast %290 : vector<16xf32> to vector<16x1xf32>
    %292 = vector.broadcast %291 : vector<16x1xf32> to vector<16x64xf32>
    %293 = arith.subf %289, %292 : vector<16x64xf32>
    %294 = math.exp %293 : vector<16x64xf32>
    %295 = arith.truncf %294 : vector<16x64xf32> to vector<16x64xbf16>
    %296 = arith.truncf %283 : vector<64x64xf32> to vector<64x64xbf16>
    %cst_93 = arith.constant dense<0.000000e+00> : vector<16x64xf32>
    %297 = tpu.matmul %295, %296, %cst_93 {dimension_numbers = #tpu.dot_dimension_numbers<[1], [0], [0], [1], [0, 0, 1, 1], [], []>} : vector<16x64xbf16>, vector<64x64xbf16>, vector<16x64xf32> -> vector<16x64xf32>
    %298 = vector.extract_strided_slice %297 {offsets = [0, 0], sizes = [16, 32], strides = [1, 1]} : vector<16x64xf32> to vector<16x32xf32>
    %299 = vector.extract_strided_slice %297 {offsets = [0, 32], sizes = [16, 32], strides = [1, 1]} : vector<16x64xf32> to vector<16x32xf32>
    %cst_94 = arith.constant 1.000000e-30 : f32
    %300 = vector.broadcast %cst_94 : f32 to vector<16x32xf32>
    %301 = arith.maximumf %299, %300 : vector<16x32xf32>
    %302 = tpu.reciprocal %301 {approx = true} : vector<16x32xf32> -> vector<16x32xf32>
    %303 = arith.mulf %298, %302 : vector<16x32xf32>
    %c544 = arith.constant 544 : index
    %c160_95 = arith.constant 160 : index
    %304 = vector.load %arg2[%c544, %c160_95] : memref<576x256xbf16, #tpu.memory_space<vmem>>, vector<32x32xbf16>
    %305 = arith.truncf %303 : vector<16x32xf32> to vector<16x32xbf16>
    %cst_96 = arith.constant dense<0.000000e+00> : vector<16x32xf32>
    %306 = tpu.matmul %305, %304, %cst_96 {dimension_numbers = #tpu.dot_dimension_numbers<[1], [0], [0], [1], [0, 0, 1, 1], [], []>} : vector<16x32xbf16>, vector<32x32xbf16>, vector<16x32xf32> -> vector<16x32xf32>
    %c37 = arith.constant 37 : index
    %c0_97 = arith.constant 0 : index
    %307 = vector.load %arg3[%c37, %c0_97] : memref<56x256xf32, #tpu.memory_space<vmem>>, vector<1x32xf32>
    %308 = vector.broadcast %307 : vector<1x32xf32> to vector<16x32xf32>
    %309 = arith.addf %306, %308 : vector<16x32xf32>
    %310 = arith.addf %269, %309 : vector<16x32xf32>
    %cst_98 = arith.constant dense<0.000000e+00> : vector<16xf32>
    %311 = vector.multi_reduction <add>, %310, %cst_98 [1] : vector<16x32xf32> to vector<16xf32>
    %312 = vector.shape_cast %311 : vector<16xf32> to vector<16x1xf32>
    %cst_99 = arith.constant 3.200000e+01 : f32
    %313 = vector.broadcast %cst_99 : f32 to vector<16x1xf32>
    %314 = arith.divf %312, %313 : vector<16x1xf32>
    %315 = vector.broadcast %314 : vector<16x1xf32> to vector<16x32xf32>
    %316 = arith.subf %310, %315 : vector<16x32xf32>
    %317 = arith.mulf %316, %316 : vector<16x32xf32>
    %cst_100 = arith.constant dense<0.000000e+00> : vector<16xf32>
    %318 = vector.multi_reduction <add>, %317, %cst_100 [1] : vector<16x32xf32> to vector<16xf32>
    %319 = vector.shape_cast %318 : vector<16xf32> to vector<16x1xf32>
    %cst_101 = arith.constant 3.200000e+01 : f32
    %320 = vector.broadcast %cst_101 : f32 to vector<16x1xf32>
    %321 = arith.divf %319, %320 : vector<16x1xf32>
    %cst_102 = arith.constant 9.99999974E-6 : f32
    %322 = vector.broadcast %cst_102 : f32 to vector<16x1xf32>
    %323 = arith.addf %321, %322 : vector<16x1xf32>
    %324 = math.rsqrt %323 : vector<16x1xf32>
    %325 = vector.broadcast %324 : vector<16x1xf32> to vector<16x32xf32>
    %326 = arith.mulf %316, %325 : vector<16x32xf32>
    %c43 = arith.constant 43 : index
    %c0_103 = arith.constant 0 : index
    %327 = vector.load %arg3[%c43, %c0_103] : memref<56x256xf32, #tpu.memory_space<vmem>>, vector<1x32xf32>
    %328 = vector.broadcast %327 : vector<1x32xf32> to vector<16x32xf32>
    %329 = arith.mulf %326, %328 : vector<16x32xf32>
    %c44 = arith.constant 44 : index
    %c0_104 = arith.constant 0 : index
    %330 = vector.load %arg3[%c44, %c0_104] : memref<56x256xf32, #tpu.memory_space<vmem>>, vector<1x32xf32>
    %331 = vector.broadcast %330 : vector<1x32xf32> to vector<16x32xf32>
    %332 = arith.addf %329, %331 : vector<16x32xf32>
    %c544_105 = arith.constant 544 : index
    %c128_106 = arith.constant 128 : index
    %333 = vector.load %arg2[%c544_105, %c128_106] : memref<576x256xbf16, #tpu.memory_space<vmem>>, vector<32x32xbf16>
    %334 = arith.truncf %332 : vector<16x32xf32> to vector<16x32xbf16>
    %cst_107 = arith.constant dense<0.000000e+00> : vector<16x32xf32>
    %335 = tpu.matmul %334, %333, %cst_107 {dimension_numbers = #tpu.dot_dimension_numbers<[1], [0], [0], [1], [0, 0, 1, 1], [], []>} : vector<16x32xbf16>, vector<32x32xbf16>, vector<16x32xf32> -> vector<16x32xf32>
    %c38 = arith.constant 38 : index
    %c0_108 = arith.constant 0 : index
    %336 = vector.load %arg3[%c38, %c0_108] : memref<56x256xf32, #tpu.memory_space<vmem>>, vector<1x32xf32>
    %337 = vector.broadcast %336 : vector<1x32xf32> to vector<16x32xf32>
    %338 = arith.addf %335, %337 : vector<16x32xf32>
    %c544_109 = arith.constant 544 : index
    %c0_110 = arith.constant 0 : index
    %339 = vector.load %arg2[%c544_109, %c0_110] : memref<576x256xbf16, #tpu.memory_space<vmem>>, vector<32x64xbf16>
    %340 = arith.truncf %269 : vector<16x32xf32> to vector<16x32xbf16>
    %cst_111 = arith.constant dense<0.000000e+00> : vector<16x64xf32>
    %341 = tpu.matmul %340, %339, %cst_111 {dimension_numbers = #tpu.dot_dimension_numbers<[1], [0], [0], [1], [0, 0, 1, 1], [], []>} : vector<16x32xbf16>, vector<32x64xbf16>, vector<16x64xf32> -> vector<16x64xf32>
    %c39 = arith.constant 39 : index
    %c0_112 = arith.constant 0 : index
    %342 = vector.load %arg3[%c39, %c0_112] : memref<56x256xf32, #tpu.memory_space<vmem>>, vector<1x64xf32>
    %343 = vector.broadcast %342 : vector<1x64xf32> to vector<16x64xf32>
    %344 = arith.addf %341, %343 : vector<16x64xf32>
    %345 = vector.extract_strided_slice %344 {offsets = [0, 0], sizes = [16, 32], strides = [1, 1]} : vector<16x64xf32> to vector<16x32xf32>
    %346 = vector.extract_strided_slice %344 {offsets = [0, 32], sizes = [16, 32], strides = [1, 1]} : vector<16x64xf32> to vector<16x32xf32>
    %347 = tpu.concatenate %345, %345, %345, %345 in 0 : vector<16x32xf32>, vector<16x32xf32>, vector<16x32xf32>, vector<16x32xf32> -> vector<64x32xf32>
    %348 = arith.mulf %347, %17 : vector<64x32xf32>
    %349 = tpu.concatenate %346, %346, %346, %346 in 0 : vector<16x32xf32>, vector<16x32xf32>, vector<16x32xf32>, vector<16x32xf32> -> vector<64x32xf32>
    %350 = arith.mulf %349, %17 : vector<64x32xf32>
    %351 = tpu.concatenate %350, %17 in 1 : vector<64x32xf32>, vector<64x32xf32> -> vector<64x64xf32>
    %352 = arith.truncf %338 : vector<16x32xf32> to vector<16x32xbf16>
    %353 = arith.truncf %348 : vector<64x32xf32> to vector<64x32xbf16>
    %cst_113 = arith.constant dense<0.000000e+00> : vector<16x64xf32>
    %354 = tpu.matmul %352, %353, %cst_113 {dimension_numbers = #tpu.dot_dimension_numbers<[1], [1], [0], [0], [0, 0, 1, 0], [], []>} : vector<16x32xbf16>, vector<64x32xbf16>, vector<16x64xf32> -> vector<16x64xf32>
    %cst_114 = arith.constant 0.353553385 : f32
    %355 = vector.broadcast %cst_114 : f32 to vector<16x64xf32>
    %356 = arith.mulf %354, %355 : vector<16x64xf32>
    %357 = arith.addf %356, %29 : vector<16x64xf32>
    %cst_115 = arith.constant dense<0xFF800000> : vector<16xf32>
    %358 = vector.multi_reduction <maximumf>, %357, %cst_115 [1] : vector<16x64xf32> to vector<16xf32>
    %359 = vector.shape_cast %358 : vector<16xf32> to vector<16x1xf32>
    %360 = vector.broadcast %359 : vector<16x1xf32> to vector<16x64xf32>
    %361 = arith.subf %357, %360 : vector<16x64xf32>
    %362 = math.exp %361 : vector<16x64xf32>
    %363 = arith.truncf %362 : vector<16x64xf32> to vector<16x64xbf16>
    %364 = arith.truncf %351 : vector<64x64xf32> to vector<64x64xbf16>
    %cst_116 = arith.constant dense<0.000000e+00> : vector<16x64xf32>
    %365 = tpu.matmul %363, %364, %cst_116 {dimension_numbers = #tpu.dot_dimension_numbers<[1], [0], [0], [1], [0, 0, 1, 1], [], []>} : vector<16x64xbf16>, vector<64x64xbf16>, vector<16x64xf32> -> vector<16x64xf32>
    %366 = vector.extract_strided_slice %365 {offsets = [0, 0], sizes = [16, 32], strides = [1, 1]} : vector<16x64xf32> to vector<16x32xf32>
    %367 = vector.extract_strided_slice %365 {offsets = [0, 32], sizes = [16, 32], strides = [1, 1]} : vector<16x64xf32> to vector<16x32xf32>
    %cst_117 = arith.constant 1.000000e-30 : f32
    %368 = vector.broadcast %cst_117 : f32 to vector<16x32xf32>
    %369 = arith.maximumf %367, %368 : vector<16x32xf32>
    %370 = tpu.reciprocal %369 {approx = true} : vector<16x32xf32> -> vector<16x32xf32>
    %371 = arith.mulf %366, %370 : vector<16x32xf32>
    %c512_118 = arith.constant 512 : index
    %c224_119 = arith.constant 224 : index
    %372 = vector.load %arg2[%c512_118, %c224_119] : memref<576x256xbf16, #tpu.memory_space<vmem>>, vector<32x32xbf16>
    %373 = arith.truncf %371 : vector<16x32xf32> to vector<16x32xbf16>
    %cst_120 = arith.constant dense<0.000000e+00> : vector<16x32xf32>
    %374 = tpu.matmul %373, %372, %cst_120 {dimension_numbers = #tpu.dot_dimension_numbers<[1], [0], [0], [1], [0, 0, 1, 1], [], []>} : vector<16x32xbf16>, vector<32x32xbf16>, vector<16x32xf32> -> vector<16x32xf32>
    %c40 = arith.constant 40 : index
    %c0_121 = arith.constant 0 : index
    %375 = vector.load %arg3[%c40, %c0_121] : memref<56x256xf32, #tpu.memory_space<vmem>>, vector<1x32xf32>
    %376 = vector.broadcast %375 : vector<1x32xf32> to vector<16x32xf32>
    %377 = arith.addf %374, %376 : vector<16x32xf32>
    %378 = arith.addf %332, %377 : vector<16x32xf32>
    %cst_122 = arith.constant dense<0.000000e+00> : vector<16xf32>
    %379 = vector.multi_reduction <add>, %378, %cst_122 [1] : vector<16x32xf32> to vector<16xf32>
    %380 = vector.shape_cast %379 : vector<16xf32> to vector<16x1xf32>
    %cst_123 = arith.constant 3.200000e+01 : f32
    %381 = vector.broadcast %cst_123 : f32 to vector<16x1xf32>
    %382 = arith.divf %380, %381 : vector<16x1xf32>
    %383 = vector.broadcast %382 : vector<16x1xf32> to vector<16x32xf32>
    %384 = arith.subf %378, %383 : vector<16x32xf32>
    %385 = arith.mulf %384, %384 : vector<16x32xf32>
    %cst_124 = arith.constant dense<0.000000e+00> : vector<16xf32>
    %386 = vector.multi_reduction <add>, %385, %cst_124 [1] : vector<16x32xf32> to vector<16xf32>
    %387 = vector.shape_cast %386 : vector<16xf32> to vector<16x1xf32>
    %cst_125 = arith.constant 3.200000e+01 : f32
    %388 = vector.broadcast %cst_125 : f32 to vector<16x1xf32>
    %389 = arith.divf %387, %388 : vector<16x1xf32>
    %cst_126 = arith.constant 9.99999974E-6 : f32
    %390 = vector.broadcast %cst_126 : f32 to vector<16x1xf32>
    %391 = arith.addf %389, %390 : vector<16x1xf32>
    %392 = math.rsqrt %391 : vector<16x1xf32>
    %393 = vector.broadcast %392 : vector<16x1xf32> to vector<16x32xf32>
    %394 = arith.mulf %384, %393 : vector<16x32xf32>
    %c45 = arith.constant 45 : index
    %c0_127 = arith.constant 0 : index
    %395 = vector.load %arg3[%c45, %c0_127] : memref<56x256xf32, #tpu.memory_space<vmem>>, vector<1x32xf32>
    %396 = vector.broadcast %395 : vector<1x32xf32> to vector<16x32xf32>
    %397 = arith.mulf %394, %396 : vector<16x32xf32>
    %c46 = arith.constant 46 : index
    %c0_128 = arith.constant 0 : index
    %398 = vector.load %arg3[%c46, %c0_128] : memref<56x256xf32, #tpu.memory_space<vmem>>, vector<1x32xf32>
    %399 = vector.broadcast %398 : vector<1x32xf32> to vector<16x32xf32>
    %400 = arith.addf %397, %399 : vector<16x32xf32>
    %c512_129 = arith.constant 512 : index
    %c0_130 = arith.constant 0 : index
    %401 = vector.load %arg2[%c512_129, %c0_130] : memref<576x256xbf16, #tpu.memory_space<vmem>>, vector<32x128xbf16>
    %402 = arith.truncf %400 : vector<16x32xf32> to vector<16x32xbf16>
    %cst_131 = arith.constant dense<0.000000e+00> : vector<16x128xf32>
    %403 = tpu.matmul %402, %401, %cst_131 {dimension_numbers = #tpu.dot_dimension_numbers<[1], [0], [0], [1], [0, 0, 1, 1], [], []>} : vector<16x32xbf16>, vector<32x128xbf16>, vector<16x128xf32> -> vector<16x128xf32>
    %c41 = arith.constant 41 : index
    %c0_132 = arith.constant 0 : index
    %404 = vector.load %arg3[%c41, %c0_132] : memref<56x256xf32, #tpu.memory_space<vmem>>, vector<1x128xf32>
    %405 = vector.broadcast %404 : vector<1x128xf32> to vector<16x128xf32>
    %406 = arith.addf %403, %405 : vector<16x128xf32>
    %cst_133 = arith.constant 0.000000e+00 : f32
    %407 = vector.broadcast %cst_133 : f32 to vector<16x128xf32>
    %408 = arith.maximumf %406, %407 : vector<16x128xf32>
    %c0_134 = arith.constant 0 : index
    %c128_135 = arith.constant 128 : index
    %409 = vector.load %arg2[%c0_134, %c128_135] : memref<576x256xbf16, #tpu.memory_space<vmem>>, vector<128x32xbf16>
    %410 = arith.truncf %408 : vector<16x128xf32> to vector<16x128xbf16>
    %cst_136 = arith.constant dense<0.000000e+00> : vector<16x32xf32>
    %411 = tpu.matmul %410, %409, %cst_136 {dimension_numbers = #tpu.dot_dimension_numbers<[1], [0], [0], [1], [0, 0, 1, 1], [], []>} : vector<16x128xbf16>, vector<128x32xbf16>, vector<16x32xf32> -> vector<16x32xf32>
    %c42 = arith.constant 42 : index
    %c0_137 = arith.constant 0 : index
    %412 = vector.load %arg3[%c42, %c0_137] : memref<56x256xf32, #tpu.memory_space<vmem>>, vector<1x32xf32>
    %413 = vector.broadcast %412 : vector<1x32xf32> to vector<16x32xf32>
    %414 = arith.addf %411, %413 : vector<16x32xf32>
    %415 = arith.addf %400, %414 : vector<16x32xf32>
    %cst_138 = arith.constant dense<0.000000e+00> : vector<16xf32>
    %416 = vector.multi_reduction <add>, %415, %cst_138 [1] : vector<16x32xf32> to vector<16xf32>
    %417 = vector.shape_cast %416 : vector<16xf32> to vector<16x1xf32>
    %cst_139 = arith.constant 3.200000e+01 : f32
    %418 = vector.broadcast %cst_139 : f32 to vector<16x1xf32>
    %419 = arith.divf %417, %418 : vector<16x1xf32>
    %420 = vector.broadcast %419 : vector<16x1xf32> to vector<16x32xf32>
    %421 = arith.subf %415, %420 : vector<16x32xf32>
    %422 = arith.mulf %421, %421 : vector<16x32xf32>
    %cst_140 = arith.constant dense<0.000000e+00> : vector<16xf32>
    %423 = vector.multi_reduction <add>, %422, %cst_140 [1] : vector<16x32xf32> to vector<16xf32>
    %424 = vector.shape_cast %423 : vector<16xf32> to vector<16x1xf32>
    %cst_141 = arith.constant 3.200000e+01 : f32
    %425 = vector.broadcast %cst_141 : f32 to vector<16x1xf32>
    %426 = arith.divf %424, %425 : vector<16x1xf32>
    %cst_142 = arith.constant 9.99999974E-6 : f32
    %427 = vector.broadcast %cst_142 : f32 to vector<16x1xf32>
    %428 = arith.addf %426, %427 : vector<16x1xf32>
    %429 = math.rsqrt %428 : vector<16x1xf32>
    %430 = vector.broadcast %429 : vector<16x1xf32> to vector<16x32xf32>
    %431 = arith.mulf %421, %430 : vector<16x32xf32>
    %c47 = arith.constant 47 : index
    %c0_143 = arith.constant 0 : index
    %432 = vector.load %arg3[%c47, %c0_143] : memref<56x256xf32, #tpu.memory_space<vmem>>, vector<1x32xf32>
    %433 = vector.broadcast %432 : vector<1x32xf32> to vector<16x32xf32>
    %434 = arith.mulf %431, %433 : vector<16x32xf32>
    %c48 = arith.constant 48 : index
    %c0_144 = arith.constant 0 : index
    %435 = vector.load %arg3[%c48, %c0_144] : memref<56x256xf32, #tpu.memory_space<vmem>>, vector<1x32xf32>
    %436 = vector.broadcast %435 : vector<1x32xf32> to vector<16x32xf32>
    %437 = arith.addf %434, %436 : vector<16x32xf32>
    %cst_145 = arith.constant dense<0.000000e+00> : vector<16xf32>
    %438 = vector.multi_reduction <add>, %437, %cst_145 [1] : vector<16x32xf32> to vector<16xf32>
    %439 = vector.shape_cast %438 : vector<16xf32> to vector<16x1xf32>
    %cst_146 = arith.constant 3.200000e+01 : f32
    %440 = vector.broadcast %cst_146 : f32 to vector<16x1xf32>
    %441 = arith.divf %439, %440 : vector<16x1xf32>
    %442 = vector.broadcast %441 : vector<16x1xf32> to vector<16x32xf32>
    %443 = arith.subf %437, %442 : vector<16x32xf32>
    %444 = arith.mulf %443, %443 : vector<16x32xf32>
    %cst_147 = arith.constant dense<0.000000e+00> : vector<16xf32>
    %445 = vector.multi_reduction <add>, %444, %cst_147 [1] : vector<16x32xf32> to vector<16xf32>
    %446 = vector.shape_cast %445 : vector<16xf32> to vector<16x1xf32>
    %cst_148 = arith.constant 3.200000e+01 : f32
    %447 = vector.broadcast %cst_148 : f32 to vector<16x1xf32>
    %448 = arith.divf %446, %447 : vector<16x1xf32>
    %cst_149 = arith.constant 9.99999974E-6 : f32
    %449 = vector.broadcast %cst_149 : f32 to vector<16x1xf32>
    %450 = arith.addf %448, %449 : vector<16x1xf32>
    %451 = math.rsqrt %450 : vector<16x1xf32>
    %452 = vector.broadcast %451 : vector<16x1xf32> to vector<16x32xf32>
    %453 = arith.mulf %443, %452 : vector<16x32xf32>
    %c49 = arith.constant 49 : index
    %c0_150 = arith.constant 0 : index
    %454 = vector.load %arg3[%c49, %c0_150] : memref<56x256xf32, #tpu.memory_space<vmem>>, vector<1x32xf32>
    %455 = vector.broadcast %454 : vector<1x32xf32> to vector<16x32xf32>
    %456 = arith.mulf %453, %455 : vector<16x32xf32>
    %c50 = arith.constant 50 : index
    %c0_151 = arith.constant 0 : index
    %457 = vector.load %arg3[%c50, %c0_151] : memref<56x256xf32, #tpu.memory_space<vmem>>, vector<1x32xf32>
    %458 = vector.broadcast %457 : vector<1x32xf32> to vector<16x32xf32>
    %459 = arith.addf %456, %458 : vector<16x32xf32>
    %c544_152 = arith.constant 544 : index
    %c64_153 = arith.constant 64 : index
    %460 = vector.load %arg2[%c544_152, %c64_153] : memref<576x256xbf16, #tpu.memory_space<vmem>>, vector<32x64xbf16>
    %461 = arith.truncf %459 : vector<16x32xf32> to vector<16x32xbf16>
    %cst_154 = arith.constant dense<0.000000e+00> : vector<16x64xf32>
    %462 = tpu.matmul %461, %460, %cst_154 {dimension_numbers = #tpu.dot_dimension_numbers<[1], [0], [0], [1], [0, 0, 1, 1], [], []>} : vector<16x32xbf16>, vector<32x64xbf16>, vector<16x64xf32> -> vector<16x64xf32>
    %c51 = arith.constant 51 : index
    %c0_155 = arith.constant 0 : index
    %463 = vector.load %arg3[%c51, %c0_155] : memref<56x256xf32, #tpu.memory_space<vmem>>, vector<1x64xf32>
    %464 = vector.broadcast %463 : vector<1x64xf32> to vector<16x64xf32>
    %465 = arith.addf %462, %464 : vector<16x64xf32>
    %c0_156 = arith.constant 0 : index
    %c0_157 = arith.constant 0 : index
    %466 = vector.load %arg4[%c0_156, %c0_157] : memref<16x64xf32, #tpu.memory_space<vmem>>, vector<16x64xf32>
    tpu.vector_store %arg4[%c0_156, %c0_157], %465 {strides = array<i32>} : memref<16x64xf32, #tpu.memory_space<vmem>>, vector<16x64xf32>,
    return
  }
  func.func @transform_0(%arg0: i32) -> (i32, i32) {
    %c0_i32 = arith.constant 0 : i32
    %c0_i32_0 = arith.constant 0 : i32
    return %arg0, %c0_i32 : i32, i32
  }
  func.func @transform_1(%arg0: i32) -> (i32, i32) {
    %c0_i32 = arith.constant 0 : i32
    %c0_i32_0 = arith.constant 0 : i32
    %c0_i32_1 = arith.constant 0 : i32
    return %c0_i32, %c0_i32_0 : i32, i32
  }
  func.func @transform_2(%arg0: i32) -> (i32, i32) {
    %c0_i32 = arith.constant 0 : i32
    %c0_i32_0 = arith.constant 0 : i32
    %c0_i32_1 = arith.constant 0 : i32
    return %c0_i32, %c0_i32_0 : i32, i32
  }
  func.func @transform_3(%arg0: i32) -> (i32, i32) {
    %c0_i32 = arith.constant 0 : i32
    %c0_i32_0 = arith.constant 0 : i32
    return %arg0, %c0_i32 : i32, i32
  }
}

</mosaic_0001>

<bundles_post_ra>
// kernel: mae_forward.1
= control target key start
LH: loop header
LB: loop body
LE: loop exit
PB: predicated region body
PF: predicated region fallthrough
CT: control target
= control target key end

     0   :  { %s3573_s14 = smov 64   ;;  %v4819_v2 = vmov 0.0   ;;  %vm3575_vm0 = vmmov 0   ;;  %s4806_s0 = inlined_call_operand.vmem [shape: bf16[16,64], index: 0, kind: input, shape index: {}]   ;;  %s4807_s1 = inlined_call_operand.vmem [shape: bf16[576,256], index: 1, kind: input, shape index: {}]   ;;  %s4808_s2 = inlined_call_operand.vmem [shape: f32[56,256], index: 2, kind: input, shape index: {}]   ;;  %s4809_s3 = inlined_call_operand.hbm [shape: f32[16,64], index: 3, kind: output, shape index: {}]  }
   0x1   :  { %v3386_v0 = vld [vmem:[%s4807_s1 + $0x1f4] ss:$8 sps:$4 sm:$0xff]   ;;  %v3387_v1 = vld [vmem:[%s4807_s1 + $0x1e4] ss:$8 sps:$4 sm:$0xff]   ;;  %3056 = vmatprep.subr.bf16.mxu1 %v4819_v2  ;;  %3068 = vmatprep.subr.bf16.mxu0 %v4819_v2 }
   0x2   :  { %135 = vrot.lane.b32.xlu0 %v3386_v0, %s3573_s14  ;;  %v3388_v3 = vld [vmem:[%s4807_s1 + $0x1d4] ss:$8 sps:$4 sm:$0xff]   ;;  %v3389_v4 = vld [vmem:[%s4807_s1 + $0x1c4] ss:$8 sps:$4 sm:$0xff]   ;;  %3064 = vmatprep.mubr.msk.bf16.mxu1 %vm3575_vm0, %v4819_v2 }
   0x3   :  { %131 = vrot.lane.b32.xlu1 %v3388_v3, %s3573_s14  ;;  %3076 = vmatprep.mubr.msk.bf16.mxu0 %vm3575_vm0, %v4819_v2 }
   0x6   :  { %133 = vrot.lane.b32.xlu0 %v3387_v1, %s3573_s14 }
   0x7   :  { %129 = vrot.lane.b32.xlu1 %v3389_v4, %s3573_s14 }
   0x8   :  { %8 = vsyncpa [#allocation3], 0  ;;  %v3393_v9 = vld [vmem:[%s4807_s1 + $0x1b4] ss:$8 sps:$4 sm:$0xff]   ;;  %v3390_v10 = vld [vmem:[%s4806_s0] sm:$0xff]   ;;  %vm141_vm1 = vcmask 523264   ;;  %v16_v19 = vlaneseq }
   0x9   :  { %v3391_v11 = vld [vmem:[%s4807_s1 + $0x1b0] ss:$8 sps:$4 sm:$0xff]   ;;  %v3396_v12 = vld [vmem:[%s4807_s1 + $0x1a4] ss:$8 sps:$4 sm:$0xff]   ;;  %v3394_v13 = vld [vmem:[%s4807_s1 + $0x1a0] ss:$8 sps:$4 sm:$0xff]  }
   0xa   :  { %v3399_v14 = vld [vmem:[%s4807_s1 + $0x194] ss:$8 sps:$4 sm:$0xff]   ;;  %v3397_v15 = vld [vmem:[%s4807_s1 + $0x190] ss:$8 sps:$4 sm:$0xff]   ;;  %v3402_v16 = vld [vmem:[%s4807_s1 + $0x184] ss:$8 sps:$4 sm:$0xff]  }
   0xb   :  { %v3400_v17 = vld [vmem:[%s4807_s1 + $0x180] ss:$8 sps:$4 sm:$0xff]   ;;  %v4818_v18 = vmov 0   ;;  %v3658_v20 = vshrl.u32 %v16_v19, 7  ;;  %v3660_v21 = vand.u32 127, %v16_v19  ;;  %s3578_s22 = smov 96  }
   0xc   :  { %v103_v50 = vld [vmem:[%s4808_s2 + $0x20] ss:$0 sm:$0xff]  ;;  %v2824_v0 = vld [vmem:[%s4808_s2 + $0x21] ss:$8 sm:$0x3]  ;;  %s3579_s16 = smov 32  }
   0xd   :  { %v3663_v22 = vadd.s32 48, %v3658_v20  ;;  %v3666_v23 = vadd.s32 56, %v3658_v20  ;;  %v35_v24 = vshra.s32 %v3660_v21, 4  ;;  %v3670_v25 = vadd.s32 32, %v3658_v20  ;;  %v186_v54 = vld [vmem:[%s4808_s2] sm:$0xff]  ;;  %s3580_s12 = smov [#allocation2]  }
   0xe   :  { %v3673_v26 = vadd.s32 40, %v3658_v20  ;;  %v3676_v27 = vadd.s32 16, %v3658_v20  ;;  %v3679_v28 = vadd.s32 24, %v3658_v20  ;;  %v3682_v29 = vadd.s32 8, %v3658_v20  ;;  %s2791_s13 = sshll.u32 %s3580_s12, 4  ;;  %s2792_s13 = int_to_ptr.vmem [resolvable:$true] %s2791_s13 }
   0xf   :  { %v4815_v30 = vshra.s32 %v3663_v22, 4  ;;  %v4814_v31 = vshra.s32 %v3666_v23, 4  ;;  %v4817_v32 = vshra.s32 %v3670_v25, 4  ;;  %v4813_v33 = vshra.s32 %v3658_v20, 4  ;;  %s3551_s15 = scalar_lea.vmem %s2792_s13, 256  ;;  %p3556_p1 = scmp.lt.s32.totalorder %s2792_s13, %s2792_s13 }
  0x10   :  { %4824 = vst [vmem:[#allocation5_spill] sm:$0xff] %v3676_v27  ;;  %4825 = vst [vmem:[#allocation6_spill] sm:$0xff] %v3679_v28  ;;  %v4816_v34 = vshra.s32 %v3673_v26, 4  ;;  %v4811_v35 = vshra.s32 %v3676_v27, 4  ;;  %v4810_v36 = vshra.s32 %v3679_v28, 4  ;;  %v4812_v37 = vshra.s32 %v3682_v29, 4  ;;  %p3552_p0 = scmp.ne.s32.totalorder %s2792_s13, %s3551_s15  ;;  %p3557_p2 = scmp.lt.s32.totalorder %s3551_s15, %s3551_s15 }
  0x11   :  { %4826 = vst [vmem:[#allocation7_spill] sm:$0xff] %v3682_v29  ;;  %vm42_vm2 = vcmp.eq.s32.totalorder %v4815_v30, %v35_v24  ;;  %vm43_vm3 = vcmp.eq.s32.totalorder %v4814_v31, %v35_v24  ;;  %vm40_vm4 = vcmp.eq.s32.totalorder %v4817_v32, %v35_v24  ;;  %vm36_vm5 = vcmp.eq.s32.totalorder %v4813_v33, %v35_v24 }
  0x12   :  { %v3701_v38 = vsel %vm42_vm2, 1.0, %v4819_v2  ;;  %v3704_v39 = vsel %vm43_vm3, 1.0, %v4819_v2  ;;  %vm41_vm6 = vcmp.eq.s32.totalorder %v4816_v34, %v35_v24  ;;  %v3709_v40 = vsel %vm40_vm4, 1.0, %v4819_v2  ;;  %p3558_p3 = por %p3557_p2, %p3556_p1 }
  0x13   :  { %v3286_v41 = vpack.i.bf16 %v3704_v39, %v3701_v38  ;;  %v3714_v42 = vsel %vm41_vm6, 1.0, %v4819_v2  ;;  %vm38_vm7 = vcmp.eq.s32.totalorder %v4811_v35, %v35_v24  ;;  %vm39_vm8 = vcmp.eq.s32.totalorder %v4810_v36, %v35_v24 }
  0x14   :  { %v3291_v43 = vpack.i.bf16 %v3714_v42, %v3709_v40  ;;  %v3723_v44 = vsel %vm38_vm7, 1.0, %v4819_v2  ;;  %v3726_v45 = vsel %vm39_vm8, 1.0, %v4819_v2  ;;  %vm37_vm9 = vcmp.eq.s32.totalorder %v4812_v37, %v35_v24  ;;  %p3559_p4 = pnand %p3558_p3, %p3552_p0 }
  0x15   :  { %3287 = vrot.lane.b32.xlu0 %v3286_v41, %s3573_s14  ;;  %v3296_v46 = vpack.i.bf16 %v3726_v45, %v3723_v44  ;;  %v3734_v47 = vsel %vm36_vm5, 1.0, %v4819_v2  ;;  %v3737_v48 = vsel %vm37_vm9, 1.0, %v4819_v2  ;;  %v3760_v61 = vsub.s32 1, %v3658_v20 }
  0x16   :  { %3292 = vrot.lane.b32.xlu1 %v3291_v43, %s3573_s14  ;;  %v3301_v49 = vpack.i.bf16 %v3737_v48, %v3734_v47  ;;  %v3763_v62 = vsub.s32 0, %v3658_v20  ;;  %v4827_v28 = vmov 0.0   ;;  %vm1697_vm6 = vcmask 261120  }
  0x17   :  { %v208_v3 = vrot.slane %v2824_v0, %v3760_v61 }
  0x18   :  { %v204_v4 = vrot.slane %v2824_v0, %v3763_v62 }
  0x19   :  { %3297 = vrot.lane.b32.xlu0 %v3296_v46, %s3573_s14 }
  0x1a   :  { %3302 = vrot.lane.b32.xlu1 %v3301_v49, %s3573_s14 }
  0x74   :  { %v136_v5 = vpop.permute.xlu0 %135 }
  0x75   :  { %3057 = vmatpush3.bf16.msra.mxu1 %v136_v5  ;;  %v132_v7 = vpop.permute.xlu1 %131 }
  0x76   :  { %3058 = vmatprep.subr.bf16.mxu1 %v4819_v2 }
  0x78   :  { %v134_v6 = vpop.permute.xlu0 %133 }
  0x79   :  { %3059 = vmatpush3.bf16.msra.mxu1 %v134_v6  ;;  %v130_v8 = vpop.permute.xlu1 %129 }
  0x7a   :  { %3060 = vmatprep.subr.bf16.mxu1 %v4819_v2 }
  0x7d   :  { %3061 = vmatpush3.bf16.msra.mxu1 %v132_v7 }
  0x7e   :  { %3062 = vmatprep.subr.bf16.mxu1 %v4819_v2 }
  0x81   :  { %3063 = vmatpush3.bf16.msra.mxu1 %v130_v8 }
  0x82   :  { %262 = vmatprep.subr.bf16.mxu1 %v3393_v9 }
  0x84   :  { %3065 = vmatmul.mubr.msk.bf16.vlgmr.msra.gmra.mxu1 %vm141_vm1, %v3390_v10 }
  0x85   :  { %263 = vmatpush1.bf16.msra.mxu1 %v3391_v11  ;;  %286 = vmatprep.mubr.bf16.mxu1 %v4818_v18 }
  0x86   :  { %264 = vmatprep.subr.bf16.mxu1 %v3396_v12 }
  0x87   :  { %v3288_v63 = vpop.permute.xlu0 %3287 }
  0x88   :  { %v3293_v1 = vpop.permute.xlu1 %3292  ;;  %v3770_v7 = vunpack.i.h.bf16 %v3288_v63  ;;  %v3772_v10 = vunpack.i.l.bf16 %v3288_v63 }
  0x89   :  { %265 = vmatpush1.bf16.msra.mxu1 %v3394_v13  ;;  %v3774_v11 = vunpack.i.h.bf16 %v3293_v1  ;;  %v3776_v12 = vunpack.i.l.bf16 %v3293_v1 }
  0x8a   :  { %266 = vmatprep.subr.bf16.mxu1 %v3399_v14 }
  0x8b   :  { %v3298_v8 = vpop.permute.xlu0 %3297 }
  0x8c   :  { %v3303_v14 = vpop.permute.xlu1 %3302  ;;  %v3786_v41 = vunpack.i.l.bf16 %v3298_v8 }
  0x8d   :  { %267 = vmatpush1.bf16.msra.mxu1 %v3397_v15  ;;  %v3788_v43 = vunpack.i.l.bf16 %v3303_v14 }
  0x8e   :  { %268 = vmatprep.subr.bf16.mxu1 %v3402_v16  ;;  %v3780_v16 = vunpack.i.h.bf16 %v3298_v8 }
  0x91   :  { %269 = vmatpush1.bf16.msra.mxu1 %v3400_v17  ;;  %v3782_v17 = vunpack.i.h.bf16 %v3303_v14 }
  0x92   :  { %3080 = vmatprep.subr.bf16.mxu1 %v4819_v2 }
 0x144   :  { %v179_v51 = vpop.f32.mrf.mxu1 }
 0x145   :  { %v180_v53 = vadd.f32 %v179_v51, %v103_v50 }
 0x146   :  { %v3066_v52 = vpop.f32.mrf.mxu1 }
 0x147   :  { %v3750_v58 = vadd.f32 %v186_v54, %v180_v53 }
 0x148   :  { %v182_v55 = vpop.f32.mrf.mxu1 }
 0x149   :  { %v183_v56 = vadd.f32 %v182_v55, %v103_v50 }
 0x14a   :  { %v3067_v57 = vpop.f32.mrf.mxu1 }
 0x14b   :  { %v3752_v59 = vadd.f32 %v186_v54, %v183_v56 }
 0x14d   :  { %v197_v60 = vpack.c.bf16 %v3752_v59, %v3750_v58 }
 0x14f   :  { %2833 = vmatmul.mubr.msk.bf16.vlgmr.msra.gmra.mxu1 %vm141_vm1, %v197_v60 }
 0x150   :  { %3088 = vmatprep.mubr.msk.bf16.mxu1 %vm3575_vm0, %v4819_v2 }
 0x20f   :  { %v288_v5 = vpop.f32.mrf.mxu1 }
 0x210   :  { %v3778_v13 = vadd.f32 %v288_v5, %v204_v4 }
 0x211   :  { %v290_v6 = vpop.f32.mrf.mxu1 }
 0x212   :  { %v291_v9 = vadd.f32 %v290_v6, %v208_v3  ;;  %v335_v50 = vmul.f32 %v3772_v10, %v3778_v13  ;;  %v333_v52 = vmul.f32 %v3776_v12, %v3778_v13  ;;  %v331_v5 = vmul.f32 %v3786_v41, %v3778_v13 }
 0x213   :  { %v292_v15 = vpop.f32.mrf.mxu1  ;;  %v329_v6 = vmul.f32 %v3788_v43, %v3778_v13 }
 0x214   :  { %v3784_v19 = vadd.f32 %v292_v15, %v204_v4  ;;  %v343_v46 = vmul.f32 %v3701_v38, %v291_v9  ;;  %v341_v0 = vmul.f32 %v3709_v40, %v291_v9 }
 0x215   :  { %v294_v24 = vpop.f32.mrf.mxu1 }
 0x216   :  { %v295_v49 = vadd.f32 %v294_v24, %v208_v3  ;;  %v336_v51 = vmul.f32 %v3770_v7, %v3784_v19  ;;  %v334_v53 = vmul.f32 %v3774_v11, %v3784_v19  ;;  %v332_v60 = vmul.f32 %v3780_v16, %v3784_v19 }
 0x217   :  { %v330_v63 = vmul.f32 %v3782_v17, %v3784_v19  ;;  %v351_v1 = vsel %vm141_vm1, %v343_v46, %v3772_v10  ;;  %v353_v15 = vpack.c.bf16 %v3784_v19, %v3778_v13  ;;  %v337_v19 = vmul.f32 %v3734_v47, %v291_v9 }
 0x218   :  { %v342_v54 = vmul.f32 %v3714_v42, %v295_v49  ;;  %v344_v55 = vmul.f32 %v3704_v39, %v295_v49  ;;  %v357_v56 = vpack.c.bf16 %v336_v51, %v335_v50  ;;  %v356_v57 = vpack.c.bf16 %v334_v53, %v333_v52 }
 0x219   :  { %v340_v8 = vmul.f32 %v3726_v45, %v295_v49  ;;  %v355_v24 = vpack.c.bf16 %v332_v60, %v331_v5  ;;  %v354_v46 = vpack.c.bf16 %v330_v63, %v329_v6  ;;  %v339_v50 = vmul.f32 %v3723_v44, %v291_v9 }
 0x21a   :  { %v352_v3 = vsel %vm141_vm1, %v344_v55, %v3770_v7  ;;  %368 = vrot.lane.b32.xlu0 %v357_v56, %s3573_s14  ;;  %366 = vrot.lane.b32.xlu1 %v356_v57, %s3573_s14  ;;  %v350_v14 = vsel %vm141_vm1, %v342_v54, %v3774_v11  ;;  %v349_v51 = vsel %vm141_vm1, %v341_v0, %v3776_v12  ;;  %v87_v6 = vand.u32 15, %v3660_v21 }
 0x21b   :  { %v446_v4 = vpack.c.bf16 %v352_v3, %v351_v1  ;;  %v445_v52 = vpack.c.bf16 %v350_v14, %v349_v51  ;;  %v338_v53 = vmul.f32 %v3737_v48, %v295_v49  ;;  %v348_v13 = vsel %vm141_vm1, %v340_v8, %v3780_v16 }
 0x21c   :  { %v347_v54 = vsel %vm141_vm1, %v339_v50, %v3786_v41  ;;  %v345_v49 = vsel %vm141_vm1, %v337_v19, %v3788_v43  ;;  %v85_v8 = vshra.s32 %v3658_v20, 3  ;;  %v88_v14 = vshra.s32 %v87_v6, 3 }
 0x21d   :  { %3081 = vmatpush3.bf16.msra.mxu1 %v446_v4  ;;  %v444_v55 = vpack.c.bf16 %v348_v13, %v347_v54  ;;  %v346_v56 = vsel %vm141_vm1, %v338_v53, %v3782_v17  ;;  %v3577_v50 = vmov -1e+30  }
 0x21e   :  { %3082 = vmatprep.subr.bf16.mxu1 %v4819_v2  ;;  %364 = vrot.lane.b32.xlu0 %v355_v24, %s3573_s14  ;;  %v443_v57 = vpack.c.bf16 %v346_v56, %v345_v49  ;;  %vm89_vm10 = vcmp.eq.s32.totalorder %v85_v8, %v88_v14  ;;  %v86_v24 = vshra.s32 %v3682_v29, 3  ;;  %v3403_v8 = vld [vmem:[%s4807_s1 + $0x34] ss:$8 sps:$4 sm:$0xff]  }
 0x21f   :  { %362 = vrot.lane.b32.xlu1 %v354_v46, %s3573_s14  ;;  %v3852_v51 = vsel %vm89_vm10, 0.0, %v3577_v50 }
 0x220   :  { %vm90_vm11 = vcmp.eq.s32.totalorder %v86_v24, %v88_v14  ;;  %v3404_v14 = vld [vmem:[%s4807_s1 + $0x24] ss:$8 sps:$4 sm:$0xff]   ;;  %v3405_v24 = vld [vmem:[%s4807_s1 + $0x14] ss:$8 sps:$4 sm:$0xff]  }
 0x221   :  { %3083 = vmatpush3.bf16.msra.mxu1 %v445_v52  ;;  %v3855_v19 = vsel %vm90_vm11, 0.0, %v3577_v50 }
 0x222   :  { %3084 = vmatprep.subr.bf16.mxu1 %v4819_v2 }
 0x225   :  { %3085 = vmatpush3.bf16.msra.mxu1 %v444_v55 }
 0x226   :  { %3086 = vmatprep.subr.bf16.mxu1 %v4819_v2 }
 0x229   :  { %3087 = vmatpush3.bf16.msra.mxu1 %v443_v57 }
 0x22a   :  { %3092 = vmatprep.subr.bf16.mxu1 %v4819_v2 }
 0x28c   :  { %v369_v9 = vpop.permute.xlu0 %368  ;;  %v367_v63 = vpop.permute.xlu1 %366 }
 0x28d   :  { %v383_v60 = vsel %vm141_vm1, %v369_v9, 0  ;;  %v380_v0 = vsel %vm141_vm1, %v367_v63, 0 }
 0x28e   :  { %3069 = vmatpush3.bf16.xpose.msra.mxu0 %v383_v60 }
 0x28f   :  { %3070 = vmatprep.subr.bf16.mxu0 %v4819_v2 }
 0x290   :  { %v365_v1 = vpop.permute.xlu0 %364 }
 0x291   :  { %v377_v3 = vsel %vm141_vm1, %v365_v1, 0  ;;  %v363_v4 = vpop.permute.xlu1 %362 }
 0x292   :  { %v374_v5 = vsel %vm141_vm1, %v363_v4, 0 }
 0x296   :  { %3071 = vmatpush3.bf16.xpose.msra.mxu0 %v380_v0 }
 0x297   :  { %3072 = vmatprep.subr.bf16.mxu0 %v4819_v2 }
 0x29e   :  { %3073 = vmatpush3.bf16.xpose.msra.mxu0 %v377_v3 }
 0x29f   :  { %3074 = vmatprep.subr.bf16.mxu0 %v4819_v2 }
 0x2a6   :  { %3075 = vmatpush3.bf16.xpose.msra.mxu0 %v374_v5 }
 0x2ad   :  { %3077 = vmatmul.mubr.msk.bf16.vlgmr.msra.gmra.mxu0 %vm141_vm1, %v353_v15 }
 0x2ae   :  { %723 = vmatprep.mubr.bf16.mxu0 %v4818_v18 }
 0x36d   :  { %v419_v46 = vpop.f32.mrf.mxu0 }
 0x36e   :  { %v426_v52 = vmul.f32 0.25, %v419_v46 }
 0x36f   :  { %v3078_v53 = vpop.f32.mrf.mxu0 }
 0x370   :  { %v428_v13 = vadd.f32 %v426_v52, %v3852_v51 }
 0x371   :  { %v422_v15 = vpop.f32.mrf.mxu0 }
 0x372   :  { %v427_v54 = vmul.f32 0.25, %v422_v15  ;;  %v430_v55 = vsel %vm141_vm1, %v428_v13, -inf }
 0x373   :  { %431 = vmax.xlane.f32.xlu0 %v430_v55  ;;  %v3079_v56 = vpop.f32.mrf.mxu0 }
 0x374   :  { %v429_v49 = vadd.f32 %v427_v54, %v3855_v19 }
 0x376   :  { %v433_v57 = vsel %vm141_vm1, %v429_v49, -inf }
 0x377   :  { %434 = vmax.xlane.f32.xlu1 %v433_v57  ;;  %v3406_v57 = vld [vmem:[%s4807_s1 + $0x4] ss:$8 sps:$4 sm:$0xff]  }
 0x388   :  { %539 = vrot.lane.b32.xlu1 %v3404_v14, %s3578_s22 }
 0x389   :  { %541 = vrot.lane.b32.xlu0 %v3403_v8, %s3578_s22 }
 0x38d   :  { %537 = vrot.lane.b32.xlu0 %v3405_v24, %s3578_s22 }
 0x3fc   :  { %v432_v9 = vpop.xlane.xlu0 %431 }
 0x3fd   :  { %v436_v60 = vsub.f32 %v428_v13, %v432_v9 }
 0x3ff   :  { %v438_v63 = vmul.f32 1.442695, %v436_v60 }
 0x400   :  { %v435_v0 = vpop.xlane.xlu1 %434  ;;  %v542_v46 = vpop.permute.xlu0 %541 }
 0x401   :  { %v437_v1 = vsub.f32 %v429_v49, %v435_v0  ;;  %3479 = vpow2.f32 %v438_v63 }
 0x403   :  { %v440_v3 = vmul.f32 1.442695, %v437_v1 }
 0x404   :  { %v540_v50 = vpop.permute.xlu1 %539  ;;  %v538_v13 = vpop.permute.xlu0 %537 }
 0x405   :  { %3481 = vpow2.f32 %v440_v3 }
 0x40e   :  { %v3480_v4 = vpop.eup %3479 }
 0x412   :  { %v3482_v5 = vpop.eup %3481 }
 0x413   :  { %v442_v6 = vpack.c.bf16 %v3482_v5, %v3480_v4  ;;  %v514_v5 = vld [vmem:[%s4808_s2 + $0x22] ss:$0 sm:$0xff] }
 0x415   :  { %3089 = vmatmul.mubr.msk.bf16.vlgmr.msra.gmra.mxu1 %vm141_vm1, %v442_v6 }
 0x416   :  { %3100 = vmatprep.mubr.msk.bf16.mxu1 %vm3575_vm0, %v4819_v2  ;;  %3093 = vmatpush3.bf16.msra.mxu1 %v542_v46 }
 0x417   :  { %3094 = vmatprep.subr.bf16.mxu1 %v4819_v2 }
 0x41a   :  { %3095 = vmatpush3.bf16.msra.mxu1 %v540_v50 }
 0x41b   :  { %3096 = vmatprep.subr.bf16.mxu1 %v4819_v2 }
 0x41e   :  { %3097 = vmatpush3.bf16.msra.mxu1 %v538_v13 }
 0x41f   :  { %3098 = vmatprep.subr.bf16.mxu1 %v4819_v2 }
 0x4d5   :  { %v484_v52 = vpop.f32.mrf.mxu1 }
 0x4d6   :  { %v491_v53 = vmax.f32 %v484_v52, 1e-30 }
 0x4d7   :  { %v3090_v15 = vpop.f32.mrf.mxu1 }
 0x4d8   :  { %3483 = vrcp.f32 %v491_v53 }
 0x4d9   :  { %v487_v54 = vpop.f32.mrf.mxu1 }
 0x4da   :  { %v492_v55 = vmax.f32 %v487_v54, 1e-30 }
 0x4db   :  { %v3091_v56 = vpop.f32.mrf.mxu1 }
 0x4dc   :  { %3485 = vrcp.f32 %v492_v55 }
 0x4e5   :  { %v3484_v49 = vpop.eup %3483 }
 0x4e6   :  { %497 = vrot.lane.b32.xlu1 %v3484_v49, %s3573_s14 }
 0x4e9   :  { %v3486_v9 = vpop.eup %3485 }
 0x4ea   :  { %499 = vrot.lane.b32.xlu0 %v3486_v9, %s3573_s14  ;;  %535 = vrot.lane.b32.xlu1 %v3406_v57, %s3578_s22 }
 0x558   :  { %v498_v60 = vpop.permute.xlu1 %497 }
 0x559   :  { %v503_v1 = vmul.f32 %v498_v60, %v484_v52 }
 0x55c   :  { %v500_v63 = vpop.permute.xlu0 %499  ;;  %v536_v0 = vpop.permute.xlu1 %535 }
 0x55d   :  { %v504_v3 = vmul.f32 %v500_v63, %v487_v54  ;;  %3099 = vmatpush3.bf16.msra.mxu1 %v536_v0 }
 0x55f   :  { %v513_v4 = vpack.c.bf16 %v504_v3, %v503_v1  ;;  %v3407_v1 = vld [vmem:[%s4807_s1 + $0x130] ss:$8 sps:$4 sm:$0xff]   ;;  %v3412_v3 = vld [vmem:[%s4807_s1 + $0x124] ss:$8 sps:$4 sm:$0xff]  }
 0x561   :  { %3101 = vmatmul.mubr.msk.bf16.vlgmr.msra.gmra.mxu1 %vm141_vm1, %v513_v4  ;;  %v3410_v4 = vld [vmem:[%s4807_s1 + $0x120] ss:$8 sps:$4 sm:$0xff]  }
 0x621   :  { %v584_v6 = vpop.f32.mrf.mxu1 }
 0x622   :  { %v585_v8 = vadd.f32 %v584_v6, %v514_v5  ;;  %v3413_v6 = vld [vmem:[%s4807_s1 + $0x110] ss:$8 sps:$4 sm:$0xff]  }
 0x623   :  { %v3102_v14 = vpop.f32.mrf.mxu1 }
 0x624   :  { %v591_v24 = vadd.f32 %v585_v8, %v3750_v58  ;;  %v3418_v8 = vld [vmem:[%s4807_s1 + $0x104] ss:$8 sps:$4 sm:$0xff]   ;;  %v3416_v14 = vld [vmem:[%s4807_s1 + $0x100] ss:$8 sps:$4 sm:$0xff]  }
 0x625   :  { %v587_v46 = vpop.f32.mrf.mxu1 }
 0x626   :  { %v588_v50 = vadd.f32 %v587_v46, %v514_v5  ;;  %v593_v53 = vsel %vm141_vm1, %v591_v24, 0.0  ;;  %v3415_v5 = vld [vmem:[%s4807_s1 + $0x114] ss:$8 sps:$4 sm:$0xff]   ;;  %v3926_v46 = vld [vmem:[%s4807_s1 + $0x70] ss:$8 sps:$4 sm:$0xff]  }
 0x627   :  { %594 = vadd.xlane.f32.xlu0 %v593_v53  ;;  %v3103_v52 = vpop.f32.mrf.mxu1  ;;  %v3938_v53 = vld [vmem:[%s4807_s1 + $0x60] ss:$8 sps:$4 sm:$0xff]  }
 0x628   :  { %v592_v13 = vadd.f32 %v588_v50, %v3752_v59  ;;  %v3409_v59 = vld [vmem:[%s4807_s1 + $0x134] ss:$8 sps:$4 sm:$0xff]   ;;  %v3931_v50 = vld [vmem:[%s4807_s1 + $0xe0] ss:$8 sps:$4 sm:$0xff]   ;;  %v3944_v52 = vld [vmem:[%s4807_s1 + $0xd0] ss:$8 sps:$4 sm:$0xff]  }
 0x629   :  { %699 = vmatprep.subr.bf16.mxu0 %v3409_v59 }
 0x62a   :  { %v596_v15 = vsel %vm141_vm1, %v592_v13, 0.0  ;;  %700 = vmatpush1.bf16.msra.mxu0 %v3407_v1 }
 0x62b   :  { %597 = vadd.xlane.f32.xlu1 %v596_v15  ;;  %701 = vmatprep.subr.bf16.mxu0 %v3412_v3  ;;  %v3956_v15 = vld [vmem:[%s4807_s1 + $0xc0] ss:$8 sps:$4 sm:$0xff]  }
 0x62e   :  { %702 = vmatpush1.bf16.msra.mxu0 %v3410_v4  ;;  %v620_v4 = vld [vmem:[%s4808_s2 + $0x25] ss:$0 sm:$0xff] }
 0x62f   :  { %703 = vmatprep.subr.bf16.mxu0 %v3415_v5 }
 0x632   :  { %704 = vmatpush1.bf16.msra.mxu0 %v3413_v6 }
 0x633   :  { %705 = vmatprep.subr.bf16.mxu0 %v3418_v8 }
 0x636   :  { %706 = vmatpush1.bf16.msra.mxu0 %v3416_v14  ;;  %v623_v14 = vld [vmem:[%s4808_s2 + $0x26] ss:$0 sm:$0xff] }
 0x6b0   :  { %v595_v54 = vpop.xlane.xlu0 %594 }
 0x6b1   :  { %v600_v55 = vmul.f32 0.015625, %v595_v54  ;;  %v3962_v54 = vld [vmem:[%s4807_s1 + $0x40] ss:$8 sps:$4 sm:$0xff]  }
 0x6b3   :  { %v602_v56 = vsub.f32 %v591_v24, %v600_v55  ;;  %v3921_v24 = vld [vmem:[%s4807_s1 + $0xf0] ss:$8 sps:$4 sm:$0xff]  }
 0x6b4   :  { %v598_v49 = vpop.xlane.xlu1 %597  ;;  %2942 = vmatprep.subr.bf16.mxu1 %v3921_v24  ;;  %v3968_v55 = vld [vmem:[%s4807_s1 + $0xb0] ss:$8 sps:$4 sm:$0xff]  }
 0x6b5   :  { %v601_v57 = vmul.f32 0.015625, %v598_v49  ;;  %v604_v9 = vmul.f32 %v602_v56, %v602_v56  ;;  %2943 = vmatpush3.bf16.msra.mxu1 %v3926_v46  ;;  %v3974_v49 = vld [vmem:[%s4807_s1 + $0x30] ss:$8 sps:$4 sm:$0xff]  }
 0x6b6   :  { %2944 = vmatprep.subr.bf16.mxu1 %v3931_v50 }
 0x6b7   :  { %v603_v60 = vsub.f32 %v592_v13, %v601_v57  ;;  %v606_v58 = vsel %vm141_vm1, %v604_v9, 0.0  ;;  %v3950_v13 = vld [vmem:[%s4807_s1 + $0x50] ss:$8 sps:$4 sm:$0xff]  }
 0x6b8   :  { %607 = vadd.xlane.f32.xlu0 %v606_v58 }
 0x6b9   :  { %v605_v63 = vmul.f32 %v603_v60, %v603_v60  ;;  %2945 = vmatpush3.bf16.msra.mxu1 %v3938_v53 }
 0x6ba   :  { %2946 = vmatprep.subr.bf16.mxu1 %v3944_v52 }
 0x6bb   :  { %v609_v0 = vsel %vm141_vm1, %v605_v63, 0.0 }
 0x6bc   :  { %610 = vadd.xlane.f32.xlu0 %v609_v0 }
 0x6bd   :  { %2947 = vmatpush3.bf16.msra.mxu1 %v3950_v13 }
 0x6be   :  { %2948 = vmatprep.subr.bf16.mxu1 %v3956_v15 }
 0x6c1   :  { %2949 = vmatpush3.bf16.msra.mxu1 %v3962_v54 }
 0x6c2   :  { %2950 = vmatprep.subr.bf16.mxu1 %v3968_v55 }
 0x6c5   :  { %2951 = vmatpush3.bf16.msra.mxu1 %v3974_v49 }
 0x741   :  { %v608_v57 = vpop.xlane.xlu0 %607 }
 0x742   :  { %v612_v9 = vmul.f32 0.015625, %v608_v57 }
 0x744   :  { %v614_v58 = vadd.f32 1e-05, %v612_v9 }
 0x745   :  { %v611_v63 = vpop.xlane.xlu0 %610 }
 0x746   :  { %3487 = vrsqrt.f32 %v614_v58  ;;  %v613_v0 = vmul.f32 0.015625, %v611_v63  ;;  %v4001_v63 = vld [vmem:[%s4807_s1 + $0x90] ss:$8 sps:$4 sm:$0xff]  }
 0x748   :  { %v615_v59 = vadd.f32 1e-05, %v613_v0  ;;  %v4006_v0 = vld [vmem:[%s4807_s1 + $0x10] ss:$8 sps:$4 sm:$0xff]  }
 0x74a   :  { %3489 = vrsqrt.f32 %v615_v59  ;;  %v4012_v59 = vld [vmem:[%s4807_s1 + $0x80] ss:$8 sps:$4 sm:$0xff]  }
 0x753   :  { %v3488_v1 = vpop.eup %3487 }
 0x754   :  { %v618_v3 = vmul.f32 %v3488_v1, %v602_v56  ;;  %v3989_v56 = vld [vmem:[%s4807_s1 + $0xa0] ss:$8 sps:$4 sm:$0xff]  }
 0x755   :  { %2952 = vmatprep.subr.bf16.mxu1 %v3989_v56  ;;  %v4018_v1 = vld [vmem:[%s4807_s1] ss:$8 sps:$4 sm:$0xff]  }
 0x756   :  { %v621_v8 = vmul.f32 %v620_v4, %v618_v3  ;;  %v2841_v3 = vld [vmem:[%s4808_s2 + $0x23] ss:$8 sm:$0x3] }
 0x757   :  { %v3490_v5 = vpop.eup %3489 }
 0x758   :  { %v619_v6 = vmul.f32 %v3490_v5, %v603_v60  ;;  %v624_v9 = vadd.f32 %v623_v14, %v621_v8  ;;  %v3994_v60 = vld [vmem:[%s4807_s1 + $0x20] ss:$8 sps:$4 sm:$0xff]   ;;  %v645_v5 = vrot.slane %v2841_v3, %v3760_v61 }
 0x759   :  { %2953 = vmatpush3.bf16.msra.mxu1 %v3994_v60 }
 0x75a   :  { %v622_v57 = vmul.f32 %v620_v4, %v619_v6  ;;  %2954 = vmatprep.subr.bf16.mxu1 %v4001_v63  ;;  %v641_v6 = vrot.slane %v2841_v3, %v3763_v62  ;;  %v772_v3 = vld [vmem:[%s4808_s2 + $0x24] ss:$0 sm:$0xff] }
 0x75c   :  { %v625_v36 = vadd.f32 %v623_v14, %v622_v57 }
 0x75d   :  { %2955 = vmatpush3.bf16.msra.mxu1 %v4006_v0 }
 0x75e   :  { %v634_v58 = vpack.c.bf16 %v625_v36, %v624_v9  ;;  %2956 = vmatprep.subr.bf16.mxu1 %v4012_v59 }
 0x760   :  { %2850 = vmatmul.mubr.msk.bf16.vlgmr.msra.gmra.mxu0 %vm141_vm1, %v634_v58 }
 0x761   :  { %1041 = vmatprep.mubr.bf16.mxu0 %v4818_v18  ;;  %2957 = vmatpush3.bf16.msra.mxu1 %v4018_v1 }
 0x762   :  { %3116 = vmatprep.subr.bf16.mxu1 %v4819_v2 }
 0x820   :  { %v725_v4 = vpop.f32.mrf.mxu0 }
 0x821   :  { %v726_v35 = vadd.f32 %v725_v4, %v641_v6 }
 0x822   :  { %v727_v8 = vpop.f32.mrf.mxu0 }
 0x823   :  { %v728_v57 = vadd.f32 %v727_v8, %v645_v5  ;;  %v734_v32 = vmax.f32 %v726_v35, 0.0 }
 0x824   :  { %v729_v14 = vpop.f32.mrf.mxu0 }
 0x825   :  { %v730_v58 = vadd.f32 %v729_v14, %v641_v6  ;;  %v735_v30 = vmax.f32 %v728_v57, 0.0 }
 0x826   :  { %v731_v37 = vpop.f32.mrf.mxu0 }
 0x827   :  { %v732_v33 = vadd.f32 %v731_v37, %v645_v5  ;;  %v736_v31 = vmax.f32 %v730_v58, 0.0 }
 0x829   :  { %v737_v34 = vmax.f32 %v732_v33, 0.0  ;;  %v770_v2 = vpack.c.bf16 %v736_v31, %v734_v32 }
 0x82b   :  { %v771_v18 = vpack.c.bf16 %v737_v34, %v735_v30 }
 0x82d   :  { %901 = vmatprep.mubr.bf16.mxu1 %v771_v18 }
 0x82e   :  { %902 = vmatmul.mubr.bf16.vlgmr.msra.gmra.mxu1 %v770_v2 }
 0x82f   :  { %3124 = vmatprep.mubr.msk.bf16.mxu1 %vm3575_vm0, %v4827_v28 }
 0x8ee   :  { %v2958_v27 = vpop.f32.mrf.mxu1 }
 0x8f0   :  { %v2959_v8 = vpop.f32.mrf.mxu1 }
 0x8f1   :  { %v2960_v4 = vadd.f32 %v2959_v8, %v2958_v27 }
 0x8f2   :  { %v2961_v6 = vpop.f32.mrf.mxu1 }
 0x8f3   :  { %v904_v37 = vadd.f32 %v2960_v4, %v772_v3 }
 0x8f4   :  { %v2962_v5 = vpop.f32.mrf.mxu1 }
 0x8f5   :  { %v2963_v14 = vadd.f32 %v2962_v5, %v2961_v6  ;;  %v910_v33 = vadd.f32 %v904_v37, %v624_v9  ;;  %v3440_v6 = vld [vmem:[%s4807_s1 + $0x1e4] ss:$8 sps:$4 sm:$0xff]   ;;  %v3443_v37 = vld [vmem:[%s4807_s1 + $0x1d4] ss:$8 sps:$4 sm:$0xff]   ;;  %v3441_v5 = vld [vmem:[%s4807_s1 + $0x1d0] ss:$8 sps:$4 sm:$0xff]  }
 0x8f7   :  { %v907_v35 = vadd.f32 %v2963_v14, %v772_v3  ;;  %v912_v30 = vsel %vm141_vm1, %v910_v33, 0.0  ;;  %v3435_v3 = vld [vmem:[%s4807_s1 + $0x1f0] ss:$8 sps:$4 sm:$0xff]   ;;  %v3446_v14 = vld [vmem:[%s4807_s1 + $0x1c4] ss:$8 sps:$4 sm:$0xff]  }
 0x8f8   :  { %913 = vadd.xlane.f32.xlu1 %v912_v30 }
 0x8f9   :  { %v911_v2 = vadd.f32 %v907_v35, %v625_v36  ;;  %v3437_v36 = vld [vmem:[%s4807_s1 + $0x1f4] ss:$8 sps:$4 sm:$0xff]  }
 0x8fa   :  { %1017 = vmatprep.subr.bf16.mxu0 %v3437_v36 }
 0x8fb   :  { %v915_v18 = vsel %vm141_vm1, %v911_v2, 0.0  ;;  %1018 = vmatpush1.bf16.msra.mxu0 %v3435_v3  ;;  %v941_v3 = vld [vmem:[%s4808_s2 + $0x30] ss:$0 sm:$0xff] }
 0x8fc   :  { %916 = vadd.xlane.f32.xlu0 %v915_v18  ;;  %1019 = vmatprep.subr.bf16.mxu0 %v3440_v6 }
 0x981   :  { %v914_v31 = vpop.xlane.xlu1 %913 }
 0x982   :  { %v918_v32 = vmul.f32 0.015625, %v914_v31 }
 0x984   :  { %v920_v34 = vsub.f32 %v910_v33, %v918_v32  ;;  %v3444_v33 = vld [vmem:[%s4807_s1 + $0x1c0] ss:$8 sps:$4 sm:$0xff]  }
 0x985   :  { %v917_v57 = vpop.xlane.xlu0 %916 }
 0x986   :  { %v919_v58 = vmul.f32 0.015625, %v917_v57  ;;  %v922_v29 = vmul.f32 %v920_v34, %v920_v34 }
 0x988   :  { %v921_v27 = vsub.f32 %v911_v2, %v919_v58  ;;  %v924_v8 = vsel %vm141_vm1, %v922_v29, 0.0  ;;  %v3438_v29 = vld [vmem:[%s4807_s1 + $0x1e0] ss:$8 sps:$4 sm:$0xff]  }
 0x989   :  { %925 = vadd.xlane.f32.xlu1 %v924_v8  ;;  %1020 = vmatpush1.bf16.msra.mxu0 %v3438_v29  ;;  %v938_v8 = vld [vmem:[%s4808_s2 + $0x27] ss:$0 sm:$0xff] }
 0x98a   :  { %v923_v4 = vmul.f32 %v921_v27, %v921_v27  ;;  %1021 = vmatprep.subr.bf16.mxu0 %v3443_v37 }
 0x98c   :  { %v927_v9 = vsel %vm141_vm1, %v923_v4, 0.0 }
 0x98d   :  { %928 = vadd.xlane.f32.xlu0 %v927_v9  ;;  %1022 = vmatpush1.bf16.msra.mxu0 %v3441_v5 }
 0x98e   :  { %1023 = vmatprep.subr.bf16.mxu0 %v3446_v14 }
 0x991   :  { %1024 = vmatpush1.bf16.msra.mxu0 %v3444_v33 }
 0x992   :  { %3104 = vmatprep.subr.bf16.mxu0 %v4827_v28 }
 0xa12   :  { %v926_v35 = vpop.xlane.xlu1 %925 }
 0xa13   :  { %v930_v30 = vmul.f32 0.015625, %v926_v35 }
 0xa15   :  { %v932_v2 = vadd.f32 1e-05, %v930_v30 }
 0xa16   :  { %v929_v18 = vpop.xlane.xlu0 %928 }
 0xa17   :  { %3491 = vrsqrt.f32 %v932_v2  ;;  %v931_v31 = vmul.f32 0.015625, %v929_v18 }
 0xa19   :  { %v933_v32 = vadd.f32 1e-05, %v931_v31 }
 0xa1b   :  { %3493 = vrsqrt.f32 %v933_v32 }
 0xa24   :  { %v3492_v57 = vpop.eup %3491 }
 0xa25   :  { %v936_v58 = vmul.f32 %v3492_v57, %v920_v34  ;;  %v2867_v34 = vld [vmem:[%s4808_s2 + $0x31] ss:$8 sm:$0x3] }
 0xa26   :  { %v959_v14 = vrot.slane %v2867_v34, %v3763_v62 }
 0xa27   :  { %v939_v36 = vmul.f32 %v938_v8, %v936_v58 }
 0xa28   :  { %v3494_v4 = vpop.eup %3493 }
 0xa29   :  { %v937_v9 = vmul.f32 %v3494_v4, %v921_v27  ;;  %v4068_v29 = vadd.f32 %v941_v3, %v939_v36  ;;  %v963_v27 = vrot.slane %v2867_v34, %v3760_v61 }
 0xa2b   :  { %v940_v6 = vmul.f32 %v938_v8, %v937_v9 }
 0xa2d   :  { %v4070_v37 = vadd.f32 %v941_v3, %v940_v6 }
 0xa2f   :  { %v952_v5 = vpack.c.bf16 %v4070_v37, %v4068_v29 }
 0xa31   :  { %2876 = vmatmul.mubr.msk.bf16.vlgmr.msra.gmra.mxu0 %vm141_vm1, %v952_v5 }
 0xa32   :  { %3112 = vmatprep.mubr.msk.bf16.mxu0 %vm3575_vm0, %v4827_v28 }
 0xaf1   :  { %v1043_v33 = vpop.f32.mrf.mxu0 }
 0xaf2   :  { %v4082_v2 = vadd.f32 %v1043_v33, %v959_v14 }
 0xaf3   :  { %v1045_v35 = vpop.f32.mrf.mxu0 }
 0xaf4   :  { %v1046_v30 = vadd.f32 %v1045_v35, %v963_v27  ;;  %v1058_v8 = vmul.f32 %v3772_v10, %v4082_v2  ;;  %v1056_v9 = vmul.f32 %v3776_v12, %v4082_v2 }
 0xaf5   :  { %v1047_v18 = vpop.f32.mrf.mxu0 }
 0xaf6   :  { %v4084_v31 = vadd.f32 %v1047_v18, %v959_v14  ;;  %v1066_v57 = vmul.f32 %v3701_v38, %v1046_v30 }
 0xaf7   :  { %v1049_v32 = vpop.f32.mrf.mxu0 }
 0xaf8   :  { %v1050_v58 = vadd.f32 %v1049_v32, %v963_v27  ;;  %v1059_v4 = vmul.f32 %v3770_v7, %v4084_v31  ;;  %v1057_v36 = vmul.f32 %v3774_v11, %v4084_v31  ;;  %v1055_v38 = vmul.f32 %v3780_v16, %v4084_v31 }
 0xaf9   :  { %v1064_v27 = vmul.f32 %v3709_v40, %v1046_v30  ;;  %v1074_v14 = vsel %vm141_vm1, %v1066_v57, %v3772_v10  ;;  %v1076_v40 = vpack.c.bf16 %v4084_v31, %v4082_v2  ;;  %v1062_v32 = vmul.f32 %v3723_v44, %v1046_v30 }
 0xafa   :  { %v1065_v3 = vmul.f32 %v3714_v42, %v1050_v58  ;;  %v1067_v6 = vmul.f32 %v3704_v39, %v1050_v58  ;;  %v1080_v5 = vpack.c.bf16 %v1059_v4, %v1058_v8  ;;  %v1079_v34 = vpack.c.bf16 %v1057_v36, %v1056_v9 }
 0xafb   :  { %v1054_v39 = vmul.f32 %v3786_v41, %v4082_v2  ;;  %v1063_v35 = vmul.f32 %v3726_v45, %v1050_v58  ;;  %v1072_v57 = vsel %vm141_vm1, %v1064_v27, %v3776_v12  ;;  %v1061_v8 = vmul.f32 %v3737_v48, %v1050_v58 }
 0xafc   :  { %v1075_v33 = vsel %vm141_vm1, %v1067_v6, %v3770_v7  ;;  %1091 = vrot.lane.b32.xlu1 %v1080_v5, %s3573_s14  ;;  %1089 = vrot.lane.b32.xlu0 %v1079_v34, %s3573_s14  ;;  %v1073_v18 = vsel %vm141_vm1, %v1065_v3, %v3774_v11  ;;  %v1053_v7 = vmul.f32 %v3782_v17, %v4084_v31  ;;  %v4828_v6 = vmov 0  }
 0xafd   :  { %v1169_v42 = vpack.c.bf16 %v1075_v33, %v1074_v14  ;;  %v1078_v10 = vpack.c.bf16 %v1055_v38, %v1054_v39  ;;  %v1168_v45 = vpack.c.bf16 %v1073_v18, %v1072_v57  ;;  %v1052_v11 = vmul.f32 %v3788_v43, %v4082_v2 }
 0xafe   :  { %v1071_v4 = vsel %vm141_vm1, %v1063_v35, %v3780_v16  ;;  %v1060_v44 = vmul.f32 %v3734_v47, %v1046_v30  ;;  %v1070_v12 = vsel %vm141_vm1, %v1062_v32, %v3786_v41  ;;  %v1069_v2 = vsel %vm141_vm1, %v1061_v8, %v3782_v17 }
 0xaff   :  { %3117 = vmatpush3.bf16.msra.mxu1 %v1169_v42  ;;  %v1077_v31 = vpack.c.bf16 %v1053_v7, %v1052_v11  ;;  %v1167_v9 = vpack.c.bf16 %v1071_v4, %v1070_v12  ;;  %v3449_v12 = vld [vmem:[%s4807_s1 + $0x194] ss:$8 sps:$4 sm:$0xff]  }
 0xb00   :  { %3118 = vmatprep.subr.bf16.mxu1 %v4827_v28  ;;  %1087 = vrot.lane.b32.xlu1 %v1078_v10, %s3573_s14  ;;  %v1068_v48 = vsel %vm141_vm1, %v1060_v44, %v3788_v43  ;;  %v3448_v44 = vld [vmem:[%s4807_s1 + $0x1a4] ss:$8 sps:$4 sm:$0xff]  }
 0xb01   :  { %v1166_v16 = vpack.c.bf16 %v1069_v2, %v1068_v48 }
 0xb03   :  { %3119 = vmatpush3.bf16.msra.mxu1 %v1168_v45 }
 0xb04   :  { %3120 = vmatprep.subr.bf16.mxu1 %v4827_v28  ;;  %1085 = vrot.lane.b32.xlu1 %v1077_v31, %s3573_s14  ;;  %v3447_v31 = vld [vmem:[%s4807_s1 + $0x1b4] ss:$8 sps:$4 sm:$0xff]  }
 0xb07   :  { %3121 = vmatpush3.bf16.msra.mxu1 %v1167_v9 }
 0xb08   :  { %3122 = vmatprep.subr.bf16.mxu1 %v4827_v28 }
 0xb0b   :  { %3123 = vmatpush3.bf16.msra.mxu1 %v1166_v16 }
 0xb0c   :  { %3128 = vmatprep.subr.bf16.mxu1 %v4827_v28 }
 0xb6e   :  { %v1092_v47 = vpop.permute.xlu1 %1091  ;;  %v1090_v41 = vpop.permute.xlu0 %1089 }
 0xb6f   :  { %v1106_v30 = vsel %vm141_vm1, %v1092_v47, 0  ;;  %v1103_v58 = vsel %vm141_vm1, %v1090_v41, 0 }
 0xb70   :  { %3105 = vmatpush3.bf16.xpose.msra.mxu0 %v1106_v30 }
 0xb71   :  { %3106 = vmatprep.subr.bf16.mxu0 %v4827_v28 }
 0xb72   :  { %v1088_v17 = vpop.permute.xlu1 %1087 }
 0xb73   :  { %v1100_v36 = vsel %vm141_vm1, %v1088_v17, 0 }
 0xb76   :  { %v1086_v43 = vpop.permute.xlu1 %1085 }
 0xb77   :  { %v1097_v3 = vsel %vm141_vm1, %v1086_v43, 0  ;;  %v3450_v43 = vld [vmem:[%s4807_s1 + $0x184] ss:$8 sps:$4 sm:$0xff]  }
 0xb78   :  { %3107 = vmatpush3.bf16.xpose.msra.mxu0 %v1103_v58 }
 0xb79   :  { %3108 = vmatprep.subr.bf16.mxu0 %v4827_v28 }
 0xb80   :  { %3109 = vmatpush3.bf16.xpose.msra.mxu0 %v1100_v36 }
 0xb81   :  { %3110 = vmatprep.subr.bf16.mxu0 %v4827_v28 }
 0xb88   :  { %3111 = vmatpush3.bf16.xpose.msra.mxu0 %v1097_v3 }
 0xb8f   :  { %3113 = vmatmul.mubr.msk.bf16.vlgmr.msra.gmra.mxu0 %vm141_vm1, %v1076_v40 }
 0xb90   :  { %1445 = vmatprep.mubr.bf16.mxu0 %v4828_v6 }
 0xc4f   :  { %v1142_v5 = vpop.f32.mrf.mxu0 }
 0xc50   :  { %v1149_v34 = vmul.f32 0.25, %v1142_v5 }
 0xc51   :  { %v3114_v38 = vpop.f32.mrf.mxu0 }
 0xc52   :  { %v1151_v27 = vadd.f32 %v1149_v34, %v3852_v51 }
 0xc53   :  { %v1145_v14 = vpop.f32.mrf.mxu0 }
 0xc54   :  { %v1150_v33 = vmul.f32 0.25, %v1145_v14  ;;  %v1153_v42 = vsel %vm141_vm1, %v1151_v27, -inf }
 0xc55   :  { %1154 = vmax.xlane.f32.xlu0 %v1153_v42  ;;  %v3115_v39 = vpop.f32.mrf.mxu0 }
 0xc56   :  { %v1152_v35 = vadd.f32 %v1150_v33, %v3855_v19  ;;  %v1237_v33 = vld [vmem:[%s4808_s2 + $0x32] ss:$0 sm:$0xff] }
 0xc58   :  { %v1156_v18 = vsel %vm141_vm1, %v1152_v35, -inf }
 0xc59   :  { %1157 = vmax.xlane.f32.xlu1 %v1156_v18 }
 0xc6a   :  { %1262 = vrot.lane.b32.xlu1 %v3448_v44, %s3573_s14  ;;  %v3460_v44 = vld [vmem:[%s4807_s1 + $0x140] ss:$8 sps:$4 sm:$0xff]  }
 0xc6b   :  { %1264 = vrot.lane.b32.xlu0 %v3447_v31, %s3573_s14  ;;  %v3457_v31 = vld [vmem:[%s4807_s1 + $0x150] ss:$8 sps:$4 sm:$0xff]  }
 0xc6f   :  { %1260 = vrot.lane.b32.xlu0 %v3449_v12, %s3573_s14 }
 0xcde   :  { %v1155_v10 = vpop.xlane.xlu0 %1154 }
 0xcdf   :  { %v1159_v40 = vsub.f32 %v1151_v27, %v1155_v10 }
 0xce1   :  { %v1161_v7 = vmul.f32 1.442695, %v1159_v40 }
 0xce2   :  { %v1158_v32 = vpop.xlane.xlu1 %1157  ;;  %v1265_v9 = vpop.permute.xlu0 %1264 }
 0xce3   :  { %v1160_v57 = vsub.f32 %v1152_v35, %v1158_v32  ;;  %3495 = vpow2.f32 %v1161_v7 }
 0xce5   :  { %v1163_v45 = vmul.f32 1.442695, %v1160_v57 }
 0xce6   :  { %v1263_v2 = vpop.permute.xlu1 %1262  ;;  %v1261_v47 = vpop.permute.xlu0 %1260 }
 0xce7   :  { %3497 = vpow2.f32 %v1163_v45 }
 0xcf0   :  { %v3496_v11 = vpop.eup %3495 }
 0xcf4   :  { %v3498_v8 = vpop.eup %3497 }
 0xcf5   :  { %v1165_v4 = vpack.c.bf16 %v3498_v8, %v3496_v11 }
 0xcf7   :  { %3125 = vmatmul.mubr.msk.bf16.vlgmr.msra.gmra.mxu1 %vm141_vm1, %v1165_v4  ;;  %v3459_v4 = vld [vmem:[%s4807_s1 + $0x154] ss:$8 sps:$4 sm:$0xff]  }
 0xcf8   :  { %3136 = vmatprep.mubr.msk.bf16.mxu1 %vm3575_vm0, %v4827_v28  ;;  %3129 = vmatpush3.bf16.msra.mxu1 %v1265_v9 }
 0xcf9   :  { %3130 = vmatprep.subr.bf16.mxu1 %v4827_v28 }
 0xcfc   :  { %3131 = vmatpush3.bf16.msra.mxu1 %v1263_v2 }
 0xcfd   :  { %3132 = vmatprep.subr.bf16.mxu1 %v4827_v28 }
 0xd00   :  { %3133 = vmatpush3.bf16.msra.mxu1 %v1261_v47 }
 0xd01   :  { %3134 = vmatprep.subr.bf16.mxu1 %v4827_v28 }
 0xdb7   :  { %v1207_v48 = vpop.f32.mrf.mxu1 }
 0xdb8   :  { %v1214_v16 = vmax.f32 %v1207_v48, 1e-30 }
 0xdb9   :  { %v3126_v30 = vpop.f32.mrf.mxu1 }
 0xdba   :  { %3499 = vrcp.f32 %v1214_v16 }
 0xdbb   :  { %v1210_v41 = vpop.f32.mrf.mxu1 }
 0xdbc   :  { %v1215_v58 = vmax.f32 %v1210_v41, 1e-30 }
 0xdbd   :  { %v3127_v17 = vpop.f32.mrf.mxu1 }
 0xdbe   :  { %3501 = vrcp.f32 %v1215_v58 }
 0xdc7   :  { %v3500_v36 = vpop.eup %3499 }
 0xdc8   :  { %1220 = vrot.lane.b32.xlu1 %v3500_v36, %s3573_s14 }
 0xdcb   :  { %v3502_v3 = vpop.eup %3501 }
 0xdcc   :  { %1222 = vrot.lane.b32.xlu0 %v3502_v3, %s3573_s14  ;;  %1258 = vrot.lane.b32.xlu1 %v3450_v43, %s3573_s14  ;;  %v1342_v43 = vld [vmem:[%s4808_s2 + $0x35] ss:$0 sm:$0xff] }
 0xe3a   :  { %v1221_v6 = vpop.permute.xlu1 %1220 }
 0xe3b   :  { %v1226_v38 = vmul.f32 %v1221_v6, %v1207_v48 }
 0xe3e   :  { %v1223_v5 = vpop.permute.xlu0 %1222  ;;  %v1259_v34 = vpop.permute.xlu1 %1258 }
 0xe3f   :  { %v1227_v27 = vmul.f32 %v1223_v5, %v1210_v41  ;;  %3135 = vmatpush3.bf16.msra.mxu1 %v1259_v34 }
 0xe41   :  { %v1236_v14 = vpack.c.bf16 %v1227_v27, %v1226_v38  ;;  %v1345_v27 = vld [vmem:[%s4808_s2 + $0x36] ss:$0 sm:$0xff] }
 0xe43   :  { %3137 = vmatmul.mubr.msk.bf16.vlgmr.msra.gmra.mxu1 %vm141_vm1, %v1236_v14 }
 0xf03   :  { %v1307_v42 = vpop.f32.mrf.mxu1 }
 0xf04   :  { %v1308_v39 = vadd.f32 %v1307_v42, %v1237_v33 }
 0xf05   :  { %v3138_v35 = vpop.f32.mrf.mxu1 }
 0xf06   :  { %v1314_v18 = vadd.f32 %v1308_v39, %v4068_v29 }
 0xf07   :  { %v1310_v10 = vpop.f32.mrf.mxu1 }
 0xf08   :  { %v1311_v40 = vadd.f32 %v1310_v10, %v1237_v33  ;;  %v1316_v7 = vsel %vm141_vm1, %v1314_v18, 0.0 }
 0xf09   :  { %1317 = vadd.xlane.f32.xlu0 %v1316_v7  ;;  %v3139_v32 = vpop.f32.mrf.mxu1 }
 0xf0a   :  { %v1315_v57 = vadd.f32 %v1311_v40, %v4070_v37 }
 0xf0c   :  { %v1319_v45 = vsel %vm141_vm1, %v1315_v57, 0.0 }
 0xf0d   :  { %1320 = vadd.xlane.f32.xlu1 %v1319_v45 }
 0xf1e   :  { %1493 = vrot.lane.b32.xlu1 %v3921_v24, %s3573_s14 }
 0xf22   :  { %1491 = vrot.lane.b32.xlu1 %v3931_v50, %s3573_s14 }
 0xf26   :  { %1475 = vrot.lane.b32.xlu1 %v3938_v53, %s3573_s14 }
 0xf2a   :  { %1473 = vrot.lane.b32.xlu1 %v3950_v13, %s3573_s14 }
 0xf2e   :  { %1471 = vrot.lane.b32.xlu1 %v3962_v54, %s3573_s14 }
 0xf32   :  { %1469 = vrot.lane.b32.xlu1 %v3974_v49, %s3573_s14 }
 0xf36   :  { %1467 = vrot.lane.b32.xlu1 %v3994_v60, %s3573_s14  ;;  %v3453_v60 = vld [vmem:[%s4807_s1 + $0x174] ss:$8 sps:$4 sm:$0xff]  }
 0xf37   :  { %1421 = vmatprep.subr.bf16.mxu0 %v3453_v60 }
 0xf3a   :  { %1465 = vrot.lane.b32.xlu1 %v4006_v0, %s3573_s14  ;;  %v3451_v0 = vld [vmem:[%s4807_s1 + $0x170] ss:$8 sps:$4 sm:$0xff]  }
 0xf3b   :  { %1422 = vmatpush1.bf16.msra.mxu0 %v3451_v0 }
 0xf3e   :  { %1463 = vrot.lane.b32.xlu1 %v4018_v1, %s3573_s14  ;;  %v3456_v1 = vld [vmem:[%s4807_s1 + $0x164] ss:$8 sps:$4 sm:$0xff]  }
 0xf3f   :  { %1423 = vmatprep.subr.bf16.mxu0 %v3456_v1 }
 0xf92   :  { %v1318_v24 = vpop.xlane.xlu0 %1317 }
 0xf93   :  { %v1322_v50 = vmul.f32 0.015625, %v1318_v24 }
 0xf95   :  { %v1324_v53 = vsub.f32 %v1314_v18, %v1322_v50 }
 0xf96   :  { %v1321_v29 = vpop.xlane.xlu1 %1320 }
 0xf97   :  { %v1323_v13 = vmul.f32 0.015625, %v1321_v29  ;;  %v1326_v37 = vmul.f32 %v1324_v53, %v1324_v53 }
 0xf99   :  { %v1325_v11 = vsub.f32 %v1315_v57, %v1323_v13  ;;  %v1328_v54 = vsel %vm141_vm1, %v1326_v37, 0.0  ;;  %v2884_v57 = vld [vmem:[%s4808_s2 + $0x33] ss:$8 sm:$0x3] }
 0xf9a   :  { %1329 = vadd.xlane.f32.xlu0 %v1328_v54  ;;  %v1494_v12 = vpop.permute.xlu1 %1493  ;;  %v1367_v24 = vrot.slane %v2884_v57, %v3760_v61  ;;  %v1363_v50 = vrot.slane %v2884_v57, %v3763_v62  ;;  %v1462_v62 = vld [vmem:[%s4808_s2 + $0x34] ss:$0 sm:$0xff] }
 0xf9b   :  { %v1327_v49 = vmul.f32 %v1325_v11, %v1325_v11  ;;  %2979 = vmatprep.subr.bf16.mxu1 %v1494_v12 }
 0xf9d   :  { %v1331_v8 = vsel %vm141_vm1, %v1327_v49, 0.0 }
 0xf9e   :  { %1332 = vadd.xlane.f32.xlu0 %v1331_v8 }
 0xfb4   :  { %1477 = vrot.lane.b32.xlu0 %v3926_v46, %s3573_s14  ;;  %v3454_v46 = vld [vmem:[%s4807_s1 + $0x160] ss:$8 sps:$4 sm:$0xff]  }
 0xfb5   :  { %1424 = vmatpush1.bf16.msra.mxu0 %v3454_v46 }
 0xfb6   :  { %1425 = vmatprep.subr.bf16.mxu0 %v3459_v4 }
 0xfb8   :  { %1489 = vrot.lane.b32.xlu0 %v3944_v52, %s3573_s14  ;;  %v3462_v52 = vld [vmem:[%s4807_s1 + $0x144] ss:$8 sps:$4 sm:$0xff]  }
 0xfb9   :  { %1426 = vmatpush1.bf16.msra.mxu0 %v3457_v31 }
 0xfba   :  { %1427 = vmatprep.subr.bf16.mxu0 %v3462_v52 }
 0xfbc   :  { %1487 = vrot.lane.b32.xlu0 %v3956_v15, %s3573_s14  ;;  %v1492_v15 = vpop.permute.xlu1 %1491 }
 0xfbd   :  { %1428 = vmatpush1.bf16.msra.mxu0 %v3460_v44 }
 0xfbe   :  { %3140 = vmatprep.subr.bf16.mxu0 %v4827_v28 }
 0xfc0   :  { %1485 = vrot.lane.b32.xlu0 %v3968_v55, %s3573_s14  ;;  %v1476_v16 = vpop.permute.xlu1 %1475 }
 0xfc4   :  { %1483 = vrot.lane.b32.xlu0 %v3989_v56, %s3573_s14  ;;  %v1474_v56 = vpop.permute.xlu1 %1473 }
 0xfc8   :  { %1481 = vrot.lane.b32.xlu0 %v4001_v63, %s3573_s14  ;;  %v1472_v17 = vpop.permute.xlu1 %1471 }
 0xfcc   :  { %1479 = vrot.lane.b32.xlu0 %v4012_v59, %s3573_s14  ;;  %v1470_v5 = vpop.permute.xlu1 %1469 }
 0xfd0   :  { %v1468_v18 = vpop.permute.xlu1 %1467 }
 0xfd4   :  { %v1466_v40 = vpop.permute.xlu1 %1465 }
 0xfd8   :  { %v1464_v32 = vpop.permute.xlu1 %1463 }
0x1023   :  { %v1330_v9 = vpop.xlane.xlu0 %1329 }
0x1024   :  { %v1334_v2 = vmul.f32 0.015625, %v1330_v9 }
0x1026   :  { %v1336_v48 = vadd.f32 1e-05, %v1334_v2 }
0x1027   :  { %v1333_v55 = vpop.xlane.xlu0 %1332 }
0x1028   :  { %3503 = vrsqrt.f32 %v1336_v48  ;;  %v1335_v47 = vmul.f32 0.015625, %v1333_v55 }
0x102a   :  { %v1337_v30 = vadd.f32 1e-05, %v1335_v47 }
0x102b   :  { %v1478_v41 = vpop.permute.xlu0 %1477 }
0x102c   :  { %3505 = vrsqrt.f32 %v1337_v30  ;;  %2980 = vmatpush3.bf16.msra.mxu1 %v1478_v41 }
0x102d   :  { %2981 = vmatprep.subr.bf16.mxu1 %v1492_v15 }
0x102f   :  { %v1490_v58 = vpop.permute.xlu0 %1489 }
0x1030   :  { %2982 = vmatpush3.bf16.msra.mxu1 %v1476_v16 }
0x1031   :  { %2983 = vmatprep.subr.bf16.mxu1 %v1490_v58 }
0x1033   :  { %v1488_v63 = vpop.permute.xlu0 %1487 }
0x1034   :  { %2984 = vmatpush3.bf16.msra.mxu1 %v1474_v56 }
0x1035   :  { %v3504_v59 = vpop.eup %3503  ;;  %2985 = vmatprep.subr.bf16.mxu1 %v1488_v63 }
0x1036   :  { %v1340_v36 = vmul.f32 %v3504_v59, %v1324_v53 }
0x1037   :  { %v1486_v3 = vpop.permute.xlu0 %1485 }
0x1038   :  { %2986 = vmatpush3.bf16.msra.mxu1 %v1472_v17  ;;  %v1343_v38 = vmul.f32 %v1342_v43, %v1340_v36 }
0x1039   :  { %v3506_v6 = vpop.eup %3505  ;;  %2987 = vmatprep.subr.bf16.mxu1 %v1486_v3 }
0x103a   :  { %v1341_v34 = vmul.f32 %v3506_v6, %v1325_v11  ;;  %v1346_v33 = vadd.f32 %v1345_v27, %v1343_v38 }
0x103b   :  { %v1484_v35 = vpop.permute.xlu0 %1483 }
0x103c   :  { %v1344_v14 = vmul.f32 %v1342_v43, %v1341_v34  ;;  %2988 = vmatpush3.bf16.msra.mxu1 %v1470_v5 }
0x103d   :  { %2989 = vmatprep.subr.bf16.mxu1 %v1484_v35  ;;  %v1583_v35 = vld [vmem:[%s4808_s2 + $0x40] ss:$0 sm:$0xff] }
0x103e   :  { %v1347_v42 = vadd.f32 %v1345_v27, %v1344_v14 }
0x103f   :  { %v1482_v10 = vpop.permute.xlu0 %1481 }
0x1040   :  { %v1356_v39 = vpack.c.bf16 %v1347_v42, %v1346_v33  ;;  %2990 = vmatpush3.bf16.msra.mxu1 %v1468_v18 }
0x1041   :  { %2991 = vmatprep.subr.bf16.mxu1 %v1482_v10 }
0x1042   :  { %2893 = vmatmul.mubr.msk.bf16.vlgmr.msra.gmra.mxu0 %vm141_vm1, %v1356_v39 }
0x1043   :  { %3148 = vmatprep.mubr.msk.bf16.mxu0 %vm3575_vm0, %v4827_v28  ;;  %v1480_v7 = vpop.permute.xlu0 %1479 }
0x1044   :  { %2992 = vmatpush3.bf16.msra.mxu1 %v1466_v40 }
0x1045   :  { %2993 = vmatprep.subr.bf16.mxu1 %v1480_v7 }
0x1048   :  { %2994 = vmatpush3.bf16.msra.mxu1 %v1464_v32 }
0x1049   :  { %3160 = vmatprep.subr.bf16.mxu1 %v4827_v28 }
0x1102   :  { %v1447_v45 = vpop.f32.mrf.mxu0 }
0x1103   :  { %v1448_v11 = vadd.f32 %v1447_v45, %v1363_v50 }
0x1104   :  { %v1449_v53 = vpop.f32.mrf.mxu0 }
0x1105   :  { %v1450_v13 = vadd.f32 %v1449_v53, %v1367_v24  ;;  %v1456_v1 = vmax.f32 %v1448_v11, 0.0 }
0x1106   :  { %v1451_v29 = vpop.f32.mrf.mxu0 }
0x1107   :  { %v1452_v37 = vadd.f32 %v1451_v29, %v1363_v50  ;;  %v1457_v60 = vmax.f32 %v1450_v13, 0.0  ;;  %v3547_v50 = vld [vmem:[%s4807_s1 + $0x34] ss:$8 sps:$4 sm:$0xff]  }
0x1108   :  { %v1453_v54 = vpop.f32.mrf.mxu0 }
0x1109   :  { %v1454_v49 = vadd.f32 %v1453_v54, %v1367_v24  ;;  %v1458_v8 = vmax.f32 %v1452_v37, 0.0 }
0x110b   :  { %v1459_v0 = vmax.f32 %v1454_v49, 0.0  ;;  %v1460_v4 = vpack.c.bf16 %v1458_v8, %v1456_v1 }
0x110d   :  { %v1461_v46 = vpack.c.bf16 %v1459_v0, %v1457_v60 }
0x110f   :  { %1543 = vmatprep.mubr.bf16.mxu1 %v1461_v46  ;;  %v3548_v46 = vld [vmem:[%s4807_s1 + $0x14] ss:$8 sps:$4 sm:$0xff]  }
0x1110   :  { %1544 = vmatmul.mubr.bf16.vlgmr.msra.gmra.mxu1 %v1460_v4  ;;  %v3549_v4 = vld [vmem:[%s4807_s1 + $0x4] ss:$8 sps:$4 sm:$0xff]  }
0x1111   :  { %3168 = vmatprep.mubr.msk.bf16.mxu1 %vm3575_vm0, %v4827_v28 }
0x11d0   :  { %v2995_v61 = vpop.f32.mrf.mxu1 }
0x11d2   :  { %v2996_v31 = vpop.f32.mrf.mxu1 }
0x11d3   :  { %v2997_v52 = vadd.f32 %v2996_v31, %v2995_v61  ;;  %v3550_v61 = vld [vmem:[%s4807_s1 + $0x24] ss:$8 sps:$4 sm:$0xff]  }
0x11d4   :  { %v2998_v44 = vpop.f32.mrf.mxu1 }
0x11d5   :  { %v1546_v12 = vadd.f32 %v2997_v52, %v1462_v62 }
0x11d6   :  { %v2999_v15 = vpop.f32.mrf.mxu1 }
0x11d7   :  { %v3000_v9 = vadd.f32 %v2999_v15, %v2998_v44  ;;  %v1552_v2 = vadd.f32 %v1546_v12, %v1346_v33 }
0x11d9   :  { %v1549_v48 = vadd.f32 %v3000_v9, %v1462_v62  ;;  %v1554_v55 = vsel %vm141_vm1, %v1552_v2, 0.0 }
0x11da   :  { %1555 = vadd.xlane.f32.xlu0 %v1554_v55 }
0x11db   :  { %v1553_v16 = vadd.f32 %v1549_v48, %v1347_v42  ;;  %v1580_v42 = vld [vmem:[%s4808_s2 + $0x37] ss:$0 sm:$0xff] }
0x11dd   :  { %v1557_v47 = vsel %vm141_vm1, %v1553_v16, 0.0 }
0x11de   :  { %1558 = vadd.xlane.f32.xlu1 %v1557_v47  ;;  %v1612_v47 = vld [vmem:[%s4808_s2 + $0x41] ss:$0 sm:$0xff] }
0x1263   :  { %v1556_v30 = vpop.xlane.xlu0 %1555 }
0x1264   :  { %v1560_v41 = vmul.f32 0.015625, %v1556_v30 }
0x1266   :  { %v1562_v56 = vsub.f32 %v1552_v2, %v1560_v41 }
0x1267   :  { %v1559_v58 = vpop.xlane.xlu1 %1558 }
0x1268   :  { %v1561_v63 = vmul.f32 0.015625, %v1559_v58  ;;  %v1564_v17 = vmul.f32 %v1562_v56, %v1562_v56  ;;  %v1615_v58 = vld [vmem:[%s4808_s2 + $0x42] ss:$0 sm:$0xff] }
0x126a   :  { %v1563_v59 = vsub.f32 %v1553_v16, %v1561_v63  ;;  %v1566_v36 = vsel %vm141_vm1, %v1564_v17, 0.0 }
0x126b   :  { %1567 = vadd.xlane.f32.xlu0 %v1566_v36 }
0x126c   :  { %v1565_v43 = vmul.f32 %v1563_v59, %v1563_v59 }
0x126e   :  { %v1569_v3 = vsel %vm141_vm1, %v1565_v43, 0.0  ;;  %v4306_v43 = vld [vmem:[%s4807_s1 + $0x214] ss:$8 sps:$4 sm:$0xff]  }
0x126f   :  { %1570 = vadd.xlane.f32.xlu0 %v1569_v3  ;;  %v4313_v3 = vld [vmem:[%s4807_s1 + $0x204] ss:$8 sps:$4 sm:$0xff]  }
0x12f4   :  { %v1568_v6 = vpop.xlane.xlu0 %1567 }
0x12f5   :  { %v1572_v5 = vmul.f32 0.015625, %v1568_v6  ;;  %v60_v6 = vshra.s32 %v3660_v21, 3 }
0x12f7   :  { %v1574_v34 = vadd.f32 1e-05, %v1572_v5  ;;  %v4829_v5 = vshra.s32 %v3670_v25, 4 }
0x12f8   :  { %v1571_v38 = vpop.xlane.xlu0 %1570 }
0x12f9   :  { %3507 = vrsqrt.f32 %v1574_v34  ;;  %v1573_v27 = vmul.f32 0.015625, %v1571_v38  ;;  %vm65_vm12 = vcmp.eq.s32.totalorder %v4829_v5, %v60_v6  ;;  %v4830_v34 = vshra.s32 %v3673_v26, 4 }
0x12fa   :  { %v4831_v38 = vshra.s32 %v3663_v22, 4 }
0x12fb   :  { %v1575_v14 = vadd.f32 1e-05, %v1573_v27  ;;  %vm66_vm13 = vcmp.eq.s32.totalorder %v4830_v34, %v60_v6  ;;  %v4832_v27 = vshra.s32 %v3666_v23, 4  ;;  %v4833_v23 = vshra.s32 %v3658_v20, 4 }
0x12fc   :  { %vm67_vm14 = vcmp.eq.s32.totalorder %v4831_v38, %v60_v6 }
0x12fd   :  { %3509 = vrsqrt.f32 %v1575_v14  ;;  %vm68_vm15 = vcmp.eq.s32.totalorder %v4832_v27, %v60_v6  ;;  %v4327_v14 = vsel %vm65_vm12, 1.0, %v4827_v28  ;;  %v4333_v21 = vsel %vm67_vm14, 1.0, %v4827_v28 }
0x12fe   :  { %v4336_v25 = vsel %vm68_vm15, 1.0, %v4827_v28  ;;  %vm61_vm2 = vcmp.eq.s32.totalorder %v4833_v23, %v60_v6 }
0x12ff   :  { %v4344_v22 = vpack.i.bf16 %v4336_v25, %v4333_v21 }
0x1306   :  { %v3508_v33 = vpop.eup %3507 }
0x1307   :  { %v1578_v39 = vmul.f32 %v3508_v33, %v1562_v56  ;;  %v4330_v33 = vsel %vm66_vm13, 1.0, %v4827_v28 }
0x1308   :  { %v4340_v26 = vpack.i.bf16 %v4330_v33, %v4327_v14 }
0x1309   :  { %v1581_v18 = vmul.f32 %v1580_v42, %v1578_v39 }
0x130a   :  { %v3510_v10 = vpop.eup %3509 }
0x130b   :  { %v1584_v40 = vadd.f32 %v1583_v35, %v1581_v18  ;;  %v1579_v7 = vmul.f32 %v3510_v10, %v1563_v59  ;;  %v4836_v10 = vld [vmem:[#allocation5_spill] sm:$0xff] }
0x130d   :  { %v1586_v32 = vsel %vm141_vm1, %v1584_v40, 0.0  ;;  %v1582_v57 = vmul.f32 %v1580_v42, %v1579_v7  ;;  %v4834_v42 = vld [vmem:[#allocation7_spill] sm:$0xff]  ;;  %v4838_v7 = vld [vmem:[#allocation6_spill] sm:$0xff] }
0x130e   :  { %1587 = vadd.xlane.f32.xlu1 %v1586_v32  ;;  %v4835_v39 = vshra.s32 %v4834_v42, 4  ;;  %v4839_v32 = vshra.s32 %v4838_v7, 4 }
0x130f   :  { %v1585_v45 = vadd.f32 %v1583_v35, %v1582_v57  ;;  %v4351_v35 = vsel %vm61_vm2, 1.0, %v4827_v28 }
0x1310   :  { %vm62_vm3 = vcmp.eq.s32.totalorder %v4835_v39, %v60_v6  ;;  %vm64_vm5 = vcmp.eq.s32.totalorder %v4839_v32, %v60_v6 }
0x1311   :  { %v1589_v24 = vsel %vm141_vm1, %v1585_v45, 0.0  ;;  %v4354_v18 = vsel %vm62_vm3, 1.0, %v4827_v28 }
0x1312   :  { %1590 = vadd.xlane.f32.xlu0 %v1589_v24  ;;  %v3321_v20 = vpack.i.bf16 %v4354_v18, %v4351_v35 }
0x131f   :  { %1626 = vrot.lane.b32.xlu1 %v3547_v50, %s3579_s16  ;;  %v1619_v50 = vld [vmem:[%s4808_s2 + $0x43] ss:$0 sm:$0xff] }
0x1397   :  { %v1588_v53 = vpop.xlane.xlu1 %1587 }
0x1398   :  { %v1592_v29 = vmul.f32 0.015625, %v1588_v53 }
0x139a   :  { %v1594_v13 = vsub.f32 %v1584_v40, %v1592_v29  ;;  %v4837_v40 = vshra.s32 %v4836_v10, 4 }
0x139b   :  { %v1591_v37 = vpop.xlane.xlu0 %1590  ;;  %v1627_v11 = vpop.permute.xlu1 %1626 }
0x139c   :  { %v1593_v54 = vmul.f32 0.015625, %v1591_v37  ;;  %v1596_v49 = vmul.f32 %v1594_v13, %v1594_v13  ;;  %3141 = vmatpush3.bf16.msra.mxu0 %v1627_v11  ;;  %vm63_vm4 = vcmp.eq.s32.totalorder %v4837_v40, %v60_v6  ;;  %v1676_v37 = vld [vmem:[%s4808_s2 + $0x10] sm:$0xff] }
0x139d   :  { %3142 = vmatprep.subr.bf16.mxu0 %v4827_v28  ;;  %v4367_v57 = vsel %vm63_vm4, 1.0, %v4827_v28 }
0x139e   :  { %v1595_v8 = vsub.f32 %v1585_v45, %v1593_v54  ;;  %v1598_v60 = vsel %vm141_vm1, %v1596_v49, 0.0  ;;  %v4370_v45 = vsel %vm64_vm5, 1.0, %v4827_v28 }
0x139f   :  { %1599 = vadd.xlane.f32.xlu1 %v1598_v60  ;;  %v3316_v24 = vpack.i.bf16 %v4370_v45, %v4367_v57 }
0x13a0   :  { %v1597_v0 = vmul.f32 %v1595_v8, %v1595_v8 }
0x13a2   :  { %v1601_v1 = vsel %vm141_vm1, %v1597_v0, 0.0 }
0x13a3   :  { %1602 = vadd.xlane.f32.xlu0 %v1601_v1 }
0x13b0   :  { %1622 = vrot.lane.b32.xlu1 %v3548_v46, %s3579_s16 }
0x13b4   :  { %1620 = vrot.lane.b32.xlu1 %v3549_v4, %s3579_s16  ;;  %v1684_v4 = vld [vmem:[%s4808_s2 + $0x44] ss:$0 sm:$0xff] }
0x13b8   :  { %3312 = vrot.lane.b32.xlu1 %v4340_v26, %s3579_s16 }
0x13b9   :  { %1624 = vrot.lane.b32.xlu0 %v3550_v61, %s3579_s16 }
0x13bc   :  { %3322 = vrot.lane.b32.xlu1 %v3321_v20, %s3579_s16 }
0x13bd   :  { %3307 = vrot.lane.b32.xlu0 %v4344_v22, %s3579_s16 }
0x13c1   :  { %3317 = vrot.lane.b32.xlu0 %v3316_v24, %s3579_s16 }
0x1428   :  { %v1600_v62 = vpop.xlane.xlu1 %1599 }
0x1429   :  { %v1604_v31 = vmul.f32 0.015625, %v1600_v62 }
0x142b   :  { %v1606_v52 = vadd.f32 1e-05, %v1604_v31 }
0x142c   :  { %v1603_v44 = vpop.xlane.xlu0 %1602  ;;  %v1623_v2 = vpop.permute.xlu1 %1622 }
0x142d   :  { %3511 = vrsqrt.f32 %v1606_v52  ;;  %v1605_v12 = vmul.f32 0.015625, %v1603_v44 }
0x142f   :  { %v1607_v15 = vadd.f32 1e-05, %v1605_v12 }
0x1430   :  { %v1625_v9 = vpop.permute.xlu0 %1624  ;;  %v1621_v48 = vpop.permute.xlu1 %1620 }
0x1431   :  { %3513 = vrsqrt.f32 %v1607_v15  ;;  %3143 = vmatpush3.bf16.msra.mxu0 %v1625_v9 }
0x1432   :  { %3144 = vmatprep.subr.bf16.mxu0 %v4827_v28 }
0x1434   :  { %v3313_v1 = vpop.permute.xlu1 %3312  ;;  %v3308_v46 = vpop.permute.xlu0 %3307 }
0x1435   :  { %3145 = vmatpush3.bf16.msra.mxu0 %v1623_v2  ;;  %v4397_v62 = vunpack.i.h.bf16 %v3313_v1  ;;  %v4399_v52 = vunpack.i.l.bf16 %v3313_v1  ;;  %v4401_v44 = vunpack.i.h.bf16 %v3308_v46  ;;  %v4403_v12 = vunpack.i.l.bf16 %v3308_v46 }
0x1436   :  { %3146 = vmatprep.subr.bf16.mxu0 %v4827_v28 }
0x1438   :  { %v3323_v15 = vpop.permute.xlu1 %3322  ;;  %v3318_v2 = vpop.permute.xlu0 %3317 }
0x1439   :  { %3147 = vmatpush3.bf16.msra.mxu0 %v1621_v48 }
0x143a   :  { %v3512_v55 = vpop.eup %3511  ;;  %3152 = vmatprep.subr.bf16.mxu0 %v4827_v28 }
0x143b   :  { %v1610_v16 = vmul.f32 %v3512_v55, %v1594_v13  ;;  %v4407_v55 = vunpack.i.h.bf16 %v3323_v15 }
0x143d   :  { %v1613_v56 = vmul.f32 %v1612_v47, %v1610_v16  ;;  %v4409_v16 = vunpack.i.h.bf16 %v3318_v2 }
0x143e   :  { %v3514_v30 = vpop.eup %3513 }
0x143f   :  { %v1611_v41 = vmul.f32 %v3514_v30, %v1595_v8  ;;  %v1616_v17 = vadd.f32 %v1615_v58, %v1613_v56  ;;  %v4413_v30 = vunpack.i.l.bf16 %v3323_v15  ;;  %v4469_v15 = vld [vmem:[%s4807_s1 + $0x220] ss:$8 sps:$4 sm:$0xff]  }
0x1441   :  { %v1614_v63 = vmul.f32 %v1612_v47, %v1611_v41  ;;  %v4415_v41 = vunpack.i.l.bf16 %v3318_v2 }
0x1443   :  { %v1617_v59 = vadd.f32 %v1615_v58, %v1614_v63 }
0x1445   :  { %v1618_v36 = vpack.c.bf16 %v1617_v59, %v1616_v17 }
0x1447   :  { %3149 = vmatmul.mubr.msk.bf16.vlgmr.msra.gmra.mxu0 %vm141_vm1, %v1618_v36 }
0x1448   :  { %3156 = vmatprep.mubr.msk.bf16.mxu0 %vm3575_vm0, %v4827_v28  ;;  %3153 = vmatpush3.bf16.msra.mxu0 %v4306_v43 }
0x1449   :  { %3154 = vmatprep.subr.bf16.mxu0 %v4827_v28 }
0x144c   :  { %3155 = vmatpush3.bf16.msra.mxu0 %v4313_v3 }
0x144d   :  { %3172 = vmatprep.subr.bf16.mxu0 %v4827_v28 }
0x1507   :  { %v1669_v53 = vpop.f32.mrf.mxu0 }
0x1508   :  { %v1670_v13 = vadd.f32 %v1669_v53, %v1619_v50 }
0x1509   :  { %v3150_v29 = vpop.f32.mrf.mxu0 }
0x150a   :  { %v4382_v8 = vadd.f32 %v1676_v37, %v1670_v13 }
0x150b   :  { %v1672_v11 = vpop.f32.mrf.mxu0 }
0x150c   :  { %v1673_v54 = vadd.f32 %v1672_v11, %v1619_v50 }
0x150d   :  { %v3151_v49 = vpop.f32.mrf.mxu0 }
0x150e   :  { %v4384_v60 = vadd.f32 %v1676_v37, %v1673_v54 }
0x1510   :  { %v4388_v0 = vpack.c.bf16 %v4384_v60, %v4382_v8 }
0x1512   :  { %3157 = vmatmul.mubr.msk.bf16.vlgmr.msra.gmra.mxu0 %vm1697_vm6, %v4388_v0 }
0x1513   :  { %3180 = vmatprep.mubr.msk.bf16.mxu0 %vm3575_vm0, %v4827_v28 }
0x15d2   :  { %v1735_v61 = vpop.f32.mrf.mxu0 }
0x15d3   :  { %v4405_v9 = vadd.f32 %v1735_v61, %v1684_v4  ;;  %v4460_v61 = vld [vmem:[%s4807_s1 + $0x230] ss:$8 sps:$4 sm:$0xff]  }
0x15d4   :  { %v3158_v31 = vpop.f32.mrf.mxu0 }
0x15d5   :  { %v1778_v58 = vmul.f32 %v4399_v52, %v4405_v9  ;;  %v1780_v17 = vmul.f32 %v4403_v12, %v4405_v9  ;;  %v1774_v38 = vmul.f32 %v4413_v30, %v4405_v9  ;;  %v1776_v27 = vmul.f32 %v4415_v41, %v4405_v9 }
0x15d6   :  { %v1738_v48 = vpop.f32.mrf.mxu0 }
0x15d7   :  { %v4411_v47 = vadd.f32 %v1738_v48, %v1684_v4 }
0x15d8   :  { %v3159_v56 = vpop.f32.mrf.mxu0 }
0x15d9   :  { %v1779_v63 = vmul.f32 %v4397_v62, %v4411_v47  ;;  %v1781_v59 = vmul.f32 %v4401_v44, %v4411_v47  ;;  %v1775_v5 = vmul.f32 %v4407_v55, %v4411_v47  ;;  %v1777_v34 = vmul.f32 %v4409_v16, %v4411_v47 }
0x15da   :  { %v1854_v31 = vpack.c.bf16 %v4411_v47, %v4405_v9 }
0x15db   :  { %v1857_v36 = vpack.c.bf16 %v1779_v63, %v1778_v58  ;;  %v1858_v6 = vpack.c.bf16 %v1781_v59, %v1780_v17  ;;  %v1855_v23 = vpack.c.bf16 %v1775_v5, %v1774_v38  ;;  %v1856_v42 = vpack.c.bf16 %v1777_v34, %v1776_v27 }
0x15dd   :  { %1867 = vrot.lane.b32.xlu1 %v1857_v36, %s3578_s22  ;;  %1869 = vrot.lane.b32.xlu0 %v1858_v6, %s3578_s22 }
0x15e1   :  { %1863 = vrot.lane.b32.xlu1 %v1855_v23, %s3578_s22  ;;  %1865 = vrot.lane.b32.xlu0 %v1856_v42, %s3578_s22 }
0x15e5   :  { %3332 = vrot.lane.b32.xlu1 %v4340_v26, %s3573_s14  ;;  %3327 = vrot.lane.b32.xlu0 %v4344_v22, %s3573_s14 }
0x15e9   :  { %3342 = vrot.lane.b32.xlu1 %v3321_v20, %s3573_s14  ;;  %3337 = vrot.lane.b32.xlu0 %v3316_v24, %s3573_s14 }
0x164f   :  { %v1868_v39 = vpop.permute.xlu1 %1867  ;;  %v1870_v10 = vpop.permute.xlu0 %1869 }
0x1650   :  { %v1884_v40 = vsel %vm1697_vm6, %v1870_v10, 0  ;;  %v1881_v50 = vsel %vm1697_vm6, %v1868_v39, 0 }
0x1651   :  { %3161 = vmatpush3.bf16.xpose.msra.mxu1 %v1884_v40 }
0x1652   :  { %3162 = vmatprep.subr.bf16.mxu1 %v4827_v28 }
0x1653   :  { %v1864_v7 = vpop.permute.xlu1 %1863  ;;  %v1866_v32 = vpop.permute.xlu0 %1865 }
0x1654   :  { %v1878_v46 = vsel %vm1697_vm6, %v1866_v32, 0  ;;  %v1875_v4 = vsel %vm1697_vm6, %v1864_v7, 0 }
0x1657   :  { %v3333_v53 = vpop.permute.xlu1 %3332  ;;  %v3328_v26 = vpop.permute.xlu0 %3327 }
0x1658   :  { %v3335_v29 = vunpack.i.h.bf16 %v3333_v53  ;;  %v3334_v13 = vunpack.i.l.bf16 %v3333_v53  ;;  %v3330_v22 = vunpack.i.h.bf16 %v3328_v26  ;;  %v3329_v37 = vunpack.i.l.bf16 %v3328_v26  ;;  %v2159_v53 = vld [vmem:[%s4808_s2 + $0x47] ss:$0 sm:$0xff] }
0x1659   :  { %3163 = vmatpush3.bf16.xpose.msra.mxu1 %v1881_v50 }
0x165a   :  { %v1811_v20 = vmul.f32 %v3335_v29, %v4411_v47  ;;  %v1810_v24 = vmul.f32 %v3334_v13, %v4405_v9  ;;  %v1813_v11 = vmul.f32 %v3330_v22, %v4411_v47  ;;  %v1812_v54 = vmul.f32 %v3329_v37, %v4405_v9  ;;  %3164 = vmatprep.subr.bf16.mxu1 %v4827_v28 }
0x165b   :  { %v4480_v2 = vpop.permute.xlu1 %3342  ;;  %v4482_v48 = vpop.permute.xlu0 %3337 }
0x165c   :  { %v3351_v49 = vpack.i.bf16 %v1811_v20, %v1810_v24  ;;  %v3346_v1 = vpack.i.bf16 %v1813_v11, %v1812_v54  ;;  %v3345_v20 = vunpack.i.h.bf16 %v4480_v2  ;;  %v3344_v24 = vunpack.i.l.bf16 %v4480_v2 }
0x165d   :  { %v3340_v11 = vunpack.i.h.bf16 %v4482_v48  ;;  %v3339_v54 = vunpack.i.l.bf16 %v4482_v48 }
0x165e   :  { %3352 = vrot.lane.b32.xlu1 %v3351_v49, %s3573_s14  ;;  %3347 = vrot.lane.b32.xlu0 %v3346_v1, %s3573_s14 }
0x1661   :  { %3165 = vmatpush3.bf16.xpose.msra.mxu1 %v1878_v46 }
0x1662   :  { %3166 = vmatprep.subr.bf16.mxu1 %v4827_v28 }
0x1669   :  { %3167 = vmatpush3.bf16.xpose.msra.mxu1 %v1875_v4 }
0x166a   :  { %3200 = vmatprep.subr.bf16.mxu1 %v4827_v28 }
0x1670   :  { %3169 = vmatmul.mubr.msk.bf16.vlgmr.msra.gmra.mxu1 %vm1697_vm6, %v1854_v31 }
0x1671   :  { %3201 = vmatpush3.bf16.msra.mxu1 %v4460_v61  ;;  %3204 = vmatprep.mubr.msk.bf16.mxu1 %vm3575_vm0, %v4827_v28 }
0x1672   :  { %3202 = vmatprep.subr.bf16.mxu1 %v4827_v28 }
0x1675   :  { %3203 = vmatpush3.bf16.msra.mxu1 %v4469_v15 }
0x1676   :  { %3220 = vmatprep.subr.bf16.mxu1 %v4827_v28 }
0x1678   :  { %3205 = vmatmul.mubr.msk.bf16.vlgmr.msra.gmra.mxu1 %vm1697_vm6, %v4388_v0 }
0x1679   :  { %3228 = vmatprep.mubr.msk.bf16.mxu1 %vm3575_vm0, %v4827_v28 }
0x16d0   :  { %v3353_v56 = vpop.permute.xlu1 %3352  ;;  %v3348_v58 = vpop.permute.xlu0 %3347 }
0x16d1   :  { %v3355_v63 = vunpack.i.h.bf16 %v3353_v56  ;;  %v3354_v17 = vunpack.i.l.bf16 %v3353_v56  ;;  %v3350_v59 = vunpack.i.h.bf16 %v3348_v58  ;;  %v3349_v36 = vunpack.i.l.bf16 %v3348_v58 }
0x16d3   :  { %v1853_v6 = vsel %vm1697_vm6, %v3350_v59, %v4401_v44  ;;  %v1852_v5 = vsel %vm1697_vm6, %v3349_v36, %v4403_v12  ;;  %v1851_v34 = vsel %vm1697_vm6, %v3355_v63, %v4397_v62  ;;  %v1850_v38 = vsel %vm1697_vm6, %v3354_v17, %v4399_v52 }
0x16d4   :  { %v1947_v0 = vpack.c.bf16 %v1853_v6, %v1852_v5  ;;  %v1946_v27 = vpack.c.bf16 %v1851_v34, %v1850_v38 }
0x16d6   :  { %3173 = vmatpush3.bf16.msra.mxu0 %v1947_v0 }
0x16d7   :  { %3174 = vmatprep.subr.bf16.mxu0 %v4827_v28 }
0x16da   :  { %3175 = vmatpush3.bf16.msra.mxu0 %v1946_v27 }
0x16db   :  { %3176 = vmatprep.subr.bf16.mxu0 %v4827_v28 }
0x1730   :  { %v1920_v23 = vpop.f32.mrf.mxu1 }
0x1731   :  { %v1927_v42 = vmul.f32 0.35355338, %v1920_v23  ;;  %v1807_v23 = vmul.f32 %v3345_v20, %v4411_v47 }
0x1732   :  { %v3170_v39 = vpop.f32.mrf.mxu1 }
0x1733   :  { %v1929_v10 = vadd.f32 %v1927_v42, %v3852_v51  ;;  %v1806_v42 = vmul.f32 %v3344_v24, %v4405_v9  ;;  %v1809_v39 = vmul.f32 %v3340_v11, %v4411_v47 }
0x1734   :  { %v1923_v40 = vpop.f32.mrf.mxu1 }
0x1735   :  { %v1928_v7 = vmul.f32 0.35355338, %v1923_v40  ;;  %v1931_v32 = vsel %vm141_vm1, %v1929_v10, -inf  ;;  %v1808_v40 = vmul.f32 %v3339_v54, %v4405_v9 }
0x1736   :  { %v3171_v50 = vpop.f32.mrf.mxu1  ;;  %1932 = vmax.xlane.f32.xlu0 %v1931_v32 }
0x1737   :  { %v1930_v26 = vadd.f32 %v1928_v7, %v3855_v19  ;;  %v3361_v7 = vpack.i.bf16 %v1807_v23, %v1806_v42  ;;  %v3356_v32 = vpack.i.bf16 %v1809_v39, %v1808_v40 }
0x1738   :  { %v2206_v29 = vpop.f32.mrf.mxu1 }
0x1739   :  { %v2207_v13 = vadd.f32 %v2206_v29, %v2159_v53  ;;  %v1934_v22 = vsel %vm141_vm1, %v1930_v26, -inf }
0x173a   :  { %1935 = vmax.xlane.f32.xlu1 %v1934_v22  ;;  %v3206_v37 = vpop.f32.mrf.mxu1 }
0x173b   :  { %v4506_v1 = vmul.f32 %v4403_v12, %v2207_v13  ;;  %v4509_v4 = vmul.f32 %v4333_v21, %v2207_v13  ;;  %v4512_v31 = vmul.f32 %v4327_v14, %v2207_v13  ;;  %v4515_v56 = vmul.f32 %v4367_v57, %v2207_v13 }
0x173c   :  { %v2209_v49 = vpop.f32.mrf.mxu1  ;;  %v4518_v2 = vmul.f32 %v4351_v35, %v2207_v13  ;;  %v4521_v48 = vmul.f32 %v4415_v41, %v2207_v13  ;;  %v4524_v63 = vmul.f32 %v4413_v30, %v2207_v13  ;;  %v4527_v17 = vmul.f32 %v4399_v52, %v2207_v13 }
0x173d   :  { %v2210_v46 = vadd.f32 %v2209_v49, %v2159_v53 }
0x173e   :  { %v3207_v58 = vpop.f32.mrf.mxu1 }
0x173f   :  { %v4530_v21 = vmul.f32 %v4401_v44, %v2210_v46  ;;  %v4533_v14 = vmul.f32 %v4336_v25, %v2210_v46  ;;  %v4536_v57 = vmul.f32 %v4330_v33, %v2210_v46  ;;  %v4539_v35 = vmul.f32 %v4370_v45, %v2210_v46 }
0x1740   :  { %v4542_v59 = vmul.f32 %v4354_v18, %v2210_v46  ;;  %v4545_v36 = vmul.f32 %v4409_v16, %v2210_v46  ;;  %v4548_v6 = vmul.f32 %v4407_v55, %v2210_v46  ;;  %v4551_v5 = vmul.f32 %v4397_v62, %v2210_v46 }
0x1741   :  { %v3366_v25 = vpack.i.bf16 %v4530_v21, %v4506_v1  ;;  %v2273_v33 = vpack.c.bf16 %v4533_v14, %v4509_v4  ;;  %v2272_v45 = vpack.c.bf16 %v4536_v57, %v4512_v31  ;;  %v2271_v18 = vpack.c.bf16 %v4539_v35, %v4515_v56  ;;  %v2108_v57 = vld [vmem:[%s4808_s2 + $0x46] ss:$0 sm:$0xff] }
0x1742   :  { %v2270_v0 = vpack.c.bf16 %v4542_v59, %v4518_v2  ;;  %v3376_v34 = vpack.i.bf16 %v4545_v36, %v4521_v48  ;;  %v3381_v38 = vpack.i.bf16 %v4548_v6, %v4524_v63  ;;  %v3371_v27 = vpack.i.bf16 %v4551_v5, %v4527_v17 }
0x1743   :  { %v2281_v4 = vsel %vm1697_vm6, %v2271_v18, 0 }
0x1744   :  { %v2278_v14 = vsel %vm1697_vm6, %v2270_v0, 0 }
0x174b   :  { %3362 = vrot.lane.b32.xlu1 %v3361_v7, %s3573_s14  ;;  %v3467_v7 = vld [vmem:[%s4807_s1 + $0x234] ss:$8 sps:$4 sm:$0xff]  }
0x174c   :  { %3357 = vrot.lane.b32.xlu0 %v3356_v32, %s3573_s14 }
0x1750   :  { %2024 = vrot.lane.b32.xlu0 %v3467_v7, %s3578_s22 }
0x17bf   :  { %v1933_v50 = vpop.xlane.xlu0 %1932 }
0x17c0   :  { %v1937_v53 = vsub.f32 %v1929_v10, %v1933_v50 }
0x17c2   :  { %v1939_v29 = vmul.f32 1.442695, %v1937_v53 }
0x17c3   :  { %v1936_v13 = vpop.xlane.xlu1 %1935  ;;  %v3358_v22 = vpop.permute.xlu0 %3357 }
0x17c4   :  { %v1938_v37 = vsub.f32 %v1930_v26, %v1936_v13  ;;  %v3360_v49 = vunpack.i.h.bf16 %v3358_v22  ;;  %v3359_v20 = vunpack.i.l.bf16 %v3358_v22  ;;  %3515 = vpow2.f32 %v1939_v29 }
0x17c6   :  { %v1941_v46 = vmul.f32 1.442695, %v1938_v37  ;;  %v1849_v47 = vsel %vm1697_vm6, %v3360_v49, %v4409_v16  ;;  %v1848_v9 = vsel %vm1697_vm6, %v3359_v20, %v4415_v41  ;;  %v3468_v20 = vld [vmem:[%s4807_s1 + $0x224] ss:$8 sps:$4 sm:$0xff]  }
0x17c7   :  { %v1945_v24 = vpack.c.bf16 %v1849_v47, %v1848_v9  ;;  %v3363_v11 = vpop.permute.xlu1 %3362  ;;  %v2025_v32 = vpop.permute.xlu0 %2024 }
0x17c8   :  { %3517 = vpow2.f32 %v1941_v46  ;;  %v3365_v54 = vunpack.i.h.bf16 %v3363_v11  ;;  %v3364_v58 = vunpack.i.l.bf16 %v3363_v11 }
0x17c9   :  { %3177 = vmatpush3.bf16.msra.mxu0 %v1945_v24 }
0x17ca   :  { %v1847_v10 = vsel %vm1697_vm6, %v3365_v54, %v4407_v55  ;;  %v1846_v26 = vsel %vm1697_vm6, %v3364_v58, %v4413_v30  ;;  %3178 = vmatprep.subr.bf16.mxu0 %v4827_v28 }
0x17cb   :  { %v1944_v23 = vpack.c.bf16 %v1847_v10, %v1846_v26  ;;  %v2011_v10 = vld [vmem:[%s4808_s2 + $0x45] ss:$0 sm:$0xff] }
0x17cd   :  { %3179 = vmatpush3.bf16.msra.mxu0 %v1944_v23 }
0x17ce   :  { %3184 = vmatprep.subr.bf16.mxu0 %v4827_v28 }
0x17d1   :  { %v3516_v42 = vpop.eup %3515 }
0x17d5   :  { %v3518_v39 = vpop.eup %3517 }
0x17d6   :  { %v1943_v40 = vpack.c.bf16 %v3518_v39, %v3516_v42 }
0x17d8   :  { %3181 = vmatmul.mubr.msk.bf16.vlgmr.msra.gmra.mxu0 %vm141_vm1, %v1943_v40 }
0x17d9   :  { %3188 = vmatprep.mubr.msk.bf16.mxu0 %vm3575_vm0, %v4827_v28  ;;  %3185 = vmatpush3.bf16.msra.mxu0 %v2025_v32 }
0x17da   :  { %3186 = vmatprep.subr.bf16.mxu0 %v4827_v28 }
0x1898   :  { %v1985_v50 = vpop.f32.mrf.mxu0 }
0x1899   :  { %v1992_v53 = vmax.f32 %v1985_v50, 1e-30 }
0x189a   :  { %v3182_v29 = vpop.f32.mrf.mxu0 }
0x189b   :  { %3519 = vrcp.f32 %v1992_v53 }
0x189c   :  { %v1988_v13 = vpop.f32.mrf.mxu0 }
0x189d   :  { %v1993_v22 = vmax.f32 %v1988_v13, 1e-30 }
0x189e   :  { %v3183_v37 = vpop.f32.mrf.mxu0 }
0x189f   :  { %3521 = vrcp.f32 %v1993_v22 }
0x18a8   :  { %v3520_v49 = vpop.eup %3519 }
0x18a9   :  { %1998 = vrot.lane.b32.xlu1 %v3520_v49, %s3578_s22 }
0x18ac   :  { %v3522_v46 = vpop.eup %3521 }
0x18ad   :  { %2022 = vrot.lane.b32.xlu1 %v3468_v20, %s3578_s22  ;;  %2000 = vrot.lane.b32.xlu0 %v3522_v46, %s3578_s22 }
0x191b   :  { %v1999_v47 = vpop.permute.xlu1 %1998 }
0x191c   :  { %v2004_v11 = vmul.f32 %v1999_v47, %v1985_v50 }
0x191f   :  { %v2023_v9 = vpop.permute.xlu1 %2022  ;;  %v2001_v24 = vpop.permute.xlu0 %2000 }
0x1920   :  { %v2005_v54 = vmul.f32 %v2001_v24, %v1988_v13  ;;  %3187 = vmatpush3.bf16.msra.mxu0 %v2023_v9 }
0x1921   :  { %3192 = vmatprep.subr.bf16.mxu0 %v4827_v28 }
0x1922   :  { %v2010_v58 = vpack.c.bf16 %v2005_v54, %v2004_v11 }
0x1924   :  { %3189 = vmatmul.mubr.msk.bf16.vlgmr.msra.gmra.mxu0 %vm1697_vm6, %v2010_v58 }
0x1925   :  { %3193 = vmatpush3.bf16.msra.mxu0 %v3467_v7  ;;  %3196 = vmatprep.mubr.msk.bf16.mxu0 %vm3575_vm0, %v4827_v28 }
0x1926   :  { %3194 = vmatprep.subr.bf16.mxu0 %v4827_v28 }
0x1929   :  { %3195 = vmatpush3.bf16.msra.mxu0 %v3468_v20 }
0x192a   :  { %3208 = vmatprep.subr.bf16.mxu0 %v4827_v28 }
0x19e4   :  { %v2065_v26 = vpop.f32.mrf.mxu0 }
0x19e5   :  { %v2066_v23 = vadd.f32 %v2065_v26, %v2011_v10 }
0x19e6   :  { %v3190_v42 = vpop.f32.mrf.mxu0 }
0x19e7   :  { %v2072_v39 = vadd.f32 %v2066_v23, %v4382_v8 }
0x19e8   :  { %v2068_v40 = vpop.f32.mrf.mxu0 }
0x19e9   :  { %v2069_v32 = vadd.f32 %v2068_v40, %v2011_v10  ;;  %v2074_v7 = vsel %vm1697_vm6, %v2072_v39, 0.0 }
0x19ea   :  { %2075 = vadd.xlane.f32.xlu0 %v2074_v7  ;;  %v3191_v50 = vpop.f32.mrf.mxu0 }
0x19eb   :  { %v2073_v53 = vadd.f32 %v2069_v32, %v4384_v60 }
0x19ed   :  { %v2077_v29 = vsel %vm1697_vm6, %v2073_v53, 0.0 }
0x19ee   :  { %2078 = vadd.xlane.f32.xlu1 %v2077_v29 }
0x19ff   :  { %3367 = vrot.lane.b32.xlu1 %v3366_v25, %s3578_s22 }
0x1a73   :  { %v2076_v13 = vpop.xlane.xlu0 %2075 }
0x1a74   :  { %v2081_v22 = vmul.f32 0.03125, %v2076_v13 }
0x1a76   :  { %v2083_v37 = vsub.f32 %v2072_v39, %v2081_v22 }
0x1a77   :  { %v2079_v8 = vpop.xlane.xlu1 %2078 }
0x1a78   :  { %v2082_v49 = vmul.f32 0.03125, %v2079_v8  ;;  %v2085_v20 = vmul.f32 %v2083_v37, %v2083_v37 }
0x1a7a   :  { %v2084_v46 = vsub.f32 %v2073_v53, %v2082_v49  ;;  %v2087_v47 = vsel %vm1697_vm6, %v2085_v20, 0.0  ;;  %v2104_v53 = vld [vmem:[%s4808_s2 + $0x54] ss:$0 sm:$0xff]  ;;  %v2284_v49 = vsel %vm1697_vm6, %v2272_v45, 0 }
0x1a7b   :  { %2088 = vadd.xlane.f32.xlu0 %v2087_v47  ;;  %v3368_v9 = vpop.permute.xlu1 %3367 }
0x1a7c   :  { %v3370_v60 = vunpack.i.h.bf16 %v3368_v9  ;;  %v3369_v24 = vunpack.i.l.bf16 %v3368_v9  ;;  %v2086_v11 = vmul.f32 %v2084_v46, %v2084_v46 }
0x1a7e   :  { %v2268_v54 = vsel %vm1697_vm6, %v3370_v60, %v4401_v44  ;;  %v2267_v1 = vsel %vm1697_vm6, %v3369_v24, %v4403_v12  ;;  %v2090_v21 = vsel %vm1697_vm6, %v2086_v11, 0.0  ;;  %v2101_v12 = vld [vmem:[%s4808_s2 + $0x53] ss:$0 sm:$0xff] }
0x1a7f   :  { %v2350_v25 = vpack.c.bf16 %v2268_v54, %v2267_v1  ;;  %2091 = vadd.xlane.f32.xlu0 %v2090_v21 }
0x1a81   :  { %3221 = vmatpush3.bf16.msra.mxu1 %v2350_v25 }
0x1a82   :  { %3222 = vmatprep.subr.bf16.mxu1 %v4827_v28 }
0x1b04   :  { %v2089_v58 = vpop.xlane.xlu0 %2088 }
0x1b05   :  { %v2093_v10 = vmul.f32 0.03125, %v2089_v58 }
0x1b07   :  { %v2095_v26 = vadd.f32 1e-05, %v2093_v10 }
0x1b08   :  { %v2092_v23 = vpop.xlane.xlu0 %2091 }
0x1b09   :  { %3523 = vrsqrt.f32 %v2095_v26  ;;  %v2094_v42 = vmul.f32 0.03125, %v2092_v23 }
0x1b0b   :  { %v2096_v39 = vadd.f32 1e-05, %v2094_v42 }
0x1b0d   :  { %3525 = vrsqrt.f32 %v2096_v39 }
0x1b16   :  { %v3524_v40 = vpop.eup %3523 }
0x1b17   :  { %v2099_v44 = vmul.f32 %v3524_v40, %v2083_v37  ;;  %v2287_v37 = vsel %vm1697_vm6, %v2273_v33, 0 }
0x1b19   :  { %v2102_v50 = vmul.f32 %v2101_v12, %v2099_v44 }
0x1b1a   :  { %v3526_v32 = vpop.eup %3525 }
0x1b1b   :  { %v2100_v7 = vmul.f32 %v3526_v32, %v2084_v46  ;;  %v4629_v13 = vadd.f32 %v2104_v53, %v2102_v50 }
0x1b1d   :  { %v2103_v29 = vmul.f32 %v2101_v12, %v2100_v7 }
0x1b1f   :  { %v4631_v22 = vadd.f32 %v2104_v53, %v2103_v29 }
0x1b21   :  { %v2107_v8 = vpack.c.bf16 %v4631_v22, %v4629_v13 }
0x1b23   :  { %3197 = vmatmul.mubr.msk.bf16.vlgmr.msra.gmra.mxu0 %vm1697_vm6, %v2107_v8 }
0x1b24   :  { %3209 = vmatpush3.bf16.xpose.msra.mxu0 %v2287_v37  ;;  %3216 = vmatprep.mubr.msk.bf16.mxu0 %vm3575_vm0, %v4827_v28 }
0x1b25   :  { %3210 = vmatprep.subr.bf16.mxu0 %v4827_v28 }
0x1b2c   :  { %3211 = vmatpush3.bf16.xpose.msra.mxu0 %v2284_v49 }
0x1b2d   :  { %3212 = vmatprep.subr.bf16.mxu0 %v4827_v28 }
0x1b34   :  { %3213 = vmatpush3.bf16.xpose.msra.mxu0 %v2281_v4 }
0x1b35   :  { %3214 = vmatprep.subr.bf16.mxu0 %v4827_v28 }
0x1b3c   :  { %3215 = vmatpush3.bf16.xpose.msra.mxu0 %v2278_v14 }
0x1b3d   :  { %3248 = vmatprep.subr.bf16.mxu0 %v4827_v28 }
0x1be3   :  { %v2148_v31 = vpop.f32.mrf.mxu0 }
0x1be4   :  { %v2149_v35 = vadd.f32 %v2148_v31, %v2108_v57 }
0x1be5   :  { %v3198_v33 = vpop.f32.mrf.mxu0 }
0x1be7   :  { %v2151_v56 = vpop.f32.mrf.mxu0 }
0x1be8   :  { %v2152_v45 = vadd.f32 %v2151_v56, %v2108_v57 }
0x1be9   :  { %v3199_v18 = vpop.f32.mrf.mxu0 }
0x1bea   :  { %v2269_v20 = vpack.c.bf16 %v2152_v45, %v2149_v35 }
0x1bec   :  { %3217 = vmatmul.mubr.msk.bf16.vlgmr.msra.gmra.mxu0 %vm1697_vm6, %v2269_v20 }
0x1bed   :  { %3264 = vmatprep.mubr.msk.bf16.mxu0 %vm3575_vm0, %v4827_v28 }
0x1cac   :  { %v2323_v2 = vpop.f32.mrf.mxu0 }
0x1cad   :  { %v2330_v59 = vmul.f32 0.35355338, %v2323_v2 }
0x1cae   :  { %v3218_v0 = vpop.f32.mrf.mxu0 }
0x1caf   :  { %v2332_v46 = vadd.f32 %v2330_v59, %v3852_v51 }
0x1cb0   :  { %v2326_v47 = vpop.f32.mrf.mxu0 }
0x1cb1   :  { %v2331_v9 = vmul.f32 0.35355338, %v2326_v47  ;;  %v2334_v60 = vsel %vm141_vm1, %v2332_v46, -inf }
0x1cb2   :  { %2335 = vmax.xlane.f32.xlu1 %v2334_v60  ;;  %v3219_v24 = vpop.f32.mrf.mxu0 }
0x1cb3   :  { %v2333_v11 = vadd.f32 %v2331_v9, %v3855_v19 }
0x1cb5   :  { %v2337_v54 = vsel %vm141_vm1, %v2333_v11, -inf }
0x1cb6   :  { %2338 = vmax.xlane.f32.xlu0 %v2337_v54 }
0x1cc3   :  { %3377 = vrot.lane.b32.xlu1 %v3376_v34, %s3578_s22 }
0x1cc7   :  { %3382 = vrot.lane.b32.xlu1 %v3381_v38, %s3578_s22 }
0x1ccc   :  { %3372 = vrot.lane.b32.xlu0 %v3371_v27, %s3578_s22 }
0x1cd0   :  { %2413 = vrot.lane.b32.xlu0 %v4306_v43, %s3579_s16 }
0x1d3b   :  { %v2336_v51 = vpop.xlane.xlu1 %2335 }
0x1d3c   :  { %v2340_v19 = vsub.f32 %v2332_v46, %v2336_v51 }
0x1d3e   :  { %v2342_v1 = vmul.f32 1.442695, %v2340_v19 }
0x1d3f   :  { %v2339_v21 = vpop.xlane.xlu0 %2338  ;;  %v3378_v25 = vpop.permute.xlu1 %3377 }
0x1d40   :  { %v2341_v48 = vsub.f32 %v2333_v11, %v2339_v21  ;;  %3527 = vpow2.f32 %v2342_v1  ;;  %v3380_v6 = vunpack.i.h.bf16 %v3378_v25  ;;  %v3379_v38 = vunpack.i.l.bf16 %v3378_v25  ;;  %v3470_v21 = vld [vmem:[%s4807_s1 + $0x200] ss:$8 sps:$4 sm:$0xff]   ;;  %v3471_v25 = vld [vmem:[%s4807_s1 + $0x74] ss:$8 sps:$4 sm:$0xff]  }
0x1d41   :  { %3249 = vmatpush3.bf16.msra.mxu0 %v3471_v25 }
0x1d42   :  { %v2344_v36 = vmul.f32 1.442695, %v2341_v48  ;;  %v2264_v27 = vsel %vm1697_vm6, %v3380_v6, %v4409_v16  ;;  %v2263_v26 = vsel %vm1697_vm6, %v3379_v38, %v4415_v41  ;;  %v3472_v48 = vld [vmem:[%s4807_s1 + $0x64] ss:$8 sps:$4 sm:$0xff]   ;;  %3250 = vmatprep.subr.bf16.mxu0 %v4827_v28 }
0x1d43   :  { %v3373_v34 = vpop.permute.xlu0 %3372  ;;  %v3383_v10 = vpop.permute.xlu1 %3382  ;;  %v2348_v39 = vpack.c.bf16 %v2264_v27, %v2263_v26  ;;  %v2489_v26 = vld [vmem:[%s4808_s2 + $0x55] ss:$0 sm:$0xff] }
0x1d44   :  { %3529 = vpow2.f32 %v2344_v36  ;;  %v3375_v63 = vunpack.i.h.bf16 %v3373_v34  ;;  %v3374_v58 = vunpack.i.l.bf16 %v3373_v34  ;;  %v3385_v23 = vunpack.i.h.bf16 %v3383_v10  ;;  %v3473_v36 = vld [vmem:[%s4807_s1 + $0x54] ss:$8 sps:$4 sm:$0xff]   ;;  %v3474_v34 = vld [vmem:[%s4807_s1 + $0x44] ss:$8 sps:$4 sm:$0xff]  }
0x1d45   :  { %v3384_v42 = vunpack.i.l.bf16 %v3383_v10  ;;  %3251 = vmatpush3.bf16.msra.mxu0 %v3472_v48 }
0x1d46   :  { %v2266_v17 = vsel %vm1697_vm6, %v3375_v63, %v4397_v62  ;;  %v2265_v43 = vsel %vm1697_vm6, %v3374_v58, %v4399_v52  ;;  %v2262_v40 = vsel %vm1697_vm6, %v3385_v23, %v4407_v55  ;;  %3252 = vmatprep.subr.bf16.mxu0 %v4827_v28  ;;  %v3475_v63 = vld [vmem:[%s4807_s1 + $0x34] ss:$8 sps:$4 sm:$0xff]  }
0x1d47   :  { %v2349_v5 = vpack.c.bf16 %v2266_v17, %v2265_v43  ;;  %v2261_v62 = vsel %vm1697_vm6, %v3384_v42, %v4413_v30  ;;  %v2414_v12 = vpop.permute.xlu0 %2413 }
0x1d48   :  { %v2347_v16 = vpack.c.bf16 %v2262_v40, %v2261_v62  ;;  %v2492_v40 = vld [vmem:[%s4808_s2 + $0x56] ss:$0 sm:$0xff] }
0x1d49   :  { %3223 = vmatpush3.bf16.msra.mxu1 %v2349_v5  ;;  %3253 = vmatpush3.bf16.msra.mxu0 %v3473_v36  ;;  %v2694_v36 = vld [vmem:[%s4808_s2 + $0x57] ss:$0 sm:$0xff] }
0x1d4a   :  { %3224 = vmatprep.subr.bf16.mxu1 %v4827_v28  ;;  %3254 = vmatprep.subr.bf16.mxu0 %v4827_v28 }
0x1d4d   :  { %3225 = vmatpush3.bf16.msra.mxu1 %v2348_v39  ;;  %v3528_v52 = vpop.eup %3527  ;;  %3255 = vmatpush3.bf16.msra.mxu0 %v3474_v34 }
0x1d4e   :  { %3226 = vmatprep.subr.bf16.mxu1 %v4827_v28  ;;  %3256 = vmatprep.subr.bf16.mxu0 %v4827_v28 }
0x1d51   :  { %v3530_v44 = vpop.eup %3529  ;;  %3227 = vmatpush3.bf16.msra.mxu1 %v2347_v16  ;;  %3257 = vmatpush3.bf16.msra.mxu0 %v3475_v63  ;;  %v2697_v63 = vld [vmem:[%s4808_s2 + $0x60] ss:$0 sm:$0xff] }
0x1d52   :  { %v2346_v41 = vpack.c.bf16 %v3530_v44, %v3528_v52  ;;  %3232 = vmatprep.subr.bf16.mxu1 %v4827_v28  ;;  %3258 = vmatprep.subr.bf16.mxu0 %v4827_v28 }
0x1d54   :  { %3229 = vmatmul.mubr.msk.bf16.vlgmr.msra.gmra.mxu1 %vm141_vm1, %v2346_v41  ;;  %v3476_v41 = vld [vmem:[%s4807_s1 + $0x24] ss:$8 sps:$4 sm:$0xff]  }
0x1d55   :  { %3236 = vmatprep.mubr.msk.bf16.mxu1 %vm3575_vm0, %v4827_v28  ;;  %3233 = vmatpush3.bf16.msra.mxu1 %v2414_v12  ;;  %v3477_v12 = vld [vmem:[%s4807_s1 + $0x14] ss:$8 sps:$4 sm:$0xff]  }
0x1d56   :  { %3234 = vmatprep.subr.bf16.mxu1 %v4827_v28  ;;  %3259 = vmatpush3.bf16.msra.mxu0 %v3476_v41 }
0x1d57   :  { %3260 = vmatprep.subr.bf16.mxu0 %v4827_v28 }
0x1d5a   :  { %3261 = vmatpush3.bf16.msra.mxu0 %v3477_v12 }
0x1d5b   :  { %3262 = vmatprep.subr.bf16.mxu0 %v4827_v28 }
0x1e14   :  { %v2388_v55 = vpop.f32.mrf.mxu1 }
0x1e15   :  { %v2395_v30 = vmax.f32 %v2388_v55, 1e-30 }
0x1e16   :  { %v3230_v32 = vpop.f32.mrf.mxu1 }
0x1e17   :  { %3531 = vrcp.f32 %v2395_v30  ;;  %v2500_v30 = vld [vmem:[%s4808_s2 + $0x51] ss:$0 sm:$0xff] }
0x1e18   :  { %v2391_v7 = vpop.f32.mrf.mxu1 }
0x1e19   :  { %v2396_v50 = vmax.f32 %v2391_v7, 1e-30 }
0x1e1a   :  { %v3231_v53 = vpop.f32.mrf.mxu1 }
0x1e1b   :  { %3533 = vrcp.f32 %v2396_v50 }
0x1e24   :  { %v3532_v29 = vpop.eup %3531 }
0x1e25   :  { %2401 = vrot.lane.b32.xlu1 %v3532_v29, %s3578_s22 }
0x1e28   :  { %v3534_v8 = vpop.eup %3533 }
0x1e29   :  { %2411 = vrot.lane.b32.xlu1 %v4313_v3, %s3579_s16  ;;  %2403 = vrot.lane.b32.xlu0 %v3534_v8, %s3578_s22  ;;  %v2410_v3 = vld [vmem:[%s4808_s2 + $0x50] ss:$0 sm:$0xff] }
0x1e97   :  { %v2402_v37 = vpop.permute.xlu1 %2401 }
0x1e98   :  { %v2407_v14 = vmul.f32 %v2402_v37, %v2388_v55  ;;  %v3478_v55 = vld [vmem:[%s4807_s1 + $0x4] ss:$8 sps:$4 sm:$0xff]  }
0x1e99   :  { %3263 = vmatpush3.bf16.msra.mxu0 %v3478_v55 }
0x1e9b   :  { %v2412_v49 = vpop.permute.xlu1 %2411  ;;  %v2404_v4 = vpop.permute.xlu0 %2403 }
0x1e9c   :  { %v2408_v31 = vmul.f32 %v2404_v4, %v2391_v7  ;;  %3235 = vmatpush3.bf16.msra.mxu1 %v2412_v49 }
0x1e9d   :  { %3240 = vmatprep.subr.bf16.mxu1 %v4827_v28 }
0x1e9e   :  { %v2409_v57 = vpack.c.bf16 %v2408_v31, %v2407_v14  ;;  %v2576_v14 = vld [vmem:[%s4808_s2 + $0x52] ss:$0 sm:$0xff] }
0x1ea0   :  { %3237 = vmatmul.mubr.msk.bf16.vlgmr.msra.gmra.mxu1 %vm1697_vm6, %v2409_v57 }
0x1ea1   :  { %3244 = vmatprep.mubr.msk.bf16.mxu1 %vm3575_vm0, %v4827_v28 }
0x1f60   :  { %v2454_v33 = vpop.f32.mrf.mxu1 }
0x1f61   :  { %v2455_v56 = vadd.f32 %v2454_v33, %v2410_v3 }
0x1f62   :  { %v3238_v35 = vpop.f32.mrf.mxu1 }
0x1f63   :  { %v2461_v45 = vadd.f32 %v2455_v56, %v4629_v13 }
0x1f64   :  { %v2457_v18 = vpop.f32.mrf.mxu1 }
0x1f65   :  { %v2458_v20 = vadd.f32 %v2457_v18, %v2410_v3  ;;  %v2463_v2 = vsel %vm1697_vm6, %v2461_v45, 0.0 }
0x1f66   :  { %2464 = vadd.xlane.f32.xlu0 %v2463_v2  ;;  %v3239_v59 = vpop.f32.mrf.mxu1 }
0x1f67   :  { %v2462_v0 = vadd.f32 %v2458_v20, %v4631_v22  ;;  %v3469_v22 = vld [vmem:[%s4807_s1 + $0x210] ss:$8 sps:$4 sm:$0xff]  }
0x1f68   :  { %3241 = vmatpush3.bf16.msra.mxu1 %v3469_v22 }
0x1f69   :  { %v2466_v46 = vsel %vm1697_vm6, %v2462_v0, 0.0  ;;  %3242 = vmatprep.subr.bf16.mxu1 %v4827_v28 }
0x1f6a   :  { %2467 = vadd.xlane.f32.xlu1 %v2466_v46 }
0x1f6c   :  { %3243 = vmatpush3.bf16.msra.mxu1 %v3470_v21 }
0x1f6d   :  { %3268 = vmatprep.subr.bf16.mxu1 %v4827_v28 }
0x1fef   :  { %v2465_v47 = vpop.xlane.xlu0 %2464 }
0x1ff0   :  { %v2469_v9 = vmul.f32 0.03125, %v2465_v47 }
0x1ff2   :  { %v2471_v60 = vsub.f32 %v2461_v45, %v2469_v9 }
0x1ff3   :  { %v2468_v24 = vpop.xlane.xlu1 %2467 }
0x1ff4   :  { %v2470_v11 = vmul.f32 0.03125, %v2468_v24  ;;  %v2473_v54 = vmul.f32 %v2471_v60, %v2471_v60 }
0x1ff6   :  { %v2472_v51 = vsub.f32 %v2462_v0, %v2470_v11  ;;  %v2475_v13 = vsel %vm1697_vm6, %v2473_v54, 0.0 }
0x1ff7   :  { %2476 = vadd.xlane.f32.xlu0 %v2475_v13 }
0x1ff8   :  { %v2474_v19 = vmul.f32 %v2472_v51, %v2472_v51 }
0x1ffa   :  { %v2478_v1 = vsel %vm1697_vm6, %v2474_v19, 0.0 }
0x1ffb   :  { %2479 = vadd.xlane.f32.xlu0 %v2478_v1 }
0x2080   :  { %v2477_v6 = vpop.xlane.xlu0 %2476 }
0x2081   :  { %v2481_v38 = vmul.f32 0.03125, %v2477_v6 }
0x2083   :  { %v2483_v58 = vadd.f32 1e-05, %v2481_v38 }
0x2084   :  { %v2480_v10 = vpop.xlane.xlu0 %2479 }
0x2085   :  { %3535 = vrsqrt.f32 %v2483_v58  ;;  %v2482_v17 = vmul.f32 0.03125, %v2480_v10 }
0x2087   :  { %v2484_v43 = vadd.f32 1e-05, %v2482_v17 }
0x2089   :  { %3537 = vrsqrt.f32 %v2484_v43 }
0x2092   :  { %v3536_v5 = vpop.eup %3535 }
0x2093   :  { %v2487_v27 = vmul.f32 %v3536_v5, %v2471_v60 }
0x2095   :  { %v2490_v39 = vmul.f32 %v2489_v26, %v2487_v27 }
0x2096   :  { %v3538_v23 = vpop.eup %3537 }
0x2097   :  { %v2488_v42 = vmul.f32 %v3538_v23, %v2472_v51  ;;  %v2493_v52 = vadd.f32 %v2492_v40, %v2490_v39 }
0x2099   :  { %v2491_v62 = vmul.f32 %v2489_v26, %v2488_v42 }
0x209b   :  { %v2494_v16 = vadd.f32 %v2492_v40, %v2491_v62 }
0x209d   :  { %v2499_v44 = vpack.c.bf16 %v2494_v16, %v2493_v52 }
0x209f   :  { %3245 = vmatmul.mubr.msk.bf16.vlgmr.msra.gmra.mxu1 %vm1697_vm6, %v2499_v44 }
0x20a0   :  { %3272 = vmatprep.mubr.msk.bf16.mxu1 %vm3575_vm0, %v4827_v28 }
0x215f   :  { %v2550_v32 = vpop.f32.mrf.mxu1 }
0x2160   :  { %v2551_v50 = vadd.f32 %v2550_v32, %v2500_v30 }
0x2161   :  { %v3246_v7 = vpop.f32.mrf.mxu1 }
0x2162   :  { %v2557_v37 = vmax.f32 %v2551_v50, 0.0 }
0x2163   :  { %v2553_v53 = vpop.f32.mrf.mxu1 }
0x2164   :  { %v2554_v29 = vadd.f32 %v2553_v53, %v2500_v30 }
0x2165   :  { %v3247_v8 = vpop.f32.mrf.mxu1 }
0x2166   :  { %v2558_v49 = vmax.f32 %v2554_v29, 0.0 }
0x2168   :  { %v2575_v4 = vpack.c.bf16 %v2558_v49, %v2557_v37 }
0x216a   :  { %3265 = vmatmul.mubr.bf16.vlgmr.msra.gmra.mxu0 %v2575_v4 }
0x222a   :  { %v2659_v31 = vpop.f32.mrf.mxu0 }
0x222b   :  { %v2660_v57 = vadd.f32 %v2659_v31, %v2576_v14 }
0x222c   :  { %v3266_v3 = vpop.f32.mrf.mxu0 }
0x222d   :  { %v2666_v33 = vadd.f32 %v2660_v57, %v2493_v52 }
0x222e   :  { %v2662_v56 = vpop.f32.mrf.mxu0 }
0x222f   :  { %v2663_v35 = vadd.f32 %v2662_v56, %v2576_v14  ;;  %v2668_v45 = vsel %vm1697_vm6, %v2666_v33, 0.0  ;;  %v2729_v14 = vld [vmem:[%s4808_s2 + $0x62] ss:$0 sm:$0xff] }
0x2230   :  { %2669 = vadd.xlane.f32.xlu1 %v2668_v45  ;;  %v3267_v18 = vpop.f32.mrf.mxu0 }
0x2231   :  { %v2667_v20 = vadd.f32 %v2663_v35, %v2494_v16 }
0x2233   :  { %v2671_v2 = vsel %vm1697_vm6, %v2667_v20, 0.0 }
0x2234   :  { %2672 = vadd.xlane.f32.xlu0 %v2671_v2 }
0x22b9   :  { %v2670_v59 = vpop.xlane.xlu1 %2669 }
0x22ba   :  { %v2674_v0 = vmul.f32 0.03125, %v2670_v59 }
0x22bc   :  { %v2676_v46 = vsub.f32 %v2666_v33, %v2674_v0  ;;  %v2733_v33 = vld [vmem:[%s4808_s2 + $0x63] ss:$0 sm:$0xff] }
0x22bd   :  { %v2673_v47 = vpop.xlane.xlu0 %2672 }
0x22be   :  { %v2675_v9 = vmul.f32 0.03125, %v2673_v47  ;;  %v2678_v60 = vmul.f32 %v2676_v46, %v2676_v46 }
0x22c0   :  { %v2677_v24 = vsub.f32 %v2667_v20, %v2675_v9  ;;  %v2680_v11 = vsel %vm1697_vm6, %v2678_v60, 0.0 }
0x22c1   :  { %2681 = vadd.xlane.f32.xlu1 %v2680_v11 }
0x22c2   :  { %v2679_v54 = vmul.f32 %v2677_v24, %v2677_v24 }
0x22c4   :  { %v2683_v51 = vsel %vm1697_vm6, %v2679_v54, 0.0 }
0x22c5   :  { %2684 = vadd.xlane.f32.xlu0 %v2683_v51 }
0x234a   :  { %v2682_v13 = vpop.xlane.xlu1 %2681 }
0x234b   :  { %v2686_v19 = vmul.f32 0.03125, %v2682_v13 }
0x234d   :  { %v2688_v1 = vadd.f32 1e-05, %v2686_v19 }
0x234e   :  { %v2685_v22 = vpop.xlane.xlu0 %2684 }
0x234f   :  { %3539 = vrsqrt.f32 %v2688_v1  ;;  %v2687_v21 = vmul.f32 0.03125, %v2685_v22 }
0x2351   :  { %v2689_v25 = vadd.f32 1e-05, %v2687_v21 }
0x2353   :  { %3541 = vrsqrt.f32 %v2689_v25 }
0x235c   :  { %v3540_v48 = vpop.eup %3539 }
0x235d   :  { %v2692_v34 = vmul.f32 %v3540_v48, %v2676_v46 }
0x235f   :  { %v2695_v6 = vmul.f32 %v2694_v36, %v2692_v34 }
0x2360   :  { %v3542_v38 = vpop.eup %3541 }
0x2361   :  { %v2698_v58 = vadd.f32 %v2697_v63, %v2695_v6  ;;  %v2693_v10 = vmul.f32 %v3542_v38, %v2677_v24 }
0x2363   :  { %v2700_v17 = vsel %vm1697_vm6, %v2698_v58, 0.0  ;;  %v2696_v43 = vmul.f32 %v2694_v36, %v2693_v10 }
0x2364   :  { %2701 = vadd.xlane.f32.xlu1 %v2700_v17 }
0x2365   :  { %v2699_v5 = vadd.f32 %v2697_v63, %v2696_v43 }
0x2367   :  { %v2703_v27 = vsel %vm1697_vm6, %v2699_v5, 0.0 }
0x2368   :  { %2704 = vadd.xlane.f32.xlu0 %v2703_v27 }
0x23ed   :  { %v2702_v26 = vpop.xlane.xlu1 %2701 }
0x23ee   :  { %v2706_v23 = vmul.f32 0.03125, %v2702_v26 }
0x23f0   :  { %v2708_v42 = vsub.f32 %v2698_v58, %v2706_v23 }
0x23f1   :  { %v2705_v39 = vpop.xlane.xlu0 %2704 }
0x23f2   :  { %v2707_v40 = vmul.f32 0.03125, %v2705_v39  ;;  %v2710_v62 = vmul.f32 %v2708_v42, %v2708_v42 }
0x23f4   :  { %v2709_v52 = vsub.f32 %v2699_v5, %v2707_v40  ;;  %v2712_v16 = vsel %vm1697_vm6, %v2710_v62, 0.0 }
0x23f5   :  { %2713 = vadd.xlane.f32.xlu1 %v2712_v16 }
0x23f6   :  { %v2711_v44 = vmul.f32 %v2709_v52, %v2709_v52 }
0x23f8   :  { %v2715_v41 = vsel %vm1697_vm6, %v2711_v44, 0.0 }
0x23f9   :  { %2716 = vadd.xlane.f32.xlu0 %v2715_v41 }
0x2406   :  { %2736 = vrot.lane.b32.xlu1 %v4460_v61, %s3573_s14  ;;  %v2726_v61 = vld [vmem:[%s4808_s2 + $0x61] ss:$0 sm:$0xff] }
0x240f   :  { %2734 = vrot.lane.b32.xlu0 %v4469_v15, %s3573_s14 }
0x247e   :  { %v2714_v12 = vpop.xlane.xlu1 %2713 }
0x247f   :  { %v2718_v55 = vmul.f32 0.03125, %v2714_v12 }
0x2481   :  { %v2720_v30 = vadd.f32 1e-05, %v2718_v55 }
0x2482   :  { %v2717_v32 = vpop.xlane.xlu0 %2716  ;;  %v2737_v7 = vpop.permute.xlu1 %2736 }
0x2483   :  { %3543 = vrsqrt.f32 %v2720_v30  ;;  %v2719_v50 = vmul.f32 0.03125, %v2717_v32  ;;  %3269 = vmatpush3.bf16.msra.mxu1 %v2737_v7 }
0x2484   :  { %3270 = vmatprep.subr.bf16.mxu1 %v4827_v28 }
0x2485   :  { %v2721_v53 = vadd.f32 1e-05, %v2719_v50 }
0x2486   :  { %v2735_v29 = vpop.permute.xlu0 %2734 }
0x2487   :  { %3545 = vrsqrt.f32 %v2721_v53  ;;  %3271 = vmatpush3.bf16.msra.mxu1 %v2735_v29 }
0x2490   :  { %v3544_v8 = vpop.eup %3543 }
0x2491   :  { %v2724_v37 = vmul.f32 %v3544_v8, %v2708_v42 }
0x2493   :  { %v2727_v4 = vmul.f32 %v2726_v61, %v2724_v37 }
0x2494   :  { %v3546_v15 = vpop.eup %3545 }
0x2495   :  { %v2725_v49 = vmul.f32 %v3546_v15, %v2709_v52  ;;  %v2730_v57 = vadd.f32 %v2729_v14, %v2727_v4 }
0x2497   :  { %v2728_v31 = vmul.f32 %v2726_v61, %v2725_v49 }
0x2499   :  { %v2731_v28 = vadd.f32 %v2729_v14, %v2728_v31 }
0x249b   :  { %v2732_v3 = vpack.c.bf16 %v2731_v28, %v2730_v57 }
0x249d   :  { %3273 = vmatmul.mubr.msk.bf16.vlgmr.msra.gmra.mxu1 %vm1697_vm6, %v2732_v3 }
0x255d   :  { %v2777_v56 = vpop.f32.mrf.mxu1 }
0x255e   :  { %v2778_v35 = vadd.f32 %v2777_v56, %v2733_v33 }
0x255f   :  { %v3274_v45 = vpop.f32.mrf.mxu1 }
0x2560   :  { %2784 = vst.msk [vmem:[#allocation2] sm:$0xff] %vm141_vm1, %v2778_v35 }
0x2561   :  { %v2780_v18 = vpop.f32.mrf.mxu1 }
0x2562   :  { %v2781_v20 = vadd.f32 %v2780_v18, %v2733_v33 }
0x2563   :  { %v3275_v2 = vpop.f32.mrf.mxu1 }
0x2564   :  { %2785 = vst.msk [vmem:[#allocation2 + $0x8] sm:$0xff] %vm141_vm1, %v2781_v20 }
0x2565   :  { %3562 = shalt.err (!%p3559_p4)
}
0x2566   :  { %s3581_s2 = smov 128   ;;  %s3582_s17 = smov 8  }
0x2567   :  { %2797 = dma.vmem_to_hbm [thread:$0]  %s2792_s13, 256, %s4809_s3, [#allocation3], %s3581_s2, %s3581_s2, %s3582_s17  }
0x2568   :  { %3571 = dma.done.wait [#allocation3], 256  }
0x2569   :  { %3572 = vsyncadd [#allocation3], 4294967040 }
0x256a   :  { %2801 = vsyncpa [#allocation3], 1 }

</bundles_post_ra>
